<compile_context>
chip_gen: v7x
topology: tpu7x:2x2x1
jax: 0.10.0
libtpu: 0.0.40
codegen_flags: <defaults>
</compile_context>

<pallas_src>
import functools

import jax
import jax.numpy as jnp
from jax.experimental import pallas as pl
from jax.experimental.pallas import tpu as pltpu


def _attention_kernel(x_ref, wq_ref, wkv_ref, wout_ref, bout_ref, o_ref,
                      k_scr, v_scr, *, heads, dim_head, inner):
    # x_ref:    (N, D)          full sequence of one batch element (batch dim squeezed)
    # wq_ref:   (heads, D, dh)  per-head Q weights (softmax scale pre-folded on host)
    # wkv_ref:  (D, 2*inner)    fused [K | V] projection weights
    # wout_ref: (heads, dh, D)  per-head output-projection weights
    # bout_ref: (1, D)          output bias
    # o_ref:    (TQ, D)         output tile
    # k_scr:    (heads, dh, N)  VMEM scratch: K stored TRANSPOSED (lane-dense along N)
    # v_scr:    (heads, N, dh)  VMEM scratch
    qi = pl.program_id(1)
    cdt = x_ref.dtype                       # MXU operand dtype (bf16 or f32)
    low_precision = cdt == jnp.bfloat16
    tq = o_ref.shape[0]
    d_model = x_ref.shape[1]

    # ---- K / V projection: ONE fused matmul, once per batch element, reused after.
    @pl.when(qi == 0)
    def _():
        kv = jnp.dot(x_ref[...], wkv_ref[...],
                     preferred_element_type=jnp.float32)            # (N, 2*inner) f32
        for h in range(heads):
            k_h = kv[:, h * dim_head:(h + 1) * dim_head]            # (N, dh)
            v_h = kv[:, inner + h * dim_head:inner + (h + 1) * dim_head]
            # Transpose K once per batch element so every q-tile's score matmul is a
            # natural [TQ, dh] x [dh, N] MXU feed with a lane-dense scratch.
            k_scr[h] = k_h.T.astype(k_scr.dtype)
            v_scr[h] = v_h.astype(v_scr.dtype)
            # TODO(synk): for very long N keep V flat (N, inner) to avoid 4x lane
            # padding of the V scratch (matters on v7x's 64 MiB VMEM).

    # ---- q-tile of the sequence (single x input; no duplicate q-tile DMA).
    start = pl.multiple_of(qi * tq, tq)
    xq = x_ref[pl.ds(start, tq), :]                                 # (TQ, D)

    # ---- per-head attention; heads is small & static so this unrolls into plain
    # 2-D matmuls with zero activation relayouts.
    acc = jnp.zeros((tq, d_model), jnp.float32)
    for h in range(heads):
        # Q projection (scale already folded into wq on the host).
        q_h = jnp.dot(xq, wq_ref[h],
                      preferred_element_type=jnp.float32).astype(cdt)     # (TQ, dh)
        # scores against transposed K -- no per-tile RHS relayout.
        s_h = jnp.dot(q_h, k_scr[h], preferred_element_type=jnp.float32)  # (TQ, N) f32
        m_h = jnp.max(s_h, axis=-1, keepdims=True)
        z_h = s_h - m_h
        # exp in bf16 when operands are bf16 (v6e/v7x EUP supports bf16); f32 else
        # (v5e-safe / f32 inputs).
        e_h = jnp.exp(z_h.astype(cdt)) if low_precision else jnp.exp(z_h)
        denom = jnp.sum(e_h.astype(jnp.float32), axis=-1, keepdims=True)  # f32 accum
        # PV with UNNORMALIZED probabilities; normalize after the matmul on the
        # small (TQ, dh) tensor instead of the (TQ, N) one.
        pv_h = jnp.dot(e_h, v_scr[h], preferred_element_type=jnp.float32)  # (TQ, dh)
        pv_h = pv_h * pl.reciprocal(denom, approx=True)                    # EUP slot
        # head-merge fused with the output projection: acc += pv_h @ Wout_h
        # (a joint 'hqd,hdD->qD' contraction would require a pv relayout; keep
        #  per-head + VPU accumulation).
        acc = acc + jnp.dot(pv_h.astype(cdt), wout_ref[h],
                            preferred_element_type=jnp.float32)            # (TQ, D)

    o_ref[...] = (acc + bout_ref[...].astype(jnp.float32)).astype(o_ref.dtype)


def attention_forward(x, w_qkv, w_out, b_out, *, heads, dim_head, q_block=None):
    """x: (B, N, D); w_qkv: (D, 3*heads*dim_head) columns ordered [q | k | v];
    w_out: (heads*dim_head, D); b_out: (D,).

    Operand dtypes are preserved (pass bf16 for MXU peak throughput; accumulation is
    always f32 inside the kernel).
    """
    B, N, D = x.shape
    inner = heads * dim_head
    assert w_qkv.shape == (D, 3 * inner)
    assert w_out.shape == (inner, D)
    scale = dim_head ** -0.5

    if q_block is None:
        # 256 fills the 256-wide MXU on v6e/v7x; pass q_block=128 explicitly on v5e.
        if N >= 256 and N % 256 == 0:
            q_block = 256
        elif N >= 128 and N % 128 == 0:
            q_block = 128
        else:
            q_block = N
    # TODO(synk): real ViT lengths (e.g. N=197) need host-side padding to a multiple
    # of 128 plus -inf masking of the padded keys; not implemented here.
    assert N % q_block == 0, "N must be divisible by q_block"
    assert q_block == N or q_block % 8 == 0, "q_block must be sublane-aligned"
    nq = N // q_block

    # ---- one-time host-side weight re-layout (free under jit).
    wq = (w_qkv[:, :inner].astype(jnp.float32) * scale).astype(w_qkv.dtype)
    wq_h = jnp.transpose(wq.reshape(D, heads, dim_head), (1, 0, 2))    # (heads, D, dh)
    w_kv = w_qkv[:, inner:]                                            # (D, 2*inner)
    w_out_h = w_out.reshape(heads, dim_head, D)                        # (heads, dh, D)
    b_out2d = b_out.reshape(1, D)

    kernel = functools.partial(_attention_kernel,
                               heads=heads, dim_head=dim_head, inner=inner)

    # ---- explicit VMEM budget (v7x: 64 MiB physical / 32 MiB default scoped).
    def _pad(n, m):
        return -(-n // m) * m
    it = x.dtype.itemsize
    est = 2 * _pad(N, 8) * _pad(D, 128) * it                      # x block (dbl-buffered)
    est += 2 * q_block * _pad(D, 128) * it                        # output tile
    est += 2 * heads * D * _pad(dim_head, 128) * it               # wq (lane-padded)
    est += 2 * D * _pad(2 * inner, 128) * it                      # wkv
    est += 2 * heads * _pad(dim_head, 8) * _pad(D, 128) * it      # wout
    est += heads * _pad(dim_head, 8) * _pad(N, 128) * it          # K scratch
    est += heads * _pad(N, 8) * _pad(dim_head, 128) * it          # V scratch
    est += 4 * (q_block * _pad(N, 128) + N * _pad(2 * inner, 128)) * 4  # f32 headroom
    vmem_limit = int(min(64 << 20, max(32 << 20, 2 * est)))

    return pl.pallas_call(
        kernel,
        out_shape=jax.ShapeDtypeStruct((B, N, D), x.dtype),
        grid_spec=pltpu.PrefetchScalarGridSpec(
            num_scalar_prefetch=0,
            grid=(B, nq),
            in_specs=[
                # full sequence of one batch element; block index is constant across
                # qi, so it is fetched once per batch element and reused by q-tiles.
                pl.BlockSpec((None, N, D), lambda b, qi: (b, 0, 0)),
                pl.BlockSpec((heads, D, dim_head), lambda b, qi: (0, 0, 0)),
                pl.BlockSpec((D, 2 * inner), lambda b, qi: (0, 0)),
                pl.BlockSpec((heads, dim_head, D), lambda b, qi: (0, 0, 0)),
                pl.BlockSpec((1, D), lambda b, qi: (0, 0)),
            ],
            out_specs=pl.BlockSpec((None, q_block, D), lambda b, qi: (b, qi, 0)),
            scratch_shapes=[
                pltpu.VMEM((heads, dim_head, N), x.dtype),   # K, transposed, reused
                pltpu.VMEM((heads, N, dim_head), x.dtype),   # V
            ],
        ),
        compiler_params=pltpu.CompilerParams(
            # batch axis megacore-parallel; the q-tile axis MUST stay sequential
            # ("arbitrary"): the K/V scratch written at qi == 0 is reused by later
            # q-tiles of the same batch element.
            dimension_semantics=("parallel", "arbitrary"),
            vmem_limit_bytes=vmem_limit),
    )(x, wq_h, w_kv, w_out_h, b_out2d)


def attention_reference(x, w_qkv, w_out, b_out, *, heads, dim_head):
    """Plain-JAX reference mirroring the PyTorch forward."""
    B, N, D = x.shape
    inner = heads * dim_head
    scale = dim_head ** -0.5
    qkv = jnp.einsum('bnd,de->bne', x, w_qkv)
    q, k, v = jnp.split(qkv, 3, axis=-1)

    def to_heads(t):  # 'b n (h d) -> b h n d'
        return t.reshape(B, N, heads, dim_head).transpose(0, 2, 1, 3)

    q, k, v = map(to_heads, (q, k, v))
    dots = jnp.einsum('bhnd,bhmd->bhnm', q, k) * scale
    attn = jax.nn.softmax(dots, axis=-1)
    out = jnp.einsum('bhnm,bhmd->bhnd', attn, v)
    out = out.transpose(0, 2, 1, 3).reshape(B, N, inner)       # 'b h n d -> b n (h d)'
    return jnp.einsum('bni,id->bnd', out, w_out) + b_out


if __name__ == "__main__":
    # Small, lane-dense shapes (last dims multiples of 128) consistent with the module.
    B, N, dim = 2, 256, 128
    heads, dim_head = 4, 32
    inner = heads * dim_head                      # 128 -> project_out = True

    key = jax.random.PRNGKey(0)
    kx, kqkv, kout, kb = jax.random.split(key, 4)

    x = jax.random.normal(kx, (B, N, dim), dtype=jnp.float32)
    # Deterministic synthetic parameter init (uniform, roughly Linear-like scale).
    w_qkv = jax.random.uniform(kqkv, (dim, 3 * inner), jnp.float32,
                               minval=-dim ** -0.5, maxval=dim ** -0.5)
    w_out = jax.random.uniform(kout, (inner, dim), jnp.float32,
                               minval=-inner ** -0.5, maxval=inner ** -0.5)
    b_out = jax.random.uniform(kb, (dim,), jnp.float32,
                               minval=-inner ** -0.5, maxval=inner ** -0.5)

    y_ref = attention_reference(x, w_qkv, w_out, b_out, heads=heads, dim_head=dim_head)

    # f32 path, q_block=128 -> two q-tiles per batch element (exercises the per-batch
    # K/V scratch reuse across q-tiles).
    y = attention_forward(x, w_qkv, w_out, b_out,
                          heads=heads, dim_head=dim_head, q_block=128)
    y = jax.block_until_ready(y)
    assert y.shape == (B, N, dim)
    assert jnp.allclose(y, y_ref, atol=2e-2, rtol=2e-2), "f32 mismatch vs reference"

    # bf16 path (default q_block -> 256 single tile; bf16 MXU operands, f32
    # accumulation, bf16 exp, f32 softmax denominator).
    yb = attention_forward(x.astype(jnp.bfloat16),
                           w_qkv.astype(jnp.bfloat16),
                           w_out.astype(jnp.bfloat16),
                           b_out.astype(jnp.bfloat16),
                           heads=heads, dim_head=dim_head)
    yb = jax.block_until_ready(yb)
    max_err = float(jnp.max(jnp.abs(yb.astype(jnp.float32) - y_ref)))
    assert max_err < 0.15, f"bf16 mismatch vs reference (max abs err {max_err})"

    print("KERNEL_OK")
</pallas_src>

<mosaic_0001>
module attributes {stable_mosaic.version = 11 : i64} {
  func.func @_attention_kernel(%arg0: i32, %arg1: i32, %arg2: memref<1x256x128xf32, #tpu.memory_space<vmem>>, %arg3: memref<4x128x32xf32, #tpu.memory_space<vmem>>, %arg4: memref<128x256xf32, #tpu.memory_space<vmem>>, %arg5: memref<4x32x128xf32, #tpu.memory_space<vmem>>, %arg6: memref<1x128xf32, #tpu.memory_space<vmem>>, %arg7: memref<1x128x128xf32, #tpu.memory_space<vmem>>, %arg8: memref<4x32x256xf32, #tpu.memory_space<vmem>>, %arg9: memref<4x256x32xf32, #tpu.memory_space<vmem>>) attributes {dimension_semantics = [#tpu.dimension_semantics<parallel>, #tpu.dimension_semantics<arbitrary>], iteration_bounds = array<i64: 2, 2>, scalar_prefetch = 0 : i64, scratch_operands = 2 : i64, tpu.core_type = #tpu.core_type<tc>, window_params = [{transform_indices = @transform_0, window_bounds = array<i64: 1, 256, 128>}, {pipeline_mode = #tpu.pipeline_mode<synchronous>, transform_indices = @transform_1, window_bounds = array<i64: 4, 128, 32>}, {pipeline_mode = #tpu.pipeline_mode<synchronous>, transform_indices = @transform_2, window_bounds = array<i64: 128, 256>}, {pipeline_mode = #tpu.pipeline_mode<synchronous>, transform_indices = @transform_3, window_bounds = array<i64: 4, 32, 128>}, {pipeline_mode = #tpu.pipeline_mode<synchronous>, transform_indices = @transform_4, window_bounds = array<i64: 1, 128>}, {transform_indices = @transform_5, window_bounds = array<i64: 1, 128, 128>}]} {
    %c0_i32 = arith.constant 0 : i32
    %0 = arith.cmpi eq, %arg1, %c0_i32 : i32
    %1 = arith.extui %0 : i1 to i32
    %c0_i32_0 = arith.constant 0 : i32
    %2 = arith.cmpi ne, %1, %c0_i32_0 : i32
    scf.if %2 {
      %c0_76 = arith.constant 0 : index
      %c0_77 = arith.constant 0 : index
      %c0_78 = arith.constant 0 : index
      %107 = vector.load %arg2[%c0_76, %c0_77, %c0_78] : memref<1x256x128xf32, #tpu.memory_space<vmem>>, vector<1x256x128xf32>
      %108 = vector.shape_cast %107 : vector<1x256x128xf32> to vector<256x128xf32>
      %c0_79 = arith.constant 0 : index
      %c0_80 = arith.constant 0 : index
      %109 = vector.load %arg4[%c0_79, %c0_80] : memref<128x256xf32, #tpu.memory_space<vmem>>, vector<128x256xf32>
      %cst_81 = arith.constant dense<0.000000e+00> : vector<256x256xf32>
      %110 = tpu.matmul %108, %109, %cst_81 {dimension_numbers = #tpu.dot_dimension_numbers<[1], [0], [0], [1], [0, 0, 1, 1], [], []>} : vector<256x128xf32>, vector<128x256xf32>, vector<256x256xf32> -> vector<256x256xf32>
      %111 = vector.extract_strided_slice %110 {offsets = [0, 0], sizes = [256, 32], strides = [1, 1]} : vector<256x256xf32> to vector<256x32xf32>
      %112 = vector.extract_strided_slice %110 {offsets = [0, 128], sizes = [256, 32], strides = [1, 1]} : vector<256x256xf32> to vector<256x32xf32>
      %113 = tpu.transpose %111, [1, 0] : vector<256x32xf32> -> vector<32x256xf32>
      %c0_82 = arith.constant 0 : index
      %c0_83 = arith.constant 0 : index
      %c0_84 = arith.constant 0 : index
      %114 = vector.load %arg8[%c0_82, %c0_83, %c0_84] : memref<4x32x256xf32, #tpu.memory_space<vmem>>, vector<1x32x256xf32>
      %115 = vector.shape_cast %114 : vector<1x32x256xf32> to vector<32x256xf32>
      %116 = vector.shape_cast %113 : vector<32x256xf32> to vector<1x32x256xf32>
      tpu.vector_store %arg8[%c0_82, %c0_83, %c0_84], %116 {strides = array<i32>} : memref<4x32x256xf32, #tpu.memory_space<vmem>>, vector<1x32x256xf32>,
      %c0_85 = arith.constant 0 : index
      %c0_86 = arith.constant 0 : index
      %c0_87 = arith.constant 0 : index
      %117 = vector.load %arg9[%c0_85, %c0_86, %c0_87] : memref<4x256x32xf32, #tpu.memory_space<vmem>>, vector<1x256x32xf32>
      %118 = vector.shape_cast %117 : vector<1x256x32xf32> to vector<256x32xf32>
      %119 = vector.shape_cast %112 : vector<256x32xf32> to vector<1x256x32xf32>
      tpu.vector_store %arg9[%c0_85, %c0_86, %c0_87], %119 {strides = array<i32>} : memref<4x256x32xf32, #tpu.memory_space<vmem>>, vector<1x256x32xf32>,
      %120 = vector.extract_strided_slice %110 {offsets = [0, 32], sizes = [256, 32], strides = [1, 1]} : vector<256x256xf32> to vector<256x32xf32>
      %121 = vector.extract_strided_slice %110 {offsets = [0, 160], sizes = [256, 32], strides = [1, 1]} : vector<256x256xf32> to vector<256x32xf32>
      %122 = tpu.transpose %120, [1, 0] : vector<256x32xf32> -> vector<32x256xf32>
      %c1_88 = arith.constant 1 : index
      %c0_89 = arith.constant 0 : index
      %c0_90 = arith.constant 0 : index
      %123 = vector.load %arg8[%c1_88, %c0_89, %c0_90] : memref<4x32x256xf32, #tpu.memory_space<vmem>>, vector<1x32x256xf32>
      %124 = vector.shape_cast %123 : vector<1x32x256xf32> to vector<32x256xf32>
      %125 = vector.shape_cast %122 : vector<32x256xf32> to vector<1x32x256xf32>
      tpu.vector_store %arg8[%c1_88, %c0_89, %c0_90], %125 {strides = array<i32>} : memref<4x32x256xf32, #tpu.memory_space<vmem>>, vector<1x32x256xf32>,
      %c1_91 = arith.constant 1 : index
      %c0_92 = arith.constant 0 : index
      %c0_93 = arith.constant 0 : index
      %126 = vector.load %arg9[%c1_91, %c0_92, %c0_93] : memref<4x256x32xf32, #tpu.memory_space<vmem>>, vector<1x256x32xf32>
      %127 = vector.shape_cast %126 : vector<1x256x32xf32> to vector<256x32xf32>
      %128 = vector.shape_cast %121 : vector<256x32xf32> to vector<1x256x32xf32>
      tpu.vector_store %arg9[%c1_91, %c0_92, %c0_93], %128 {strides = array<i32>} : memref<4x256x32xf32, #tpu.memory_space<vmem>>, vector<1x256x32xf32>,
      %129 = vector.extract_strided_slice %110 {offsets = [0, 64], sizes = [256, 32], strides = [1, 1]} : vector<256x256xf32> to vector<256x32xf32>
      %130 = vector.extract_strided_slice %110 {offsets = [0, 192], sizes = [256, 32], strides = [1, 1]} : vector<256x256xf32> to vector<256x32xf32>
      %131 = tpu.transpose %129, [1, 0] : vector<256x32xf32> -> vector<32x256xf32>
      %c2_94 = arith.constant 2 : index
      %c0_95 = arith.constant 0 : index
      %c0_96 = arith.constant 0 : index
      %132 = vector.load %arg8[%c2_94, %c0_95, %c0_96] : memref<4x32x256xf32, #tpu.memory_space<vmem>>, vector<1x32x256xf32>
      %133 = vector.shape_cast %132 : vector<1x32x256xf32> to vector<32x256xf32>
      %134 = vector.shape_cast %131 : vector<32x256xf32> to vector<1x32x256xf32>
      tpu.vector_store %arg8[%c2_94, %c0_95, %c0_96], %134 {strides = array<i32>} : memref<4x32x256xf32, #tpu.memory_space<vmem>>, vector<1x32x256xf32>,
      %c2_97 = arith.constant 2 : index
      %c0_98 = arith.constant 0 : index
      %c0_99 = arith.constant 0 : index
      %135 = vector.load %arg9[%c2_97, %c0_98, %c0_99] : memref<4x256x32xf32, #tpu.memory_space<vmem>>, vector<1x256x32xf32>
      %136 = vector.shape_cast %135 : vector<1x256x32xf32> to vector<256x32xf32>
      %137 = vector.shape_cast %130 : vector<256x32xf32> to vector<1x256x32xf32>
      tpu.vector_store %arg9[%c2_97, %c0_98, %c0_99], %137 {strides = array<i32>} : memref<4x256x32xf32, #tpu.memory_space<vmem>>, vector<1x256x32xf32>,
      %138 = vector.extract_strided_slice %110 {offsets = [0, 96], sizes = [256, 32], strides = [1, 1]} : vector<256x256xf32> to vector<256x32xf32>
      %139 = vector.extract_strided_slice %110 {offsets = [0, 224], sizes = [256, 32], strides = [1, 1]} : vector<256x256xf32> to vector<256x32xf32>
      %140 = tpu.transpose %138, [1, 0] : vector<256x32xf32> -> vector<32x256xf32>
      %c3_100 = arith.constant 3 : index
      %c0_101 = arith.constant 0 : index
      %c0_102 = arith.constant 0 : index
      %141 = vector.load %arg8[%c3_100, %c0_101, %c0_102] : memref<4x32x256xf32, #tpu.memory_space<vmem>>, vector<1x32x256xf32>
      %142 = vector.shape_cast %141 : vector<1x32x256xf32> to vector<32x256xf32>
      %143 = vector.shape_cast %140 : vector<32x256xf32> to vector<1x32x256xf32>
      tpu.vector_store %arg8[%c3_100, %c0_101, %c0_102], %143 {strides = array<i32>} : memref<4x32x256xf32, #tpu.memory_space<vmem>>, vector<1x32x256xf32>,
      %c3_103 = arith.constant 3 : index
      %c0_104 = arith.constant 0 : index
      %c0_105 = arith.constant 0 : index
      %144 = vector.load %arg9[%c3_103, %c0_104, %c0_105] : memref<4x256x32xf32, #tpu.memory_space<vmem>>, vector<1x256x32xf32>
      %145 = vector.shape_cast %144 : vector<1x256x32xf32> to vector<256x32xf32>
      %146 = vector.shape_cast %139 : vector<256x32xf32> to vector<1x256x32xf32>
      tpu.vector_store %arg9[%c3_103, %c0_104, %c0_105], %146 {strides = array<i32>} : memref<4x256x32xf32, #tpu.memory_space<vmem>>, vector<1x256x32xf32>,
    } else {
    }
    %c128_i32 = arith.constant 128 : i32
    %3 = arith.muli %arg1, %c128_i32 : i32
    %4 = tpu.assume_multiple %3, 128 : i32
    %c0 = arith.constant 0 : index
    %5 = arith.index_cast %4 : i32 to index
    %c0_1 = arith.constant 0 : index
    %6 = vector.load %arg2[%c0, %5, %c0_1] : memref<1x256x128xf32, #tpu.memory_space<vmem>>, vector<1x128x128xf32>
    %7 = vector.shape_cast %6 : vector<1x128x128xf32> to vector<128x128xf32>
    %cst = arith.constant 0.000000e+00 : f32
    %8 = vector.broadcast %cst : f32 to vector<128x128xf32>
    %c0_2 = arith.constant 0 : index
    %c0_3 = arith.constant 0 : index
    %c0_4 = arith.constant 0 : index
    %9 = vector.load %arg3[%c0_2, %c0_3, %c0_4] : memref<4x128x32xf32, #tpu.memory_space<vmem>>, vector<1x128x32xf32>
    %10 = vector.shape_cast %9 : vector<1x128x32xf32> to vector<128x32xf32>
    %cst_5 = arith.constant dense<0.000000e+00> : vector<128x32xf32>
    %11 = tpu.matmul %7, %10, %cst_5 {dimension_numbers = #tpu.dot_dimension_numbers<[1], [0], [0], [1], [0, 0, 1, 1], [], []>} : vector<128x128xf32>, vector<128x32xf32>, vector<128x32xf32> -> vector<128x32xf32>
    %c0_6 = arith.constant 0 : index
    %c0_7 = arith.constant 0 : index
    %c0_8 = arith.constant 0 : index
    %12 = vector.load %arg8[%c0_6, %c0_7, %c0_8] : memref<4x32x256xf32, #tpu.memory_space<vmem>>, vector<1x32x256xf32>
    %13 = vector.shape_cast %12 : vector<1x32x256xf32> to vector<32x256xf32>
    %cst_9 = arith.constant dense<0.000000e+00> : vector<128x256xf32>
    %14 = tpu.matmul %11, %13, %cst_9 {dimension_numbers = #tpu.dot_dimension_numbers<[1], [0], [0], [1], [0, 0, 1, 1], [], []>} : vector<128x32xf32>, vector<32x256xf32>, vector<128x256xf32> -> vector<128x256xf32>
    %cst_10 = arith.constant dense<0xFF800000> : vector<128xf32>
    %15 = vector.multi_reduction <maximumf>, %14, %cst_10 [1] : vector<128x256xf32> to vector<128xf32>
    %16 = vector.shape_cast %15 : vector<128xf32> to vector<128x1xf32>
    %17 = vector.broadcast %16 : vector<128x1xf32> to vector<128x256xf32>
    %18 = arith.subf %14, %17 : vector<128x256xf32>
    %19 = math.exp %18 : vector<128x256xf32>
    %cst_11 = arith.constant dense<0.000000e+00> : vector<128xf32>
    %20 = vector.multi_reduction <add>, %19, %cst_11 [1] : vector<128x256xf32> to vector<128xf32>
    %21 = vector.shape_cast %20 : vector<128xf32> to vector<128x1xf32>
    %c0_12 = arith.constant 0 : index
    %c0_13 = arith.constant 0 : index
    %c0_14 = arith.constant 0 : index
    %22 = vector.load %arg9[%c0_12, %c0_13, %c0_14] : memref<4x256x32xf32, #tpu.memory_space<vmem>>, vector<1x256x32xf32>
    %23 = vector.shape_cast %22 : vector<1x256x32xf32> to vector<256x32xf32>
    %cst_15 = arith.constant dense<0.000000e+00> : vector<128x32xf32>
    %24 = tpu.matmul %19, %23, %cst_15 {dimension_numbers = #tpu.dot_dimension_numbers<[1], [0], [0], [1], [0, 0, 1, 1], [], []>} : vector<128x256xf32>, vector<256x32xf32>, vector<128x32xf32> -> vector<128x32xf32>
    %25 = tpu.reciprocal %21 {approx = true} : vector<128x1xf32> -> vector<128x1xf32>
    %26 = vector.broadcast %25 : vector<128x1xf32> to vector<128x32xf32>
    %27 = arith.mulf %24, %26 : vector<128x32xf32>
    %c0_16 = arith.constant 0 : index
    %c0_17 = arith.constant 0 : index
    %c0_18 = arith.constant 0 : index
    %28 = vector.load %arg5[%c0_16, %c0_17, %c0_18] : memref<4x32x128xf32, #tpu.memory_space<vmem>>, vector<1x32x128xf32>
    %29 = vector.shape_cast %28 : vector<1x32x128xf32> to vector<32x128xf32>
    %cst_19 = arith.constant dense<0.000000e+00> : vector<128x128xf32>
    %30 = tpu.matmul %27, %29, %cst_19 {dimension_numbers = #tpu.dot_dimension_numbers<[1], [0], [0], [1], [0, 0, 1, 1], [], []>} : vector<128x32xf32>, vector<32x128xf32>, vector<128x128xf32> -> vector<128x128xf32>
    %31 = arith.addf %8, %30 : vector<128x128xf32>
    %c1 = arith.constant 1 : index
    %c0_20 = arith.constant 0 : index
    %c0_21 = arith.constant 0 : index
    %32 = vector.load %arg3[%c1, %c0_20, %c0_21] : memref<4x128x32xf32, #tpu.memory_space<vmem>>, vector<1x128x32xf32>
    %33 = vector.shape_cast %32 : vector<1x128x32xf32> to vector<128x32xf32>
    %cst_22 = arith.constant dense<0.000000e+00> : vector<128x32xf32>
    %34 = tpu.matmul %7, %33, %cst_22 {dimension_numbers = #tpu.dot_dimension_numbers<[1], [0], [0], [1], [0, 0, 1, 1], [], []>} : vector<128x128xf32>, vector<128x32xf32>, vector<128x32xf32> -> vector<128x32xf32>
    %c1_23 = arith.constant 1 : index
    %c0_24 = arith.constant 0 : index
    %c0_25 = arith.constant 0 : index
    %35 = vector.load %arg8[%c1_23, %c0_24, %c0_25] : memref<4x32x256xf32, #tpu.memory_space<vmem>>, vector<1x32x256xf32>
    %36 = vector.shape_cast %35 : vector<1x32x256xf32> to vector<32x256xf32>
    %cst_26 = arith.constant dense<0.000000e+00> : vector<128x256xf32>
    %37 = tpu.matmul %34, %36, %cst_26 {dimension_numbers = #tpu.dot_dimension_numbers<[1], [0], [0], [1], [0, 0, 1, 1], [], []>} : vector<128x32xf32>, vector<32x256xf32>, vector<128x256xf32> -> vector<128x256xf32>
    %cst_27 = arith.constant dense<0xFF800000> : vector<128xf32>
    %38 = vector.multi_reduction <maximumf>, %37, %cst_27 [1] : vector<128x256xf32> to vector<128xf32>
    %39 = vector.shape_cast %38 : vector<128xf32> to vector<128x1xf32>
    %40 = vector.broadcast %39 : vector<128x1xf32> to vector<128x256xf32>
    %41 = arith.subf %37, %40 : vector<128x256xf32>
    %42 = math.exp %41 : vector<128x256xf32>
    %cst_28 = arith.constant dense<0.000000e+00> : vector<128xf32>
    %43 = vector.multi_reduction <add>, %42, %cst_28 [1] : vector<128x256xf32> to vector<128xf32>
    %44 = vector.shape_cast %43 : vector<128xf32> to vector<128x1xf32>
    %c1_29 = arith.constant 1 : index
    %c0_30 = arith.constant 0 : index
    %c0_31 = arith.constant 0 : index
    %45 = vector.load %arg9[%c1_29, %c0_30, %c0_31] : memref<4x256x32xf32, #tpu.memory_space<vmem>>, vector<1x256x32xf32>
    %46 = vector.shape_cast %45 : vector<1x256x32xf32> to vector<256x32xf32>
    %cst_32 = arith.constant dense<0.000000e+00> : vector<128x32xf32>
    %47 = tpu.matmul %42, %46, %cst_32 {dimension_numbers = #tpu.dot_dimension_numbers<[1], [0], [0], [1], [0, 0, 1, 1], [], []>} : vector<128x256xf32>, vector<256x32xf32>, vector<128x32xf32> -> vector<128x32xf32>
    %48 = tpu.reciprocal %44 {approx = true} : vector<128x1xf32> -> vector<128x1xf32>
    %49 = vector.broadcast %48 : vector<128x1xf32> to vector<128x32xf32>
    %50 = arith.mulf %47, %49 : vector<128x32xf32>
    %c1_33 = arith.constant 1 : index
    %c0_34 = arith.constant 0 : index
    %c0_35 = arith.constant 0 : index
    %51 = vector.load %arg5[%c1_33, %c0_34, %c0_35] : memref<4x32x128xf32, #tpu.memory_space<vmem>>, vector<1x32x128xf32>
    %52 = vector.shape_cast %51 : vector<1x32x128xf32> to vector<32x128xf32>
    %cst_36 = arith.constant dense<0.000000e+00> : vector<128x128xf32>
    %53 = tpu.matmul %50, %52, %cst_36 {dimension_numbers = #tpu.dot_dimension_numbers<[1], [0], [0], [1], [0, 0, 1, 1], [], []>} : vector<128x32xf32>, vector<32x128xf32>, vector<128x128xf32> -> vector<128x128xf32>
    %54 = arith.addf %31, %53 : vector<128x128xf32>
    %c2 = arith.constant 2 : index
    %c0_37 = arith.constant 0 : index
    %c0_38 = arith.constant 0 : index
    %55 = vector.load %arg3[%c2, %c0_37, %c0_38] : memref<4x128x32xf32, #tpu.memory_space<vmem>>, vector<1x128x32xf32>
    %56 = vector.shape_cast %55 : vector<1x128x32xf32> to vector<128x32xf32>
    %cst_39 = arith.constant dense<0.000000e+00> : vector<128x32xf32>
    %57 = tpu.matmul %7, %56, %cst_39 {dimension_numbers = #tpu.dot_dimension_numbers<[1], [0], [0], [1], [0, 0, 1, 1], [], []>} : vector<128x128xf32>, vector<128x32xf32>, vector<128x32xf32> -> vector<128x32xf32>
    %c2_40 = arith.constant 2 : index
    %c0_41 = arith.constant 0 : index
    %c0_42 = arith.constant 0 : index
    %58 = vector.load %arg8[%c2_40, %c0_41, %c0_42] : memref<4x32x256xf32, #tpu.memory_space<vmem>>, vector<1x32x256xf32>
    %59 = vector.shape_cast %58 : vector<1x32x256xf32> to vector<32x256xf32>
    %cst_43 = arith.constant dense<0.000000e+00> : vector<128x256xf32>
    %60 = tpu.matmul %57, %59, %cst_43 {dimension_numbers = #tpu.dot_dimension_numbers<[1], [0], [0], [1], [0, 0, 1, 1], [], []>} : vector<128x32xf32>, vector<32x256xf32>, vector<128x256xf32> -> vector<128x256xf32>
    %cst_44 = arith.constant dense<0xFF800000> : vector<128xf32>
    %61 = vector.multi_reduction <maximumf>, %60, %cst_44 [1] : vector<128x256xf32> to vector<128xf32>
    %62 = vector.shape_cast %61 : vector<128xf32> to vector<128x1xf32>
    %63 = vector.broadcast %62 : vector<128x1xf32> to vector<128x256xf32>
    %64 = arith.subf %60, %63 : vector<128x256xf32>
    %65 = math.exp %64 : vector<128x256xf32>
    %cst_45 = arith.constant dense<0.000000e+00> : vector<128xf32>
    %66 = vector.multi_reduction <add>, %65, %cst_45 [1] : vector<128x256xf32> to vector<128xf32>
    %67 = vector.shape_cast %66 : vector<128xf32> to vector<128x1xf32>
    %c2_46 = arith.constant 2 : index
    %c0_47 = arith.constant 0 : index
    %c0_48 = arith.constant 0 : index
    %68 = vector.load %arg9[%c2_46, %c0_47, %c0_48] : memref<4x256x32xf32, #tpu.memory_space<vmem>>, vector<1x256x32xf32>
    %69 = vector.shape_cast %68 : vector<1x256x32xf32> to vector<256x32xf32>
    %cst_49 = arith.constant dense<0.000000e+00> : vector<128x32xf32>
    %70 = tpu.matmul %65, %69, %cst_49 {dimension_numbers = #tpu.dot_dimension_numbers<[1], [0], [0], [1], [0, 0, 1, 1], [], []>} : vector<128x256xf32>, vector<256x32xf32>, vector<128x32xf32> -> vector<128x32xf32>
    %71 = tpu.reciprocal %67 {approx = true} : vector<128x1xf32> -> vector<128x1xf32>
    %72 = vector.broadcast %71 : vector<128x1xf32> to vector<128x32xf32>
    %73 = arith.mulf %70, %72 : vector<128x32xf32>
    %c2_50 = arith.constant 2 : index
    %c0_51 = arith.constant 0 : index
    %c0_52 = arith.constant 0 : index
    %74 = vector.load %arg5[%c2_50, %c0_51, %c0_52] : memref<4x32x128xf32, #tpu.memory_space<vmem>>, vector<1x32x128xf32>
    %75 = vector.shape_cast %74 : vector<1x32x128xf32> to vector<32x128xf32>
    %cst_53 = arith.constant dense<0.000000e+00> : vector<128x128xf32>
    %76 = tpu.matmul %73, %75, %cst_53 {dimension_numbers = #tpu.dot_dimension_numbers<[1], [0], [0], [1], [0, 0, 1, 1], [], []>} : vector<128x32xf32>, vector<32x128xf32>, vector<128x128xf32> -> vector<128x128xf32>
    %77 = arith.addf %54, %76 : vector<128x128xf32>
    %c3 = arith.constant 3 : index
    %c0_54 = arith.constant 0 : index
    %c0_55 = arith.constant 0 : index
    %78 = vector.load %arg3[%c3, %c0_54, %c0_55] : memref<4x128x32xf32, #tpu.memory_space<vmem>>, vector<1x128x32xf32>
    %79 = vector.shape_cast %78 : vector<1x128x32xf32> to vector<128x32xf32>
    %cst_56 = arith.constant dense<0.000000e+00> : vector<128x32xf32>
    %80 = tpu.matmul %7, %79, %cst_56 {dimension_numbers = #tpu.dot_dimension_numbers<[1], [0], [0], [1], [0, 0, 1, 1], [], []>} : vector<128x128xf32>, vector<128x32xf32>, vector<128x32xf32> -> vector<128x32xf32>
    %c3_57 = arith.constant 3 : index
    %c0_58 = arith.constant 0 : index
    %c0_59 = arith.constant 0 : index
    %81 = vector.load %arg8[%c3_57, %c0_58, %c0_59] : memref<4x32x256xf32, #tpu.memory_space<vmem>>, vector<1x32x256xf32>
    %82 = vector.shape_cast %81 : vector<1x32x256xf32> to vector<32x256xf32>
    %cst_60 = arith.constant dense<0.000000e+00> : vector<128x256xf32>
    %83 = tpu.matmul %80, %82, %cst_60 {dimension_numbers = #tpu.dot_dimension_numbers<[1], [0], [0], [1], [0, 0, 1, 1], [], []>} : vector<128x32xf32>, vector<32x256xf32>, vector<128x256xf32> -> vector<128x256xf32>
    %cst_61 = arith.constant dense<0xFF800000> : vector<128xf32>
    %84 = vector.multi_reduction <maximumf>, %83, %cst_61 [1] : vector<128x256xf32> to vector<128xf32>
    %85 = vector.shape_cast %84 : vector<128xf32> to vector<128x1xf32>
    %86 = vector.broadcast %85 : vector<128x1xf32> to vector<128x256xf32>
    %87 = arith.subf %83, %86 : vector<128x256xf32>
    %88 = math.exp %87 : vector<128x256xf32>
    %cst_62 = arith.constant dense<0.000000e+00> : vector<128xf32>
    %89 = vector.multi_reduction <add>, %88, %cst_62 [1] : vector<128x256xf32> to vector<128xf32>
    %90 = vector.shape_cast %89 : vector<128xf32> to vector<128x1xf32>
    %c3_63 = arith.constant 3 : index
    %c0_64 = arith.constant 0 : index
    %c0_65 = arith.constant 0 : index
    %91 = vector.load %arg9[%c3_63, %c0_64, %c0_65] : memref<4x256x32xf32, #tpu.memory_space<vmem>>, vector<1x256x32xf32>
    %92 = vector.shape_cast %91 : vector<1x256x32xf32> to vector<256x32xf32>
    %cst_66 = arith.constant dense<0.000000e+00> : vector<128x32xf32>
    %93 = tpu.matmul %88, %92, %cst_66 {dimension_numbers = #tpu.dot_dimension_numbers<[1], [0], [0], [1], [0, 0, 1, 1], [], []>} : vector<128x256xf32>, vector<256x32xf32>, vector<128x32xf32> -> vector<128x32xf32>
    %94 = tpu.reciprocal %90 {approx = true} : vector<128x1xf32> -> vector<128x1xf32>
    %95 = vector.broadcast %94 : vector<128x1xf32> to vector<128x32xf32>
    %96 = arith.mulf %93, %95 : vector<128x32xf32>
    %c3_67 = arith.constant 3 : index
    %c0_68 = arith.constant 0 : index
    %c0_69 = arith.constant 0 : index
    %97 = vector.load %arg5[%c3_67, %c0_68, %c0_69] : memref<4x32x128xf32, #tpu.memory_space<vmem>>, vector<1x32x128xf32>
    %98 = vector.shape_cast %97 : vector<1x32x128xf32> to vector<32x128xf32>
    %cst_70 = arith.constant dense<0.000000e+00> : vector<128x128xf32>
    %99 = tpu.matmul %96, %98, %cst_70 {dimension_numbers = #tpu.dot_dimension_numbers<[1], [0], [0], [1], [0, 0, 1, 1], [], []>} : vector<128x32xf32>, vector<32x128xf32>, vector<128x128xf32> -> vector<128x128xf32>
    %100 = arith.addf %77, %99 : vector<128x128xf32>
    %c0_71 = arith.constant 0 : index
    %c0_72 = arith.constant 0 : index
    %101 = vector.load %arg6[%c0_71, %c0_72] : memref<1x128xf32, #tpu.memory_space<vmem>>, vector<1x128xf32>
    %102 = vector.broadcast %101 : vector<1x128xf32> to vector<128x128xf32>
    %103 = arith.addf %100, %102 : vector<128x128xf32>
    %c0_73 = arith.constant 0 : index
    %c0_74 = arith.constant 0 : index
    %c0_75 = arith.constant 0 : index
    %104 = vector.load %arg7[%c0_73, %c0_74, %c0_75] : memref<1x128x128xf32, #tpu.memory_space<vmem>>, vector<1x128x128xf32>
    %105 = vector.shape_cast %104 : vector<1x128x128xf32> to vector<128x128xf32>
    %106 = vector.shape_cast %103 : vector<128x128xf32> to vector<1x128x128xf32>
    tpu.vector_store %arg7[%c0_73, %c0_74, %c0_75], %106 {strides = array<i32>} : memref<1x128x128xf32, #tpu.memory_space<vmem>>, vector<1x128x128xf32>,
    return
  }
  func.func @transform_0(%arg0: i32, %arg1: i32) -> (i32, i32, i32) {
    %c0_i32 = arith.constant 0 : i32
    %c0_i32_0 = arith.constant 0 : i32
    %c0_i32_1 = arith.constant 0 : i32
    return %arg0, %c0_i32, %c0_i32_0 : i32, i32, i32
  }
  func.func @transform_1(%arg0: i32, %arg1: i32) -> (i32, i32, i32) {
    %c0_i32 = arith.constant 0 : i32
    %c0_i32_0 = arith.constant 0 : i32
    %c0_i32_1 = arith.constant 0 : i32
    %c0_i32_2 = arith.constant 0 : i32
    return %c0_i32, %c0_i32_0, %c0_i32_1 : i32, i32, i32
  }
  func.func @transform_2(%arg0: i32, %arg1: i32) -> (i32, i32) {
    %c0_i32 = arith.constant 0 : i32
    %c0_i32_0 = arith.constant 0 : i32
    %c0_i32_1 = arith.constant 0 : i32
    return %c0_i32, %c0_i32_0 : i32, i32
  }
  func.func @transform_3(%arg0: i32, %arg1: i32) -> (i32, i32, i32) {
    %c0_i32 = arith.constant 0 : i32
    %c0_i32_0 = arith.constant 0 : i32
    %c0_i32_1 = arith.constant 0 : i32
    %c0_i32_2 = arith.constant 0 : i32
    return %c0_i32, %c0_i32_0, %c0_i32_1 : i32, i32, i32
  }
  func.func @transform_4(%arg0: i32, %arg1: i32) -> (i32, i32) {
    %c0_i32 = arith.constant 0 : i32
    %c0_i32_0 = arith.constant 0 : i32
    %c0_i32_1 = arith.constant 0 : i32
    return %c0_i32, %c0_i32_0 : i32, i32
  }
  func.func @transform_5(%arg0: i32, %arg1: i32) -> (i32, i32, i32) {
    %c0_i32 = arith.constant 0 : i32
    %c0_i32_0 = arith.constant 0 : i32
    return %arg0, %arg1, %c0_i32 : i32, i32, i32
  }
}

</mosaic_0001>

<bundles_post_ra>
// kernel: tpu_custom_call.1
= control target key start
LH: loop header
LB: loop body
LE: loop exit
PB: predicated region body
PF: predicated region fallthrough
CT: control target
= control target key end

     0   :  { %s10373_s0 = inlined_call_operand.vmem [shape: f32[2,256,128], index: 0, kind: input, shape index: {}]   ;;  %s10374_s1 = inlined_call_operand.vmem [shape: f32[4,128,32], index: 1, kind: input, shape index: {}]   ;;  %s10375_s2 = inlined_call_operand.hbm [shape: f32[128,256], index: 2, kind: input, shape index: {}]   ;;  %s10376_s3 = inlined_call_operand.vmem [shape: f32[4,32,128], index: 3, kind: input, shape index: {}]   ;;  %s10377_s4 = inlined_call_operand.vmem [shape: f32[1,128], index: 4, kind: input, shape index: {}]   ;;  %s10378_s5 = inlined_call_operand.hbm [shape: f32[2,256,128], index: 5, kind: output, shape index: {}]  }
   0x1   :  { %10418 = sst [smem:[#allocation96_spill]] %s10373_s0 }
   0x2   :  { %10 = vsyncpa [#allocation5], 0 }
   0x3   :  { %11 = vsyncpa [#allocation6], 0 }
   0x4   :  { %13 = vsyncpa [#allocation6 + $0x1], 0  ;;  %s7933_s18 = smov 0   ;;  %s7935_s19 = smov 0  }
   0x5   :  { %s7937_s20 = smov 0   ;;  %s7939_s21 = smov 0  }
   0x6   :  { %s7941_s22 = smov 0   ;;  %s7943_s23 = smov 0  }
   0x7   :  { %s7945_s24 = smov 0   ;;  %s7947_s25 = smov 0  }
   0x8 LB: > { %s5753_s26 = sadd.s32 4294967295, %s7890_s25   ;;  %s5754_s27 = sadd.s32 4294967294, %s7890_s25   ;;  %s7890_s25 = sphi %s7947_s25, %s19_s25   ;;  %s7886_s24 = sphi %s7945_s24, %s10609_s24   ;;  %s7882_s23 = sphi %s7943_s23, %s10608_s23   ;;  %s7878_s22 = sphi %s7941_s22, %s10607_s22   ;;  %s7874_s21 = sphi %s7939_s21, %s10606_s21   ;;  %s7870_s20 = sphi %s7937_s20, %s10605_s20   ;;  %s7866_s19 = sphi %s7935_s19, %s10604_s19   ;;  %s7862_s18 = sphi %s7933_s18, %s10603_s18  }
   0x9   : > { %s28_s28 = sadd.s32 1, %s7882_s23  ;;  %s31_s29 = sadd.s32 1, %s7886_s24 }
   0xa   : > { %p29_p0 = scmp.ge.s32.totalorder %s28_s28, 2  ;;  %s150_s30 = sadd.s32 1, %s7870_s20 }
   0xb   : > { %p160_p1 = scmp.ne.s32.totalorder %s7870_s20, %s7866_s19  ;;  %p161_p2 = scmp.eq.s32.totalorder %s5753_s26, 3 }
   0xc   : > { %s10611_s28 = smov (%p29_p0, %s28_s28), 0  ;;  %s10613_s29 = smov (!%p29_p0, %s31_s29), %s7886_s24 }
   0xd   : > { %s146_s6 = ssub.s32 %s7882_s23, %s10611_s28  ;;  %p7985_p3 = por %p161_p2, %p160_p1 }
   0xe   : > { %p33_p4 = scmp.ge.s32.totalorder %s10613_s29, 2  ;;  %p166_p5 = scmp.ne.s32.totalorder %s7866_s19, %s7862_s18 }
   0xf   : > { %s10419_s7 = scalar_select %p7985_p3, 1, 0 }
  0x10   : > { %p167_p6 = scmp.eq.s32.totalorder %s5754_s27, 3  ;;  %p5755_p7 = scmp.ge.s32.totalorder %s7890_s25, 1 }
  0x11   : > { %s10615_s29 = smov (%p33_p4, %s10613_s29), 0  ;;  %p174_p9 = scmp.lt.s32.totalorder %s7890_s25, 5 }
  0x12   : > { %p7994_p8 = por %p167_p6, %p166_p5  ;;  %s145_s9 = ssub.s32 %s7886_s24, %s10615_s29 }
  0x13   : > { %s147_s10 = sor.u32 %s146_s6, %s145_s9  ;;  %p8001_p10 = pnand %p5755_p7, %p174_p9 }
  0x14   : > { %s10420_s8 = scalar_select %p7994_p8, 1, 0 }
  0x15   : > { %s10421_s11 = scalar_select %p8001_p10, 1, 0 }
  0x16   : > { %p148_p11 = scmp.eq.s32.totalorder %s147_s10, 0  ;;  %p8005_p12 = scmp.eq.s32.totalorder %s5753_s26, 0 }
  0x17   : > { %p7279_p13 = pneg %p8001_p10  ;;  %s7892_s14 = smov [#allocation4]  }
  0x18   : > { %s10422_s12 = scalar_select %p8005_p12, 1, 0 }
  0x19   : > { %s8012_s13 = scalar_select %p148_p11, %s7870_s20, %s150_s30  }
  0x1a   : > { %s189_s15 = sshll.u32 %s7892_s14, 4  ;;  %p8016_p0 = pnand %p8005_p12, %p7279_p13  ;;  %s190_s15 = int_to_ptr.vmem [resolvable:$true] %s189_s15 }
  0x1b   : > { %s7764_s26 = scalar_lea.hbm %s10375_s2, 4096 }
  0x1c   : > { %p7765_p1 = scmp.ne.s32.totalorder %s10375_s2, %s7764_s26  ;;  %p7766_p2 = pneg %p8016_p0 }
  0x1d   : > { %p7771_p6 = scmp.lt.u32.totalorder %s7764_s26, %s10375_s2 }
  0x1e   : > { %p7767_p4 = pnand %p7766_p2, %p7765_p1 }
  0x20   : > { %p7768_p5 = pneg %p7767_p4 }
  0x22   : > { %p7773_p7 = pnand %p7771_p6, %p7768_p5 }
  0x24   : > { %7776 = shalt.err (!%p7773_p7)
}
  0x25   : > { %s7777_s14 = scalar_lea.vmem %s190_s15, 4096  ;;  %p7785_p8 = scmp.lt.s32.totalorder %s190_s15, %s190_s15 }
  0x26   : > { %p7778_p9 = scmp.ne.s32.totalorder %s190_s15, %s7777_s14  ;;  %p7786_p3 = scmp.lt.s32.totalorder %s7777_s14, %s7777_s14 }
  0x28   : > { %p7780_p11 = pnand %p7778_p9, %p7766_p2  ;;  %p7787_p12 = por %p7786_p3, %p7785_p8 }
  0x2a   : > { %p7781_p13 = pneg %p7780_p11 }
  0x2c   : > { %p7788_p10 = pnand %p7787_p12, %p7781_p13 }
  0x2e   : > { %7791 = shalt.err (!%p7788_p10)
}
  0x2f   : > { %s7893_s17 = smov 256   ;;  %s7894_s27 = smov 16  }
  0x30   : > { %7282 = dma.hbm_to_vmem [thread:$0]  (!%p8016_p0), %s10375_s2, 4096, %s190_s15, [#allocation5], %s7893_s17, %s7893_s17, %s7894_s27  }
  0x31   : > { %p10424_p1 = scmp.ne.s32.totalorder %s10421_s11, 0 }
  0x33   : > { %219 = sbr.rel (%p10424_p1) target bundleno = 3657 (0xe49), region = 40 }
  0x3a   : > { %p10425_p4 = scmp.ne.s32.totalorder %s10422_s12, 0 }
  0x3c   : > { %7853 = dma.done.wait (%p10425_p4), [#allocation5], 4096  }
  0x3d   : > { %7855 = vsyncadd (%p10425_p4), [#allocation5], 4294963200  ;;  %s10415_s26 = sand.u32 1, %s7866_s19   ;;  %p247_p3 = scmp.lt.s32.totalorder %s7878_s22, 1 }
  0x3e   : > { %s5760_s16 = sshll.u32 %s10415_s26, 7  ;;  %s10426_s0 = sld [smem:[#allocation96_spill]] }
  0x3f   : > { %s248_s30 = scalar_select %p247_p3, %s7878_s22, 1 }
  0x40   : > { %s8052_s17 = scalar_lea.vmem [#allocation7], %s5760_s16  ;;  %p5763_p8 = scmp.ne.s32.totalorder %s7874_s21, 0 }
  0x41   : > { %s5960_s10 = sshll.u32 %s248_s30, 8 }
  0x42   : > { %256 = sbr.rel (%p5763_p8) target bundleno = 1323 (0x52b), region = 48 }
  0x44   : > { %s8050_s11 = scalar_lea.vmem %s10426_s0, %s5960_s10 }
  0x49   : > { %v290_v0 = vld [vmem:[#allocation4 + $0x8] sm:$0xff]  ;;  %v292_v1 = vld [vmem:[#allocation4 + $0x18] sm:$0xff]  ;;  %v289_v2 = vld [vmem:[#allocation4] sm:$0xff]  ;;  %v7895_v7 = vmov 0.0   ;;  %vm650_vm0 = vcmask 261120   ;;  %s7896_s12 = smov 96  }
  0x4a   : > { %v6841_v3 = vpack.c.bf16 %v292_v1, %v290_v0  ;;  %v291_v4 = vld [vmem:[#allocation4 + $0x10] sm:$0xff]  ;;  %v294_v5 = vld [vmem:[#allocation4 + $0x28] sm:$0xff]  ;;  %v296_v6 = vld [vmem:[#allocation4 + $0x38] sm:$0xff]  ;;  %385 = vmatprep.mubr.f32.mxu0 %v7895_v7  ;;  %481 = vmatprep.mubr.f32.mxu1 %v7895_v7  ;;  %s7897_s27 = smov 64   ;;  %s7898_s6 = smov 32  }
  0x4b   : > { %v6843_v8 = vpack.c.bf16 %v291_v4, %v289_v2  ;;  %v6845_v9 = vpack.c.bf16 %v296_v6, %v294_v5  ;;  %v293_v10 = vld [vmem:[#allocation4 + $0x20] sm:$0xff]  ;;  %v295_v11 = vld [vmem:[#allocation4 + $0x30] sm:$0xff]  ;;  %v298_v12 = vld [vmem:[#allocation4 + $0x48] sm:$0xff] }
  0x4c   : > { %6842 = vmatprep.subr.bf16.mxu0 %v6841_v3  ;;  %7193 = vmatprep.subr.bf16.mxu1 %v6841_v3  ;;  %v300_v13 = vld [vmem:[#allocation4 + $0x58] sm:$0xff]  ;;  %v6847_v14 = vpack.c.bf16 %v295_v11, %v293_v10  ;;  %v297_v16 = vld [vmem:[#allocation4 + $0x40] sm:$0xff]  ;;  %v299_v17 = vld [vmem:[#allocation4 + $0x50] sm:$0xff] }
  0x4d   : > { %6844 = vmatpush1.bf16.msra.mxu0 %v6843_v8  ;;  %7201 = vmatpush1.bf16.msra.mxu1 %v6843_v8  ;;  %v6849_v15 = vpack.c.bf16 %v300_v13, %v298_v12  ;;  %v302_v18 = vld [vmem:[#allocation4 + $0x68] sm:$0xff]  ;;  %v304_v19 = vld [vmem:[#allocation4 + $0x78] sm:$0xff]  ;;  %v6851_v20 = vpack.c.bf16 %v299_v17, %v297_v16  ;;  %v301_v22 = vld [vmem:[#allocation4 + $0x60] sm:$0xff] }
  0x4e   : > { %6846 = vmatprep.subr.bf16.mxu0 %v6845_v9  ;;  %7194 = vmatprep.subr.bf16.mxu1 %v6845_v9  ;;  %v6853_v21 = vpack.c.bf16 %v304_v19, %v302_v18  ;;  %v303_v23 = vld [vmem:[#allocation4 + $0x70] sm:$0xff]  ;;  %v306_v24 = vld [vmem:[#allocation4 + $0x88] sm:$0xff]  ;;  %v308_v25 = vld [vmem:[#allocation4 + $0x98] sm:$0xff] }
  0x4f   : > { %v6855_v26 = vpack.c.bf16 %v303_v23, %v301_v22  ;;  %v6857_v27 = vpack.c.bf16 %v308_v25, %v306_v24  ;;  %v305_v28 = vld [vmem:[#allocation4 + $0x80] sm:$0xff]  ;;  %v307_v29 = vld [vmem:[#allocation4 + $0x90] sm:$0xff]  ;;  %v310_v30 = vld [vmem:[#allocation4 + $0xa8] sm:$0xff] }
  0x50   : > { %v312_v31 = vld [vmem:[#allocation4 + $0xb8] sm:$0xff]  ;;  %v6859_v32 = vpack.c.bf16 %v307_v29, %v305_v28  ;;  %v309_v34 = vld [vmem:[#allocation4 + $0xa0] sm:$0xff]  ;;  %v311_v35 = vld [vmem:[#allocation4 + $0xb0] sm:$0xff] }
  0x51   : > { %6848 = vmatpush1.bf16.msra.mxu0 %v6847_v14  ;;  %7202 = vmatpush1.bf16.msra.mxu1 %v6847_v14  ;;  %v6861_v33 = vpack.c.bf16 %v312_v31, %v310_v30  ;;  %v314_v36 = vld [vmem:[#allocation4 + $0xc8] sm:$0xff]  ;;  %v316_v37 = vld [vmem:[#allocation4 + $0xd8] sm:$0xff]  ;;  %v6863_v38 = vpack.c.bf16 %v311_v35, %v309_v34  ;;  %v313_v40 = vld [vmem:[#allocation4 + $0xc0] sm:$0xff] }
  0x52   : > { %6850 = vmatprep.subr.bf16.mxu0 %v6849_v15  ;;  %7195 = vmatprep.subr.bf16.mxu1 %v6849_v15  ;;  %v6865_v39 = vpack.c.bf16 %v316_v37, %v314_v36  ;;  %v315_v41 = vld [vmem:[#allocation4 + $0xd0] sm:$0xff]  ;;  %v318_v42 = vld [vmem:[#allocation4 + $0xe8] sm:$0xff]  ;;  %v320_v43 = vld [vmem:[#allocation4 + $0xf8] sm:$0xff] }
  0x53   : > { %v6867_v44 = vpack.c.bf16 %v315_v41, %v313_v40  ;;  %v6869_v45 = vpack.c.bf16 %v320_v43, %v318_v42  ;;  %v317_v46 = vld [vmem:[#allocation4 + $0xe0] sm:$0xff]  ;;  %v319_v47 = vld [vmem:[#allocation4 + $0xf0] sm:$0xff]  ;;  %v274_v51 = vld [vmem:[%s8050_s11 + $0x88] sm:$0xff] }
  0x54   : > { %v6871_v48 = vpack.c.bf16 %v319_v47, %v317_v46  ;;  %v257_v49 = vld [vmem:[%s8050_s11] sm:$0xff]  ;;  %v258_v52 = vld [vmem:[%s8050_s11 + $0x8] sm:$0xff]  ;;  %v275_v53 = vld [vmem:[%s8050_s11 + $0x90] sm:$0xff] }
  0x55   : > { %6852 = vmatpush1.bf16.msra.mxu0 %v6851_v20  ;;  %7203 = vmatpush1.bf16.msra.mxu1 %v6851_v20  ;;  %v273_v50 = vld [vmem:[%s8050_s11 + $0x80] sm:$0xff]  ;;  %v259_v54 = vld [vmem:[%s8050_s11 + $0x10] sm:$0xff]  ;;  %v276_v55 = vld [vmem:[%s8050_s11 + $0x98] sm:$0xff] }
  0x56   : > { %6854 = vmatprep.subr.bf16.mxu0 %v6853_v21  ;;  %7196 = vmatprep.subr.bf16.mxu1 %v6853_v21  ;;  %v260_v56 = vld [vmem:[%s8050_s11 + $0x18] sm:$0xff]  ;;  %v261_v57 = vld [vmem:[%s8050_s11 + $0x20] sm:$0xff]  ;;  %v262_v59 = vld [vmem:[%s8050_s11 + $0x28] sm:$0xff] }
  0x57   : > { %v277_v58 = vld [vmem:[%s8050_s11 + $0xa0] sm:$0xff]  ;;  %v278_v60 = vld [vmem:[%s8050_s11 + $0xa8] sm:$0xff]  ;;  %v263_v61 = vld [vmem:[%s8050_s11 + $0x30] sm:$0xff] }
  0x58   : > { %v279_v62 = vld [vmem:[%s8050_s11 + $0xb0] sm:$0xff]  ;;  %v264_v63 = vld [vmem:[%s8050_s11 + $0x38] sm:$0xff]  ;;  %v265_v1 = vld [vmem:[%s8050_s11 + $0x40] sm:$0xff] }
  0x59   : > { %6856 = vmatpush1.bf16.msra.mxu0 %v6855_v26  ;;  %7204 = vmatpush1.bf16.msra.mxu1 %v6855_v26  ;;  %v280_v0 = vld [vmem:[%s8050_s11 + $0xb8] sm:$0xff]  ;;  %v281_v2 = vld [vmem:[%s8050_s11 + $0xc0] sm:$0xff]  ;;  %v266_v3 = vld [vmem:[%s8050_s11 + $0x48] sm:$0xff] }
  0x5a   : > { %6858 = vmatprep.subr.bf16.mxu0 %v6857_v27  ;;  %7197 = vmatprep.subr.bf16.mxu1 %v6857_v27  ;;  %v282_v4 = vld [vmem:[%s8050_s11 + $0xc8] sm:$0xff]  ;;  %v267_v5 = vld [vmem:[%s8050_s11 + $0x50] sm:$0xff]  ;;  %v268_v8 = vld [vmem:[%s8050_s11 + $0x58] sm:$0xff] }
  0x5b   : > { %v283_v6 = vld [vmem:[%s8050_s11 + $0xd0] sm:$0xff]  ;;  %v284_v9 = vld [vmem:[%s8050_s11 + $0xd8] sm:$0xff]  ;;  %v269_v10 = vld [vmem:[%s8050_s11 + $0x60] sm:$0xff] }
  0x5c   : > { %v285_v11 = vld [vmem:[%s8050_s11 + $0xe0] sm:$0xff]  ;;  %v270_v12 = vld [vmem:[%s8050_s11 + $0x68] sm:$0xff]  ;;  %v271_v14 = vld [vmem:[%s8050_s11 + $0x70] sm:$0xff] }
  0x5d   : > { %6860 = vmatpush1.bf16.msra.mxu0 %v6859_v32  ;;  %7205 = vmatpush1.bf16.msra.mxu1 %v6859_v32  ;;  %v286_v13 = vld [vmem:[%s8050_s11 + $0xe8] sm:$0xff]  ;;  %v287_v15 = vld [vmem:[%s8050_s11 + $0xf0] sm:$0xff]  ;;  %v272_v16 = vld [vmem:[%s8050_s11 + $0x78] sm:$0xff] }
  0x5e   : > { %6862 = vmatprep.subr.bf16.mxu0 %v6861_v33  ;;  %7198 = vmatprep.subr.bf16.mxu1 %v6861_v33  ;;  %v288_v17 = vld [vmem:[%s8050_s11 + $0xf8] sm:$0xff] }
  0x61   : > { %6864 = vmatpush1.bf16.msra.mxu0 %v6863_v38  ;;  %7206 = vmatpush1.bf16.msra.mxu1 %v6863_v38 }
  0x62   : > { %6866 = vmatprep.subr.bf16.mxu0 %v6865_v39  ;;  %7199 = vmatprep.subr.bf16.mxu1 %v6865_v39 }
  0x65   : > { %6868 = vmatpush1.bf16.msra.mxu0 %v6867_v44  ;;  %7207 = vmatpush1.bf16.msra.mxu1 %v6867_v44 }
  0x66   : > { %6870 = vmatprep.subr.bf16.mxu0 %v6869_v45  ;;  %7200 = vmatprep.subr.bf16.mxu1 %v6869_v45 }
  0x69   : > { %6872 = vmatpush1.bf16.msra.mxu0 %v6871_v48  ;;  %7208 = vmatpush1.bf16.msra.mxu1 %v6871_v48 }
  0x6c   : > { %386 = vmatmul.mubr.f32.vlgmr.msra.gmra.mrb[0].mxu0 %v257_v49  ;;  %482 = vmatmul.mubr.f32.vlgmr.msra.gmra.mrb[0].mxu1 %v273_v50 }
  0x6d   : > { %487 = vmatprep.mubr.f32.mxu1 %v7895_v7  ;;  %391 = vmatprep.mubr.f32.mxu0 %v7895_v7 }
  0x70   : > { %488 = vmatmul.mubr.f32.gmra.mrb[2].mxu1 %v274_v51  ;;  %392 = vmatmul.mubr.f32.gmra.mrb[2].mxu0 %v258_v52 }
  0x71   : > { %493 = vmatprep.mubr.f32.mxu1 %v7895_v7  ;;  %397 = vmatprep.mubr.f32.mxu0 %v7895_v7 }
  0x74   : > { %494 = vmatmul.mubr.f32.gmra.mrb[4].mxu1 %v275_v53  ;;  %398 = vmatmul.mubr.f32.gmra.mrb[4].mxu0 %v259_v54 }
  0x75   : > { %499 = vmatprep.mubr.f32.mxu1 %v7895_v7  ;;  %403 = vmatprep.mubr.f32.mxu0 %v7895_v7 }
  0x78   : > { %500 = vmatmul.mubr.f32.gmra.mrb[6].mxu1 %v276_v55  ;;  %404 = vmatmul.mubr.f32.gmra.mrb[6].mxu0 %v260_v56 }
  0x79   : > { %409 = vmatprep.mubr.f32.mxu0 %v7895_v7  ;;  %505 = vmatprep.mubr.f32.mxu1 %v7895_v7 }
  0x7c   : > { %410 = vmatmul.mubr.f32.gmra.mrb[8].mxu0 %v261_v57  ;;  %506 = vmatmul.mubr.f32.gmra.mrb[8].mxu1 %v277_v58 }
  0x7d   : > { %415 = vmatprep.mubr.f32.mxu0 %v7895_v7  ;;  %511 = vmatprep.mubr.f32.mxu1 %v7895_v7 }
  0x80   : > { %416 = vmatmul.mubr.f32.gmra.mrb[10].mxu0 %v262_v59  ;;  %512 = vmatmul.mubr.f32.gmra.mrb[10].mxu1 %v278_v60 }
  0x81   : > { %421 = vmatprep.mubr.f32.mxu0 %v7895_v7  ;;  %517 = vmatprep.mubr.f32.mxu1 %v7895_v7 }
  0x84   : > { %422 = vmatmul.mubr.f32.gmra.mrb[12].mxu0 %v263_v61  ;;  %518 = vmatmul.mubr.f32.gmra.mrb[12].mxu1 %v279_v62 }
  0x85   : > { %427 = vmatprep.mubr.f32.mxu0 %v7895_v7  ;;  %523 = vmatprep.mubr.f32.mxu1 %v7895_v7 }
  0x88   : > { %428 = vmatmul.mubr.f32.gmra.mrb[14].mxu0 %v264_v63  ;;  %524 = vmatmul.mubr.f32.gmra.mrb[14].mxu1 %v280_v0 }
  0x89   : > { %433 = vmatprep.mubr.f32.mxu0 %v7895_v7  ;;  %529 = vmatprep.mubr.f32.mxu1 %v7895_v7 }
  0x8c   : > { %434 = vmatmul.mubr.f32.gmra.mrb[16].mxu0 %v265_v1  ;;  %530 = vmatmul.mubr.f32.gmra.mrb[16].mxu1 %v281_v2 }
  0x8d   : > { %439 = vmatprep.mubr.f32.mxu0 %v7895_v7  ;;  %535 = vmatprep.mubr.f32.mxu1 %v7895_v7 }
  0x90   : > { %440 = vmatmul.mubr.f32.gmra.mrb[18].mxu0 %v266_v3  ;;  %536 = vmatmul.mubr.f32.gmra.mrb[18].mxu1 %v282_v4 }
  0x91   : > { %445 = vmatprep.mubr.f32.mxu0 %v7895_v7  ;;  %541 = vmatprep.mubr.f32.mxu1 %v7895_v7 }
  0x94   : > { %446 = vmatmul.mubr.f32.gmra.mrb[20].mxu0 %v267_v5  ;;  %542 = vmatmul.mubr.f32.gmra.mrb[20].mxu1 %v283_v6 }
  0x95   : > { %451 = vmatprep.mubr.f32.mxu0 %v7895_v7  ;;  %547 = vmatprep.mubr.f32.mxu1 %v7895_v7 }
  0x98   : > { %452 = vmatmul.mubr.f32.gmra.mrb[22].mxu0 %v268_v8  ;;  %548 = vmatmul.mubr.f32.gmra.mrb[22].mxu1 %v284_v9 }
  0x99   : > { %457 = vmatprep.mubr.f32.mxu0 %v7895_v7  ;;  %553 = vmatprep.mubr.f32.mxu1 %v7895_v7 }
  0x9c   : > { %458 = vmatmul.mubr.f32.gmra.mrb[24].mxu0 %v269_v10  ;;  %554 = vmatmul.mubr.f32.gmra.mrb[24].mxu1 %v285_v11 }
  0x9d   : > { %463 = vmatprep.mubr.f32.mxu0 %v7895_v7  ;;  %559 = vmatprep.mubr.f32.mxu1 %v7895_v7 }
  0xa0   : > { %464 = vmatmul.mubr.f32.gmra.mrb[26].mxu0 %v270_v12  ;;  %560 = vmatmul.mubr.f32.gmra.mrb[26].mxu1 %v286_v13 }
  0xa1   : > { %469 = vmatprep.mubr.f32.mxu0 %v7895_v7  ;;  %565 = vmatprep.mubr.f32.mxu1 %v7895_v7 }
  0xa4   : > { %470 = vmatmul.mubr.f32.gmra.mrb[28].mxu0 %v271_v14  ;;  %566 = vmatmul.mubr.f32.gmra.mrb[28].mxu1 %v287_v15 }
  0xa5   : > { %475 = vmatprep.mubr.f32.mxu0 %v7895_v7  ;;  %571 = vmatprep.mubr.f32.mxu1 %v7895_v7 }
  0xa8   : > { %476 = vmatmul.mubr.f32.gmra.mrb[30].mxu0 %v272_v16  ;;  %572 = vmatmul.mubr.f32.gmra.mrb[30].mxu1 %v288_v17 }
 0x13f   : > { %v8119_v18 = vpop.f32.mrb[0].mxu0  ;;  %v8121_v19 = vpop.f32.mrb[0].mxu1 }
 0x140   : > { %747 = vrot.lane.b32.xlu1 %v8121_v19, %s7896_s12  ;;  %v8125_v20 = vpop.f32.mrb[1].mxu1  ;;  %715 = vrot.lane.b32.xlu0 %v8119_v18, %s7896_s12  ;;  %v8129_v21 = vpop.f32.mrb[1].mxu0 }
 0x141   : > { %10427 = vst [vmem:[#allocation10_spill] sm:$0xff] %v8125_v20  ;;  %10428 = vst [vmem:[#allocation11_spill] sm:$0xff] %v8129_v21 }
 0x142   : > { %667 = vst.msk [vmem:[#allocation3 + $0x80] sm:$0xff] %vm650_vm0, %v8125_v20  ;;  %651 = vst.msk [vmem:[#allocation3] sm:$0xff] %vm650_vm0, %v8129_v21 }
 0x143   : > { %v8135_v7 = vpop.f32.mrb[2].mxu1  ;;  %v8137_v22 = vpop.f32.mrb[2].mxu0 }
 0x144   : > { %1045 = vrot.lane.b32.xlu1 %v8119_v18, %s7897_s27  ;;  %916 = vrot.lane.b32.xlu0 %v8129_v21, %s7896_s12  ;;  %v8143_v23 = vpop.f32.mrb[3].mxu0  ;;  %v8145_v24 = vpop.f32.mrb[3].mxu1 }
 0x145   : > { %10429 = vst [vmem:[#allocation12_spill] sm:$0xff] %v8143_v23  ;;  %10430 = vst [vmem:[#allocation13_spill] sm:$0xff] %v8145_v24 }
 0x146   : > { %652 = vst.msk [vmem:[#allocation3 + $0x8] sm:$0xff] %vm650_vm0, %v8143_v23  ;;  %668 = vst.msk [vmem:[#allocation3 + $0x88] sm:$0xff] %vm650_vm0, %v8145_v24 }
 0x147   : > { %v8151_v25 = vpop.f32.mrb[4].mxu1  ;;  %v8153_v26 = vpop.f32.mrb[4].mxu0 }
 0x148   : > { %1077 = vrot.lane.b32.xlu1 %v8121_v19, %s7897_s27  ;;  %1214 = vrot.lane.b32.xlu0 %v8129_v21, %s7897_s27  ;;  %v8159_v27 = vpop.f32.mrb[5].mxu1  ;;  %v8161_v28 = vpop.f32.mrb[5].mxu0 }
 0x149   : > { %10431 = vst [vmem:[#allocation14_spill] sm:$0xff] %v8159_v27  ;;  %10432 = vst [vmem:[#allocation15_spill] sm:$0xff] %v8161_v28 }
 0x14a   : > { %669 = vst.msk [vmem:[#allocation3 + $0x90] sm:$0xff] %vm650_vm0, %v8159_v27  ;;  %653 = vst.msk [vmem:[#allocation3 + $0x10] sm:$0xff] %vm650_vm0, %v8161_v28 }
 0x14b   : > { %v8167_v29 = vpop.f32.mrb[6].mxu1  ;;  %v8169_v30 = vpop.f32.mrb[6].mxu0 }
 0x14c   : > { %948 = vrot.lane.b32.xlu1 %v8125_v20, %s7896_s12  ;;  %749 = vrot.lane.b32.xlu0 %v8135_v7, %s7896_s12  ;;  %v8175_v31 = vpop.f32.mrb[7].mxu0  ;;  %v8177_v32 = vpop.f32.mrb[7].mxu1 }
 0x14d   : > { %10433 = vst [vmem:[#allocation16_spill] sm:$0xff] %v8175_v31  ;;  %10434 = vst [vmem:[#allocation17_spill] sm:$0xff] %v8177_v32 }
 0x14e   : > { %654 = vst.msk [vmem:[#allocation3 + $0x18] sm:$0xff] %vm650_vm0, %v8175_v31  ;;  %670 = vst.msk [vmem:[#allocation3 + $0x98] sm:$0xff] %vm650_vm0, %v8177_v32 }
 0x14f   : > { %v8183_v33 = vpop.f32.mrb[8].mxu0  ;;  %v8185_v34 = vpop.f32.mrb[8].mxu1 }
 0x150   : > { %1047 = vrot.lane.b32.xlu0 %v8137_v22, %s7897_s27  ;;  %717 = vrot.lane.b32.xlu1 %v8137_v22, %s7896_s12  ;;  %v8191_v35 = vpop.f32.mrb[9].mxu0  ;;  %v8193_v36 = vpop.f32.mrb[9].mxu1 }
 0x151   : > { %10435 = vst [vmem:[#allocation18_spill] sm:$0xff] %v8191_v35  ;;  %10436 = vst [vmem:[#allocation19_spill] sm:$0xff] %v8193_v36 }
 0x152   : > { %655 = vst.msk [vmem:[#allocation3 + $0x20] sm:$0xff] %vm650_vm0, %v8191_v35  ;;  %671 = vst.msk [vmem:[#allocation3 + $0xa0] sm:$0xff] %vm650_vm0, %v8193_v36 }
 0x153   : > { %v8199_v37 = vpop.f32.mrb[10].mxu0  ;;  %v8201_v38 = vpop.f32.mrb[10].mxu1 }
 0x154   : > { %1079 = vrot.lane.b32.xlu0 %v8135_v7, %s7897_s27  ;;  %918 = vrot.lane.b32.xlu1 %v8143_v23, %s7896_s12  ;;  %v8207_v39 = vpop.f32.mrb[11].mxu0  ;;  %v8209_v40 = vpop.f32.mrb[11].mxu1 }
 0x155   : > { %10437 = vst [vmem:[#allocation20_spill] sm:$0xff] %v8207_v39  ;;  %10438 = vst [vmem:[#allocation21_spill] sm:$0xff] %v8209_v40 }
 0x156   : > { %656 = vst.msk [vmem:[#allocation3 + $0x28] sm:$0xff] %vm650_vm0, %v8207_v39  ;;  %672 = vst.msk [vmem:[#allocation3 + $0xa8] sm:$0xff] %vm650_vm0, %v8209_v40 }
 0x157   : > { %v8215_v41 = vpop.f32.mrb[12].mxu0  ;;  %v8217_v42 = vpop.f32.mrb[12].mxu1 }
 0x158   : > { %950 = vrot.lane.b32.xlu0 %v8145_v24, %s7896_s12  ;;  %1216 = vrot.lane.b32.xlu1 %v8143_v23, %s7897_s27  ;;  %v8223_v43 = vpop.f32.mrb[13].mxu0  ;;  %v8225_v44 = vpop.f32.mrb[13].mxu1 }
 0x159   : > { %10439 = vst [vmem:[#allocation22_spill] sm:$0xff] %v8223_v43  ;;  %10440 = vst [vmem:[#allocation23_spill] sm:$0xff] %v8225_v44 }
 0x15a   : > { %657 = vst.msk [vmem:[#allocation3 + $0x30] sm:$0xff] %vm650_vm0, %v8223_v43  ;;  %673 = vst.msk [vmem:[#allocation3 + $0xb0] sm:$0xff] %vm650_vm0, %v8225_v44 }
 0x15b   : > { %v8231_v45 = vpop.f32.mrb[14].mxu0  ;;  %v8233_v46 = vpop.f32.mrb[14].mxu1 }
 0x15c   : > { %753 = vrot.lane.b32.xlu0 %v8167_v29, %s7896_s12  ;;  %719 = vrot.lane.b32.xlu1 %v8153_v26, %s7896_s12  ;;  %v8239_v47 = vpop.f32.mrb[15].mxu0  ;;  %v8241_v48 = vpop.f32.mrb[15].mxu1 }
 0x15d   : > { %10441 = vst [vmem:[#allocation24_spill] sm:$0xff] %v8239_v47  ;;  %10442 = vst [vmem:[#allocation25_spill] sm:$0xff] %v8241_v48 }
 0x15e   : > { %658 = vst.msk [vmem:[#allocation3 + $0x38] sm:$0xff] %vm650_vm0, %v8239_v47  ;;  %674 = vst.msk [vmem:[#allocation3 + $0xb8] sm:$0xff] %vm650_vm0, %v8241_v48 }
 0x15f   : > { %v8247_v49 = vpop.f32.mrb[16].mxu0  ;;  %v8249_v50 = vpop.f32.mrb[16].mxu1 }
 0x160   : > { %751 = vrot.lane.b32.xlu1 %v8151_v25, %s7896_s12  ;;  %1051 = vrot.lane.b32.xlu0 %v8169_v30, %s7897_s27  ;;  %v8255_v51 = vpop.f32.mrb[17].mxu0  ;;  %v8257_v52 = vpop.f32.mrb[17].mxu1 }
 0x161   : > { %10443 = vst [vmem:[#allocation26_spill] sm:$0xff] %v8255_v51  ;;  %10444 = vst [vmem:[#allocation27_spill] sm:$0xff] %v8257_v52 }
 0x162   : > { %659 = vst.msk [vmem:[#allocation3 + $0x40] sm:$0xff] %vm650_vm0, %v8255_v51  ;;  %675 = vst.msk [vmem:[#allocation3 + $0xc0] sm:$0xff] %vm650_vm0, %v8257_v52 }
 0x163   : > { %v8263_v53 = vpop.f32.mrb[18].mxu0  ;;  %v8265_v54 = vpop.f32.mrb[18].mxu1 }
 0x164   : > { %1049 = vrot.lane.b32.xlu1 %v8153_v26, %s7897_s27  ;;  %1083 = vrot.lane.b32.xlu0 %v8167_v29, %s7897_s27  ;;  %v8271_v55 = vpop.f32.mrb[19].mxu0  ;;  %v8273_v56 = vpop.f32.mrb[19].mxu1 }
 0x165   : > { %10445 = vst [vmem:[#allocation28_spill] sm:$0xff] %v8271_v55  ;;  %10446 = vst [vmem:[#allocation29_spill] sm:$0xff] %v8273_v56 }
 0x166   : > { %660 = vst.msk [vmem:[#allocation3 + $0x48] sm:$0xff] %vm650_vm0, %v8271_v55  ;;  %676 = vst.msk [vmem:[#allocation3 + $0xc8] sm:$0xff] %vm650_vm0, %v8273_v56 }
 0x167   : > { %v8279_v57 = vpop.f32.mrb[20].mxu0  ;;  %v8281_v58 = vpop.f32.mrb[20].mxu1 }
 0x168   : > { %1081 = vrot.lane.b32.xlu1 %v8151_v25, %s7897_s27  ;;  %922 = vrot.lane.b32.xlu0 %v8175_v31, %s7896_s12  ;;  %v8287_v59 = vpop.f32.mrb[21].mxu0  ;;  %v8289_v60 = vpop.f32.mrb[21].mxu1 }
 0x169   : > { %10447 = vst [vmem:[#allocation30_spill] sm:$0xff] %v8287_v59  ;;  %10448 = vst [vmem:[#allocation31_spill] sm:$0xff] %v8289_v60 }
 0x16a   : > { %661 = vst.msk [vmem:[#allocation3 + $0x50] sm:$0xff] %vm650_vm0, %v8287_v59  ;;  %677 = vst.msk [vmem:[#allocation3 + $0xd0] sm:$0xff] %vm650_vm0, %v8289_v60 }
 0x16b   : > { %v8295_v61 = vpop.f32.mrb[22].mxu0  ;;  %v8297_v62 = vpop.f32.mrb[22].mxu1 }
 0x16c   : > { %920 = vrot.lane.b32.xlu1 %v8161_v28, %s7896_s12  ;;  %954 = vrot.lane.b32.xlu0 %v8177_v32, %s7896_s12  ;;  %v8303_v63 = vpop.f32.mrb[23].mxu0  ;;  %v8305_v0 = vpop.f32.mrb[23].mxu1 }
 0x16d   : > { %10449 = vst [vmem:[#allocation32_spill] sm:$0xff] %v8303_v63  ;;  %10450 = vst [vmem:[#allocation33_spill] sm:$0xff] %v8305_v0 }
 0x16e   : > { %662 = vst.msk [vmem:[#allocation3 + $0x58] sm:$0xff] %vm650_vm0, %v8303_v63  ;;  %678 = vst.msk [vmem:[#allocation3 + $0xd8] sm:$0xff] %vm650_vm0, %v8305_v0 }
 0x16f   : > { %v8311_v1 = vpop.f32.mrb[24].mxu0  ;;  %v8313_v2 = vpop.f32.mrb[24].mxu1 }
 0x170   : > { %952 = vrot.lane.b32.xlu1 %v8159_v27, %s7896_s12  ;;  %1220 = vrot.lane.b32.xlu0 %v8175_v31, %s7897_s27  ;;  %v8319_v3 = vpop.f32.mrb[25].mxu0  ;;  %v8321_v4 = vpop.f32.mrb[25].mxu1 }
 0x171   : > { %10451 = vst [vmem:[#allocation34_spill] sm:$0xff] %v8319_v3  ;;  %10452 = vst [vmem:[#allocation35_spill] sm:$0xff] %v8321_v4 }
 0x172   : > { %663 = vst.msk [vmem:[#allocation3 + $0x60] sm:$0xff] %vm650_vm0, %v8319_v3  ;;  %679 = vst.msk [vmem:[#allocation3 + $0xe0] sm:$0xff] %vm650_vm0, %v8321_v4 }
 0x173   : > { %v8327_v5 = vpop.f32.mrb[26].mxu0  ;;  %v8329_v6 = vpop.f32.mrb[26].mxu1 }
 0x174   : > { %1218 = vrot.lane.b32.xlu1 %v8161_v28, %s7897_s27  ;;  %725 = vrot.lane.b32.xlu0 %v8199_v37, %s7896_s12  ;;  %v8335_v8 = vpop.f32.mrb[27].mxu0  ;;  %v8337_v9 = vpop.f32.mrb[27].mxu1 }
 0x175   : > { %10453 = vst [vmem:[#allocation36_spill] sm:$0xff] %v8335_v8  ;;  %10454 = vst [vmem:[#allocation37_spill] sm:$0xff] %v8337_v9 }
 0x176   : > { %664 = vst.msk [vmem:[#allocation3 + $0x68] sm:$0xff] %vm650_vm0, %v8335_v8  ;;  %680 = vst.msk [vmem:[#allocation3 + $0xe8] sm:$0xff] %vm650_vm0, %v8337_v9 }
 0x177   : > { %v8343_v10 = vpop.f32.mrb[28].mxu0  ;;  %v8345_v11 = vpop.f32.mrb[28].mxu1 }
 0x178   : > { %721 = vrot.lane.b32.xlu1 %v8169_v30, %s7896_s12  ;;  %757 = vrot.lane.b32.xlu0 %v8201_v38, %s7896_s12  ;;  %v8351_v12 = vpop.f32.mrb[29].mxu0  ;;  %v8353_v13 = vpop.f32.mrb[29].mxu1 }
 0x179   : > { %10455 = vst [vmem:[#allocation38_spill] sm:$0xff] %v8351_v12  ;;  %10456 = vst [vmem:[#allocation39_spill] sm:$0xff] %v8353_v13 }
 0x17a   : > { %665 = vst.msk [vmem:[#allocation3 + $0x70] sm:$0xff] %vm650_vm0, %v8351_v12  ;;  %681 = vst.msk [vmem:[#allocation3 + $0xf0] sm:$0xff] %vm650_vm0, %v8353_v13 }
 0x17b   : > { %v8359_v14 = vpop.f32.mrb[30].mxu0  ;;  %v8361_v15 = vpop.f32.mrb[30].mxu1 }
 0x17c   : > { %723 = vrot.lane.b32.xlu1 %v8183_v33, %s7896_s12  ;;  %1055 = vrot.lane.b32.xlu0 %v8199_v37, %s7897_s27  ;;  %v8367_v16 = vpop.f32.mrb[31].mxu0  ;;  %v8371_v17 = vpop.f32.mrb[31].mxu1 }
 0x17d   : > { %10457 = vst [vmem:[#allocation40_spill] sm:$0xff] %v8367_v16  ;;  %666 = vst.msk [vmem:[#allocation3 + $0x78] sm:$0xff] %vm650_vm0, %v8367_v16 }
 0x17e   : > { %10458 = vst [vmem:[#allocation41_spill] sm:$0xff] %v8371_v17  ;;  %682 = vst.msk [vmem:[#allocation3 + $0xf8] sm:$0xff] %vm650_vm0, %v8371_v17 }
 0x180   : > { %755 = vrot.lane.b32.xlu1 %v8185_v34, %s7896_s12  ;;  %1087 = vrot.lane.b32.xlu0 %v8201_v38, %s7897_s27 }
 0x184   : > { %1053 = vrot.lane.b32.xlu1 %v8183_v33, %s7897_s27  ;;  %926 = vrot.lane.b32.xlu0 %v8207_v39, %s7896_s12 }
 0x188   : > { %1085 = vrot.lane.b32.xlu1 %v8185_v34, %s7897_s27  ;;  %958 = vrot.lane.b32.xlu0 %v8209_v40, %s7896_s12 }
 0x18c   : > { %924 = vrot.lane.b32.xlu1 %v8191_v35, %s7896_s12  ;;  %729 = vrot.lane.b32.xlu0 %v8231_v45, %s7896_s12 }
 0x190   : > { %956 = vrot.lane.b32.xlu1 %v8193_v36, %s7896_s12  ;;  %761 = vrot.lane.b32.xlu0 %v8233_v46, %s7896_s12 }
 0x194   : > { %1222 = vrot.lane.b32.xlu1 %v8191_v35, %s7897_s27  ;;  %1059 = vrot.lane.b32.xlu0 %v8231_v45, %s7897_s27 }
 0x198   : > { %727 = vrot.lane.b32.xlu1 %v8215_v41, %s7896_s12  ;;  %1091 = vrot.lane.b32.xlu0 %v8233_v46, %s7897_s27 }
 0x19c   : > { %759 = vrot.lane.b32.xlu1 %v8217_v42, %s7896_s12  ;;  %930 = vrot.lane.b32.xlu0 %v8239_v47, %s7896_s12 }
 0x1a0   : > { %1057 = vrot.lane.b32.xlu1 %v8215_v41, %s7897_s27  ;;  %962 = vrot.lane.b32.xlu0 %v8241_v48, %s7896_s12 }
 0x1a4   : > { %1089 = vrot.lane.b32.xlu1 %v8217_v42, %s7897_s27  ;;  %733 = vrot.lane.b32.xlu0 %v8263_v53, %s7896_s12 }
 0x1a8   : > { %928 = vrot.lane.b32.xlu1 %v8223_v43, %s7896_s12  ;;  %765 = vrot.lane.b32.xlu0 %v8265_v54, %s7896_s12 }
 0x1ac   : > { %960 = vrot.lane.b32.xlu1 %v8225_v44, %s7896_s12  ;;  %1063 = vrot.lane.b32.xlu0 %v8263_v53, %s7897_s27 }
 0x1b0   : > { %731 = vrot.lane.b32.xlu1 %v8247_v49, %s7896_s12  ;;  %1095 = vrot.lane.b32.xlu0 %v8265_v54, %s7897_s27 }
 0x1b2   : > { %v8427_v31 = vpop.permute.xlu1 %747  ;;  %v8429_v21 = vpop.permute.xlu0 %715 }
 0x1b3   : > { %10459 = vst [vmem:[#allocation42_spill] sm:$0xff] %v8427_v31  ;;  %10460 = vst [vmem:[#allocation43_spill] sm:$0xff] %v8429_v21 }
 0x1b4   : > { %763 = vrot.lane.b32.xlu1 %v8249_v50, %s7896_s12  ;;  %934 = vrot.lane.b32.xlu0 %v8271_v55, %s7896_s12 }
 0x1b6   : > { %v8435_v35 = vpop.permute.xlu1 %1045  ;;  %v917_v28 = vpop.permute.xlu0 %916 }
 0x1b7   : > { %10461 = vst [vmem:[#allocation44_spill] sm:$0xff] %v8435_v35  ;;  %1013 = vst.msk [vmem:[#allocation3 + $0x100] sm:$0xff] %vm650_vm0, %v917_v28 }
 0x1b8   : > { %1061 = vrot.lane.b32.xlu1 %v8247_v49, %s7897_s27  ;;  %966 = vrot.lane.b32.xlu0 %v8273_v56, %s7896_s12 }
 0x1ba   : > { %v8442_v23 = vpop.permute.xlu1 %1077  ;;  %v1215_v31 = vpop.permute.xlu0 %1214 }
 0x1bb   : > { %10462 = vst [vmem:[#allocation45_spill] sm:$0xff] %v8442_v23  ;;  %1311 = vst.msk [vmem:[#allocation3 + $0x200] sm:$0xff] %vm650_vm0, %v1215_v31 }
 0x1bc   : > { %1093 = vrot.lane.b32.xlu1 %v8249_v50, %s7897_s27  ;;  %737 = vrot.lane.b32.xlu0 %v8295_v61, %s7896_s12 }
 0x1be   : > { %v949_v35 = vpop.permute.xlu1 %948  ;;  %v8449_v21 = vpop.permute.xlu0 %749 }
 0x1bf   : > { %10463 = vst [vmem:[#allocation46_spill] sm:$0xff] %v8449_v21  ;;  %1029 = vst.msk [vmem:[#allocation3 + $0x180] sm:$0xff] %vm650_vm0, %v949_v35 }
 0x1c0   : > { %932 = vrot.lane.b32.xlu1 %v8255_v51, %s7896_s12  ;;  %769 = vrot.lane.b32.xlu0 %v8297_v62, %s7896_s12 }
 0x1c2   : > { %v8456_v28 = vpop.permute.xlu0 %1047  ;;  %v8458_v31 = vpop.permute.xlu1 %717 }
 0x1c3   : > { %10464 = vst [vmem:[#allocation47_spill] sm:$0xff] %v8456_v28  ;;  %10465 = vst [vmem:[#allocation48_spill] sm:$0xff] %v8458_v31 }
 0x1c4   : > { %964 = vrot.lane.b32.xlu1 %v8257_v52, %s7896_s12  ;;  %1067 = vrot.lane.b32.xlu0 %v8295_v61, %s7897_s27 }
 0x1c6   : > { %v8464_v23 = vpop.permute.xlu0 %1079  ;;  %v919_v21 = vpop.permute.xlu1 %918 }
 0x1c7   : > { %10466 = vst [vmem:[#allocation49_spill] sm:$0xff] %v8464_v23  ;;  %1014 = vst.msk [vmem:[#allocation3 + $0x108] sm:$0xff] %vm650_vm0, %v919_v21 }
 0x1c8   : > { %735 = vrot.lane.b32.xlu1 %v8279_v57, %s7896_s12  ;;  %1099 = vrot.lane.b32.xlu0 %v8297_v62, %s7897_s27 }
 0x1ca   : > { %v951_v35 = vpop.permute.xlu0 %950  ;;  %v1217_v28 = vpop.permute.xlu1 %1216 }
 0x1cb   : > { %1030 = vst.msk [vmem:[#allocation3 + $0x188] sm:$0xff] %vm650_vm0, %v951_v35  ;;  %1312 = vst.msk [vmem:[#allocation3 + $0x208] sm:$0xff] %vm650_vm0, %v1217_v28 }
 0x1cc   : > { %767 = vrot.lane.b32.xlu1 %v8281_v58, %s7896_s12  ;;  %938 = vrot.lane.b32.xlu0 %v8303_v63, %s7896_s12 }
 0x1ce   : > { %v8477_v23 = vpop.permute.xlu0 %753  ;;  %v8479_v21 = vpop.permute.xlu1 %719 }
 0x1cf   : > { %10467 = vst [vmem:[#allocation50_spill] sm:$0xff] %v8477_v23  ;;  %10468 = vst [vmem:[#allocation51_spill] sm:$0xff] %v8479_v21 }
 0x1d0   : > { %1065 = vrot.lane.b32.xlu1 %v8279_v57, %s7897_s27  ;;  %970 = vrot.lane.b32.xlu0 %v8305_v0, %s7896_s12 }
 0x1d2   : > { %v8485_v31 = vpop.permute.xlu1 %751  ;;  %v8487_v35 = vpop.permute.xlu0 %1051 }
 0x1d3   : > { %10469 = vst [vmem:[#allocation52_spill] sm:$0xff] %v8485_v31  ;;  %10470 = vst [vmem:[#allocation53_spill] sm:$0xff] %v8487_v35 }
 0x1d4   : > { %1097 = vrot.lane.b32.xlu1 %v8281_v58, %s7897_s27  ;;  %741 = vrot.lane.b32.xlu0 %v8327_v5, %s7896_s12 }
 0x1d6   : > { %v8493_v28 = vpop.permute.xlu1 %1049  ;;  %v8495_v23 = vpop.permute.xlu0 %1083 }
 0x1d7   : > { %10471 = vst [vmem:[#allocation54_spill] sm:$0xff] %v8493_v28  ;;  %10472 = vst [vmem:[#allocation55_spill] sm:$0xff] %v8495_v23 }
 0x1d8   : > { %936 = vrot.lane.b32.xlu1 %v8287_v59, %s7896_s12  ;;  %773 = vrot.lane.b32.xlu0 %v8329_v6, %s7896_s12 }
 0x1da   : > { %v8501_v21 = vpop.permute.xlu1 %1081  ;;  %v923_v31 = vpop.permute.xlu0 %922 }
 0x1db   : > { %10473 = vst [vmem:[#allocation56_spill] sm:$0xff] %v8501_v21  ;;  %1016 = vst.msk [vmem:[#allocation3 + $0x118] sm:$0xff] %vm650_vm0, %v923_v31 }
 0x1dc   : > { %968 = vrot.lane.b32.xlu1 %v8289_v60, %s7896_s12  ;;  %1071 = vrot.lane.b32.xlu0 %v8327_v5, %s7897_s27 }
 0x1de   : > { %v921_v35 = vpop.permute.xlu1 %920  ;;  %v955_v28 = vpop.permute.xlu0 %954 }
 0x1df   : > { %1015 = vst.msk [vmem:[#allocation3 + $0x110] sm:$0xff] %vm650_vm0, %v921_v35  ;;  %1032 = vst.msk [vmem:[#allocation3 + $0x198] sm:$0xff] %vm650_vm0, %v955_v28 }
 0x1e0   : > { %739 = vrot.lane.b32.xlu1 %v8311_v1, %s7896_s12  ;;  %1103 = vrot.lane.b32.xlu0 %v8329_v6, %s7897_s27 }
 0x1e2   : > { %v953_v23 = vpop.permute.xlu1 %952  ;;  %v1221_v31 = vpop.permute.xlu0 %1220 }
 0x1e3   : > { %1031 = vst.msk [vmem:[#allocation3 + $0x190] sm:$0xff] %vm650_vm0, %v953_v23  ;;  %1314 = vst.msk [vmem:[#allocation3 + $0x218] sm:$0xff] %vm650_vm0, %v1221_v31 }
 0x1e4   : > { %771 = vrot.lane.b32.xlu1 %v8313_v2, %s7896_s12  ;;  %942 = vrot.lane.b32.xlu0 %v8335_v8, %s7896_s12 }
 0x1e6   : > { %v1219_v35 = vpop.permute.xlu1 %1218  ;;  %v8520_v28 = vpop.permute.xlu0 %725 }
 0x1e7   : > { %10474 = vst [vmem:[#allocation57_spill] sm:$0xff] %v8520_v28  ;;  %1313 = vst.msk [vmem:[#allocation3 + $0x210] sm:$0xff] %vm650_vm0, %v1219_v35 }
 0x1e8   : > { %1069 = vrot.lane.b32.xlu1 %v8311_v1, %s7897_s27  ;;  %974 = vrot.lane.b32.xlu0 %v8337_v9, %s7896_s12 }
 0x1ea   : > { %v8527_v23 = vpop.permute.xlu1 %721  ;;  %v8529_v31 = vpop.permute.xlu0 %757 }
 0x1eb   : > { %10475 = vst [vmem:[#allocation58_spill] sm:$0xff] %v8527_v23  ;;  %10476 = vst [vmem:[#allocation59_spill] sm:$0xff] %v8529_v31 }
 0x1ec   : > { %1101 = vrot.lane.b32.xlu1 %v8313_v2, %s7897_s27  ;;  %745 = vrot.lane.b32.xlu0 %v8359_v14, %s7896_s12 }
 0x1ee   : > { %v8535_v21 = vpop.permute.xlu1 %723  ;;  %v8537_v28 = vpop.permute.xlu0 %1055 }
 0x1ef   : > { %10477 = vst [vmem:[#allocation60_spill] sm:$0xff] %v8535_v21  ;;  %10478 = vst [vmem:[#allocation61_spill] sm:$0xff] %v8537_v28 }
 0x1f0   : > { %940 = vrot.lane.b32.xlu1 %v8319_v3, %s7896_s12  ;;  %777 = vrot.lane.b32.xlu0 %v8361_v15, %s7896_s12 }
 0x1f2   : > { %v8543_v35 = vpop.permute.xlu1 %755  ;;  %v8545_v23 = vpop.permute.xlu0 %1087 }
 0x1f3   : > { %10479 = vst [vmem:[#allocation62_spill] sm:$0xff] %v8543_v35  ;;  %10480 = vst [vmem:[#allocation63_spill] sm:$0xff] %v8545_v23 }
 0x1f4   : > { %972 = vrot.lane.b32.xlu1 %v8321_v4, %s7896_s12  ;;  %1075 = vrot.lane.b32.xlu0 %v8359_v14, %s7897_s27 }
 0x1f6   : > { %v8551_v31 = vpop.permute.xlu1 %1053  ;;  %v927_v21 = vpop.permute.xlu0 %926 }
 0x1f7   : > { %10481 = vst [vmem:[#allocation64_spill] sm:$0xff] %v8551_v31  ;;  %1018 = vst.msk [vmem:[#allocation3 + $0x128] sm:$0xff] %vm650_vm0, %v927_v21 }
 0x1f8   : > { %743 = vrot.lane.b32.xlu1 %v8343_v10, %s7896_s12  ;;  %1107 = vrot.lane.b32.xlu0 %v8361_v15, %s7897_s27 }
 0x1fa   : > { %v8558_v28 = vpop.permute.xlu1 %1085  ;;  %v959_v23 = vpop.permute.xlu0 %958 }
 0x1fb   : > { %10482 = vst [vmem:[#allocation65_spill] sm:$0xff] %v8558_v28  ;;  %1034 = vst.msk [vmem:[#allocation3 + $0x1a8] sm:$0xff] %vm650_vm0, %v959_v23 }
 0x1fc   : > { %775 = vrot.lane.b32.xlu1 %v8345_v11, %s7896_s12  ;;  %946 = vrot.lane.b32.xlu0 %v8367_v16, %s7896_s12 }
 0x1fe   : > { %v925_v31 = vpop.permute.xlu1 %924  ;;  %v8565_v35 = vpop.permute.xlu0 %729 }
 0x1ff   : > { %10483 = vst [vmem:[#allocation66_spill] sm:$0xff] %v8565_v35  ;;  %1017 = vst.msk [vmem:[#allocation3 + $0x120] sm:$0xff] %vm650_vm0, %v925_v31 }
 0x200   : > { %1073 = vrot.lane.b32.xlu1 %v8343_v10, %s7897_s27  ;;  %978 = vrot.lane.b32.xlu0 %v8371_v17, %s7896_s12 }
 0x202   : > { %v957_v21 = vpop.permute.xlu1 %956  ;;  %v8572_v28 = vpop.permute.xlu0 %761 }
 0x203   : > { %1033 = vst.msk [vmem:[#allocation3 + $0x1a0] sm:$0xff] %vm650_vm0, %v957_v21 }
 0x204   : > { %1105 = vrot.lane.b32.xlu1 %v8345_v11, %s7897_s27  ;;  %1224 = vrot.lane.b32.xlu0 %v8207_v39, %s7897_s27 }
 0x206   : > { %v1223_v23 = vpop.permute.xlu1 %1222  ;;  %v8579_v35 = vpop.permute.xlu0 %1059 }
 0x207   : > { %10484 = vst [vmem:[#allocation67_spill] sm:$0xff] %v8579_v35  ;;  %1315 = vst.msk [vmem:[#allocation3 + $0x220] sm:$0xff] %vm650_vm0, %v1223_v23 }
 0x208   : > { %944 = vrot.lane.b32.xlu1 %v8351_v12, %s7896_s12  ;;  %1228 = vrot.lane.b32.xlu0 %v8239_v47, %s7897_s27 }
 0x20a   : > { %v8586_v31 = vpop.permute.xlu1 %727  ;;  %v8588_v21 = vpop.permute.xlu0 %1091 }
 0x20b   : > { %10485 = vst [vmem:[#allocation68_spill] sm:$0xff] %v8588_v21 }
 0x20c   : > { %976 = vrot.lane.b32.xlu1 %v8353_v13, %s7896_s12  ;;  %1232 = vrot.lane.b32.xlu0 %v8271_v55, %s7897_s27 }
 0x20e   : > { %v8594_v39 = vpop.permute.xlu1 %759  ;;  %v931_v35 = vpop.permute.xlu0 %930 }
 0x20f   : > { %1020 = vst.msk [vmem:[#allocation3 + $0x138] sm:$0xff] %vm650_vm0, %v931_v35 }
 0x210   : > { %1226 = vrot.lane.b32.xlu1 %v8223_v43, %s7897_s27  ;;  %1236 = vrot.lane.b32.xlu0 %v8303_v63, %s7897_s27 }
 0x212   : > { %v8601_v23 = vpop.permute.xlu1 %1057  ;;  %v963_v47 = vpop.permute.xlu0 %962 }
 0x213   : > { %1036 = vst.msk [vmem:[#allocation3 + $0x1b8] sm:$0xff] %vm650_vm0, %v963_v47 }
 0x214   : > { %1230 = vrot.lane.b32.xlu1 %v8255_v51, %s7897_s27  ;;  %1240 = vrot.lane.b32.xlu0 %v8335_v8, %s7897_s27 }
 0x216   : > { %v8608_v55 = vpop.permute.xlu1 %1089  ;;  %v8610_v35 = vpop.permute.xlu0 %733 }
 0x218   : > { %1234 = vrot.lane.b32.xlu1 %v8287_v59, %s7897_s27  ;;  %1244 = vrot.lane.b32.xlu0 %v8367_v16, %s7897_s27 }
 0x21a   : > { %v929_v63 = vpop.permute.xlu1 %928  ;;  %v8616_v43 = vpop.permute.xlu0 %765 }
 0x21b   : > { %1019 = vst.msk [vmem:[#allocation3 + $0x130] sm:$0xff] %vm650_vm0, %v929_v63 }
 0x21c   : > { %1238 = vrot.lane.b32.xlu1 %v8319_v3, %s7897_s27  ;;  %1248 = vrot.lane.b32.xlu0 %v8145_v24, %s7897_s27 }
 0x21e   : > { %v961_v47 = vpop.permute.xlu1 %960  ;;  %v8623_v8 = vpop.permute.xlu0 %1063 }
 0x21f   : > { %1035 = vst.msk [vmem:[#allocation3 + $0x1b0] sm:$0xff] %vm650_vm0, %v961_v47 }
 0x220   : > { %1242 = vrot.lane.b32.xlu1 %v8351_v12, %s7897_s27  ;;  %1252 = vrot.lane.b32.xlu0 %v8177_v32, %s7897_s27 }
 0x222   : > { %v8630_v16 = vpop.permute.xlu1 %731  ;;  %v8632_v63 = vpop.permute.xlu0 %1095 }
 0x223   : > { %10486 = vst [vmem:[#allocation69_spill] sm:$0xff] %v8632_v63 }
 0x224   : > { %1246 = vrot.lane.b32.xlu1 %v8125_v20, %s7897_s27  ;;  %1256 = vrot.lane.b32.xlu0 %v8209_v40, %s7897_s27 }
 0x226   : > { %v8638_v24 = vpop.permute.xlu1 %763  ;;  %v935_v3 = vpop.permute.xlu0 %934 }
 0x227   : > { %1022 = vst.msk [vmem:[#allocation3 + $0x148] sm:$0xff] %vm650_vm0, %v935_v3 }
 0x228   : > { %1250 = vrot.lane.b32.xlu1 %v8159_v27, %s7897_s27  ;;  %1260 = vrot.lane.b32.xlu0 %v8241_v48, %s7897_s27 }
 0x22a   : > { %v8645_v47 = vpop.permute.xlu1 %1061  ;;  %v967_v32 = vpop.permute.xlu0 %966 }
 0x22b   : > { %1038 = vst.msk [vmem:[#allocation3 + $0x1c8] sm:$0xff] %vm650_vm0, %v967_v32 }
 0x22c   : > { %1254 = vrot.lane.b32.xlu1 %v8193_v36, %s7897_s27  ;;  %1264 = vrot.lane.b32.xlu0 %v8273_v56, %s7897_s27 }
 0x22e   : > { %v8652_v40 = vpop.permute.xlu1 %1093  ;;  %v8654_v3 = vpop.permute.xlu0 %737 }
 0x22f   : > { %10487 = vst [vmem:[#allocation70_spill] sm:$0xff] %v8652_v40 }
 0x230   : > { %1258 = vrot.lane.b32.xlu1 %v8225_v44, %s7897_s27  ;;  %1268 = vrot.lane.b32.xlu0 %v8305_v0, %s7897_s27 }
 0x232   : > { %v933_v48 = vpop.permute.xlu1 %932  ;;  %v8660_v27 = vpop.permute.xlu0 %769 }
 0x233   : > { %1021 = vst.msk [vmem:[#allocation3 + $0x140] sm:$0xff] %vm650_vm0, %v933_v48 }
 0x234   : > { %1262 = vrot.lane.b32.xlu1 %v8257_v52, %s7897_s27  ;;  %1272 = vrot.lane.b32.xlu0 %v8337_v9, %s7897_s27 }
 0x236   : > { %v965_v32 = vpop.permute.xlu1 %964  ;;  %v8667_v56 = vpop.permute.xlu0 %1067 }
 0x237   : > { %10488 = vst [vmem:[#allocation71_spill] sm:$0xff] %v8667_v56  ;;  %1037 = vst.msk [vmem:[#allocation3 + $0x1c0] sm:$0xff] %vm650_vm0, %v965_v32 }
 0x238   : > { %1266 = vrot.lane.b32.xlu1 %v8289_v60, %s7897_s27  ;;  %1276 = vrot.lane.b32.xlu0 %v8371_v17, %s7897_s27 }
 0x23a   : > { %v8674_v0 = vpop.permute.xlu1 %735  ;;  %v8676_v48 = vpop.permute.xlu0 %1099 }
 0x23b   : > { %10489 = vst [vmem:[#allocation72_spill] sm:$0xff] %v8676_v48 }
 0x23c   : > { %1270 = vrot.lane.b32.xlu1 %v8321_v4, %s7897_s27  ;;  %1345 = vrot.lane.b32.xlu0 %v8137_v22, %s7898_s6 }
 0x23e   : > { %v8682_v9 = vpop.permute.xlu1 %767  ;;  %v939_v32 = vpop.permute.xlu0 %938 }
 0x23f   : > { %1024 = vst.msk [vmem:[#allocation3 + $0x158] sm:$0xff] %vm650_vm0, %v939_v32 }
 0x240   : > { %1274 = vrot.lane.b32.xlu1 %v8353_v13, %s7897_s27  ;;  %1349 = vrot.lane.b32.xlu0 %v8169_v30, %s7898_s6 }
 0x242   : > { %v8689_v17 = vpop.permute.xlu1 %1065  ;;  %v971_v60 = vpop.permute.xlu0 %970 }
 0x243   : > { %1040 = vst.msk [vmem:[#allocation3 + $0x1d8] sm:$0xff] %vm650_vm0, %v971_v60 }
 0x244   : > { %1343 = vrot.lane.b32.xlu1 %v8119_v18, %s7898_s6  ;;  %1353 = vrot.lane.b32.xlu0 %v8199_v37, %s7898_s6 }
 0x246   : > { %v8696_v4 = vpop.permute.xlu1 %1097  ;;  %v8698_v32 = vpop.permute.xlu0 %741 }
 0x247   : > { %10490 = vst [vmem:[#allocation73_spill] sm:$0xff] %v8696_v4 }
 0x248   : > { %1347 = vrot.lane.b32.xlu1 %v8153_v26, %s7898_s6  ;;  %1357 = vrot.lane.b32.xlu0 %v8231_v45, %s7898_s6 }
 0x24a   : > { %v937_v13 = vpop.permute.xlu1 %936  ;;  %v8704_v52 = vpop.permute.xlu0 %773 }
 0x24b   : > { %1023 = vst.msk [vmem:[#allocation3 + $0x150] sm:$0xff] %vm650_vm0, %v937_v13 }
 0x24c   : > { %1351 = vrot.lane.b32.xlu1 %v8183_v33, %s7898_s6  ;;  %1361 = vrot.lane.b32.xlu0 %v8263_v53, %s7898_s6 }
 0x24e   : > { %v969_v60 = vpop.permute.xlu1 %968  ;;  %v8711_v44 = vpop.permute.xlu0 %1071 }
 0x24f   : > { %10491 = vst [vmem:[#allocation74_spill] sm:$0xff] %v8711_v44  ;;  %1039 = vst.msk [vmem:[#allocation3 + $0x1d0] sm:$0xff] %vm650_vm0, %v969_v60 }
 0x250   : > { %1355 = vrot.lane.b32.xlu1 %v8215_v41, %s7898_s6  ;;  %1365 = vrot.lane.b32.xlu0 %v8295_v61, %s7898_s6 }
 0x252   : > { %v8718_v36 = vpop.permute.xlu1 %739  ;;  %v8720_v13 = vpop.permute.xlu0 %1103 }
 0x253   : > { %10492 = vst [vmem:[#allocation75_spill] sm:$0xff] %v8720_v13 }
 0x254   : > { %1359 = vrot.lane.b32.xlu1 %v8247_v49, %s7898_s6  ;;  %1369 = vrot.lane.b32.xlu0 %v8327_v5, %s7898_s6 }
 0x256   : > { %v8726_v20 = vpop.permute.xlu1 %771  ;;  %v943_v12 = vpop.permute.xlu0 %942 }
 0x257   : > { %1026 = vst.msk [vmem:[#allocation3 + $0x168] sm:$0xff] %vm650_vm0, %v943_v12 }
 0x258   : > { %1363 = vrot.lane.b32.xlu1 %v8279_v57, %s7898_s6  ;;  %1373 = vrot.lane.b32.xlu0 %v8359_v14, %s7898_s6 }
 0x25a   : > { %v8733_v60 = vpop.permute.xlu1 %1069  ;;  %v975_v59 = vpop.permute.xlu0 %974 }
 0x25b   : > { %10493 = vst [vmem:[#allocation76_spill] sm:$0xff] %v8733_v60  ;;  %1042 = vst.msk [vmem:[#allocation3 + $0x1e8] sm:$0xff] %vm650_vm0, %v975_v59 }
 0x25c   : > { %1367 = vrot.lane.b32.xlu1 %v8311_v1, %s7898_s6  ;;  %1377 = vrot.lane.b32.xlu0 %v8135_v7, %s7898_s6 }
 0x25e   : > { %v8740_v51 = vpop.permute.xlu1 %1101  ;;  %v8742_v12 = vpop.permute.xlu0 %745 }
 0x25f   : > { %10494 = vst [vmem:[#allocation77_spill] sm:$0xff] %v8740_v51 }
 0x260   : > { %1371 = vrot.lane.b32.xlu1 %v8343_v10, %s7898_s6  ;;  %1381 = vrot.lane.b32.xlu0 %v8167_v29, %s7898_s6 }
 0x262   : > { %v941_v13 = vpop.permute.xlu1 %940  ;;  %v8748_v48 = vpop.permute.xlu0 %777 }
 0x263   : > { %1025 = vst.msk [vmem:[#allocation3 + $0x160] sm:$0xff] %vm650_vm0, %v941_v13 }
 0x264   : > { %1385 = vrot.lane.b32.xlu0 %v8201_v38, %s7898_s6 }
 0x266   : > { %v973_v59 = vpop.permute.xlu1 %972  ;;  %v8753_v4 = vpop.permute.xlu0 %1075 }
 0x267   : > { %10495 = vst [vmem:[#allocation78_spill] sm:$0xff] %v8753_v4  ;;  %1041 = vst.msk [vmem:[#allocation3 + $0x1e0] sm:$0xff] %vm650_vm0, %v973_v59 }
 0x268   : > { %1389 = vrot.lane.b32.xlu0 %v8233_v46, %s7898_s6 }
 0x26a   : > { %v8758_v51 = vpop.permute.xlu1 %743  ;;  %v8760_v44 = vpop.permute.xlu0 %1107 }
 0x26b   : > { %10496 = vst [vmem:[#allocation79_spill] sm:$0xff] %v8760_v44 }
 0x26c   : > { %1393 = vrot.lane.b32.xlu0 %v8265_v54, %s7898_s6 }
 0x26e   : > { %v8764_v63 = vpop.permute.xlu1 %775  ;;  %v947_v13 = vpop.permute.xlu0 %946 }
 0x26f   : > { %1028 = vst.msk [vmem:[#allocation3 + $0x178] sm:$0xff] %vm650_vm0, %v947_v13 }
 0x270   : > { %1397 = vrot.lane.b32.xlu0 %v8297_v62, %s7898_s6 }
 0x272   : > { %v8769_v4 = vpop.permute.xlu1 %1073  ;;  %v979_v59 = vpop.permute.xlu0 %978 }
 0x273   : > { %10497 = vst [vmem:[#allocation80_spill] sm:$0xff] %v8769_v4  ;;  %1044 = vst.msk [vmem:[#allocation3 + $0x1f8] sm:$0xff] %vm650_vm0, %v979_v59 }
 0x274   : > { %1401 = vrot.lane.b32.xlu0 %v8329_v6, %s7898_s6 }
 0x276   : > { %v8774_v44 = vpop.permute.xlu1 %1105  ;;  %v1225_v60 = vpop.permute.xlu0 %1224 }
 0x277   : > { %10498 = vst [vmem:[#allocation81_spill] sm:$0xff] %v8774_v44  ;;  %1316 = vst.msk [vmem:[#allocation3 + $0x228] sm:$0xff] %vm650_vm0, %v1225_v60 }
 0x278   : > { %1405 = vrot.lane.b32.xlu0 %v8361_v15, %s7898_s6 }
 0x27a   : > { %v945_v13 = vpop.permute.xlu1 %944  ;;  %v1229_v40 = vpop.permute.xlu0 %1228 }
 0x27b   : > { %1027 = vst.msk [vmem:[#allocation3 + $0x170] sm:$0xff] %vm650_vm0, %v945_v13  ;;  %1318 = vst.msk [vmem:[#allocation3 + $0x238] sm:$0xff] %vm650_vm0, %v1229_v40 }
 0x27e   : > { %v977_v4 = vpop.permute.xlu1 %976  ;;  %v1233_v56 = vpop.permute.xlu0 %1232 }
 0x27f   : > { %1043 = vst.msk [vmem:[#allocation3 + $0x1f0] sm:$0xff] %vm650_vm0, %v977_v4  ;;  %1320 = vst.msk [vmem:[#allocation3 + $0x248] sm:$0xff] %vm650_vm0, %v1233_v56 }
 0x282   : > { %v1227_v59 = vpop.permute.xlu1 %1226  ;;  %v1237_v44 = vpop.permute.xlu0 %1236 }
 0x283   : > { %1317 = vst.msk [vmem:[#allocation3 + $0x230] sm:$0xff] %vm650_vm0, %v1227_v59  ;;  %1322 = vst.msk [vmem:[#allocation3 + $0x258] sm:$0xff] %vm650_vm0, %v1237_v44 }
 0x286   : > { %v1231_v60 = vpop.permute.xlu1 %1230  ;;  %v1241_v21 = vpop.permute.xlu0 %1240 }
 0x287   : > { %1319 = vst.msk [vmem:[#allocation3 + $0x240] sm:$0xff] %vm650_vm0, %v1231_v60  ;;  %1324 = vst.msk [vmem:[#allocation3 + $0x268] sm:$0xff] %vm650_vm0, %v1241_v21 }
 0x289   : > { %610 = vxpose.xlu1.b32.start [1/16] (narrow) %v8121_v19, 32 }
 0x28a   : > { %v1235_v40 = vpop.permute.xlu1 %1234  ;;  %v1245_v13 = vpop.permute.xlu0 %1244 }
 0x28b   : > { %1321 = vst.msk [vmem:[#allocation3 + $0x250] sm:$0xff] %vm650_vm0, %v1235_v40  ;;  %1326 = vst.msk [vmem:[#allocation3 + $0x278] sm:$0xff] %vm650_vm0, %v1245_v13 }
 0x28d   : > { %611 = vxpose.xlu1.b32.cont [2/16] (narrow) %v8135_v7, 32 }
 0x28e   : > { %v1239_v56 = vpop.permute.xlu1 %1238  ;;  %v1249_v4 = vpop.permute.xlu0 %1248 }
 0x28f   : > { %1323 = vst.msk [vmem:[#allocation3 + $0x260] sm:$0xff] %vm650_vm0, %v1239_v56  ;;  %1328 = vst.msk [vmem:[#allocation3 + $0x288] sm:$0xff] %vm650_vm0, %v1249_v4  ;;  %v10530_v4 = vld [vmem:[#allocation74_spill] sm:$0xff] }
 0x291   : > { %612 = vxpose.xlu1.b32.cont [3/16] (narrow) %v8151_v25, 32 }
 0x292   : > { %v1243_v44 = vpop.permute.xlu1 %1242  ;;  %v1253_v21 = vpop.permute.xlu0 %1252 }
 0x293   : > { %1325 = vst.msk [vmem:[#allocation3 + $0x270] sm:$0xff] %vm650_vm0, %v1243_v44  ;;  %1330 = vst.msk [vmem:[#allocation3 + $0x298] sm:$0xff] %vm650_vm0, %v1253_v21  ;;  %v10533_v44 = vld [vmem:[#allocation72_spill] sm:$0xff]  ;;  %v10534_v21 = vld [vmem:[#allocation78_spill] sm:$0xff] }
 0x295   : > { %613 = vxpose.xlu1.b32.cont [4/16] (narrow) %v8167_v29, 32 }
 0x296   : > { %v1247_v59 = vpop.permute.xlu1 %1246  ;;  %578 = vxpose.xlu0.b32.start [1/16] (narrow) %v8119_v18, 32  ;;  %v1257_v7 = vpop.permute.xlu0 %1256 }
 0x297   : > { %1327 = vst.msk [vmem:[#allocation3 + $0x280] sm:$0xff] %vm650_vm0, %v1247_v59  ;;  %1332 = vst.msk [vmem:[#allocation3 + $0x2a8] sm:$0xff] %vm650_vm0, %v1257_v7  ;;  %v10535_v59 = vld [vmem:[#allocation77_spill] sm:$0xff] }
 0x299   : > { %614 = vxpose.xlu1.b32.cont [5/16] (narrow) %v8185_v34, 32 }
 0x29a   : > { %v1251_v60 = vpop.permute.xlu1 %1250  ;;  %579 = vxpose.xlu0.b32.cont [2/16] (narrow) %v8137_v22, 32  ;;  %v1261_v40 = vpop.permute.xlu0 %1260 }
 0x29b   : > { %1329 = vst.msk [vmem:[#allocation3 + $0x290] sm:$0xff] %vm650_vm0, %v1251_v60  ;;  %1334 = vst.msk [vmem:[#allocation3 + $0x2b8] sm:$0xff] %vm650_vm0, %v1261_v40  ;;  %v10536_v60 = vld [vmem:[#allocation75_spill] sm:$0xff] }
 0x29d   : > { %615 = vxpose.xlu1.b32.cont [6/16] (narrow) %v8201_v38, 32 }
 0x29e   : > { %v1255_v29 = vpop.permute.xlu1 %1254  ;;  %580 = vxpose.xlu0.b32.cont [3/16] (narrow) %v8153_v26, 32  ;;  %v1265_v18 = vpop.permute.xlu0 %1264 }
 0x29f   : > { %1331 = vst.msk [vmem:[#allocation3 + $0x2a0] sm:$0xff] %vm650_vm0, %v1255_v29  ;;  %1336 = vst.msk [vmem:[#allocation3 + $0x2c8] sm:$0xff] %vm650_vm0, %v1265_v18  ;;  %v10537_v29 = vld [vmem:[#allocation81_spill] sm:$0xff] }
 0x2a1   : > { %616 = vxpose.xlu1.b32.cont [7/16] (narrow) %v8217_v42, 32 }
 0x2a2   : > { %v1259_v13 = vpop.permute.xlu1 %1258  ;;  %581 = vxpose.xlu0.b32.cont [4/16] (narrow) %v8169_v30, 32  ;;  %v1269_v22 = vpop.permute.xlu0 %1268 }
 0x2a3   : > { %1333 = vst.msk [vmem:[#allocation3 + $0x2b0] sm:$0xff] %vm650_vm0, %v1259_v13  ;;  %1338 = vst.msk [vmem:[#allocation3 + $0x2d8] sm:$0xff] %vm650_vm0, %v1269_v22  ;;  %v10538_v13 = vld [vmem:[#allocation79_spill] sm:$0xff] }
 0x2a5   : > { %617 = vxpose.xlu1.b32.cont [8/16] (narrow) %v8233_v46, 32 }
 0x2a6   : > { %v1263_v38 = vpop.permute.xlu1 %1262  ;;  %582 = vxpose.xlu0.b32.cont [5/16] (narrow) %v8183_v33, 32  ;;  %v1273_v26 = vpop.permute.xlu0 %1272 }
 0x2a7   : > { %1335 = vst.msk [vmem:[#allocation3 + $0x2c0] sm:$0xff] %vm650_vm0, %v1263_v38  ;;  %1340 = vst.msk [vmem:[#allocation3 + $0x2e8] sm:$0xff] %vm650_vm0, %v1273_v26 }
 0x2a9   : > { %618 = vxpose.xlu1.b32.cont [9/16] (narrow) %v8249_v50, 32 }
 0x2aa   : > { %v1267_v56 = vpop.permute.xlu1 %1266  ;;  %583 = vxpose.xlu0.b32.cont [6/16] (narrow) %v8199_v37, 32  ;;  %v1277_v30 = vpop.permute.xlu0 %1276  ;;  %v10499_v37 = vld [vmem:[#allocation43_spill] sm:$0xff] }
 0x2ab   : > { %1337 = vst.msk [vmem:[#allocation3 + $0x2d0] sm:$0xff] %vm650_vm0, %v1267_v56  ;;  %1342 = vst.msk [vmem:[#allocation3 + $0x2f8] sm:$0xff] %vm650_vm0, %v1277_v30 }
 0x2ad   : > { %619 = vxpose.xlu1.b32.cont [10/16] (narrow) %v8265_v54, 32  ;;  %v10504_v54 = vld [vmem:[#allocation60_spill] sm:$0xff] }
 0x2ae   : > { %v1271_v46 = vpop.permute.xlu1 %1270  ;;  %584 = vxpose.xlu0.b32.cont [7/16] (narrow) %v8215_v41, 32  ;;  %v10500_v41 = vld [vmem:[#allocation48_spill] sm:$0xff]  ;;  %v1346_v40 = vpop.permute.xlu0 %1345 }
 0x2af   : > { %1339 = vst.msk [vmem:[#allocation3 + $0x2e0] sm:$0xff] %vm650_vm0, %v1271_v46 }
 0x2b1   : > { %620 = vxpose.xlu1.b32.cont [11/16] (narrow) %v8281_v58, 32 }
 0x2b2   : > { %v1275_v33 = vpop.permute.xlu1 %1274  ;;  %585 = vxpose.xlu0.b32.cont [8/16] (narrow) %v8231_v45, 32  ;;  %v10501_v45 = vld [vmem:[#allocation51_spill] sm:$0xff]  ;;  %v1350_v38 = vpop.permute.xlu0 %1349 }
 0x2b3   : > { %1341 = vst.msk [vmem:[#allocation3 + $0x2f0] sm:$0xff] %vm650_vm0, %v1275_v33 }
 0x2b5   : > { %621 = vxpose.xlu1.b32.cont [12/16] (narrow) %v8297_v62, 32  ;;  %v10507_v62 = vld [vmem:[#allocation52_spill] sm:$0xff] }
 0x2b6   : > { %586 = vxpose.xlu0.b32.cont [9/16] (narrow) %v8247_v49, 32  ;;  %v10502_v49 = vld [vmem:[#allocation58_spill] sm:$0xff]  ;;  %v1354_v30 = vpop.permute.xlu0 %1353 }
 0x2b9   : > { %622 = vxpose.xlu1.b32.cont [13/16] (narrow) %v8313_v2, 32 }
 0x2ba   : > { %587 = vxpose.xlu0.b32.cont [10/16] (narrow) %v8263_v53, 32  ;;  %v10503_v53 = vld [vmem:[#allocation42_spill] sm:$0xff] }
 0x2bd   : > { %623 = vxpose.xlu1.b32.cont [14/16] (narrow) %v8329_v6, 32  ;;  %v10510_v6 = vld [vmem:[#allocation62_spill] sm:$0xff] }
 0x2be   : > { %588 = vxpose.xlu0.b32.cont [11/16] (narrow) %v8279_v57, 32  ;;  %v10505_v57 = vld [vmem:[#allocation46_spill] sm:$0xff] }
 0x2c1   : > { %624 = vxpose.xlu1.b32.cont [15/16] (narrow) %v8345_v11, 32 }
 0x2c2   : > { %589 = vxpose.xlu0.b32.cont [12/16] (narrow) %v8295_v61, 32  ;;  %v10506_v61 = vld [vmem:[#allocation57_spill] sm:$0xff] }
 0x2c5   : > { %625 = vxpose.xlu1.b32.end [16/16] (narrow) %v8361_v15, 32  ;;  %v10522_v15 = vld [vmem:[#allocation67_spill] sm:$0xff] }
 0x2c6   : > { %590 = vxpose.xlu0.b32.cont [13/16] (narrow) %v8311_v1, 32  ;;  %v10508_v1 = vld [vmem:[#allocation50_spill] sm:$0xff] }
 0x2c9   : > { %811 = vxpose.xlu1.b32.start [1/16] (narrow) %v10499_v37, 32  ;;  %v1358_v37 = vpop.permute.xlu0 %1357 }
 0x2ca   : > { %591 = vxpose.xlu0.b32.cont [14/16] (narrow) %v8327_v5, 32  ;;  %v10509_v5 = vld [vmem:[#allocation66_spill] sm:$0xff] }
 0x2cd   : > { %812 = vxpose.xlu1.b32.cont [2/16] (narrow) %v10500_v41, 32 }
 0x2ce   : > { %592 = vxpose.xlu0.b32.cont [15/16] (narrow) %v8343_v10, 32  ;;  %v10511_v10 = vld [vmem:[#allocation59_spill] sm:$0xff] }
 0x2d1   : > { %813 = vxpose.xlu1.b32.cont [3/16] (narrow) %v10501_v45, 32 }
 0x2d2   : > { %593 = vxpose.xlu0.b32.end [16/16] (narrow) %v8359_v14, 32  ;;  %v1344_v14 = vpop.permute.xlu1 %1343 }
 0x2d5   : > { %814 = vxpose.xlu1.b32.cont [4/16] (narrow) %v10502_v49, 32  ;;  %v1362_v49 = vpop.permute.xlu0 %1361 }
 0x2d6   : > { %843 = vxpose.xlu0.b32.start [1/16] (narrow) %v10503_v53, 32 }
 0x2d9   : > { %815 = vxpose.xlu1.b32.cont [5/16] (narrow) %v10504_v54, 32  ;;  %v1366_v54 = vpop.permute.xlu0 %1365 }
 0x2da   : > { %844 = vxpose.xlu0.b32.cont [2/16] (narrow) %v10505_v57, 32 }
 0x2dd   : > { %816 = vxpose.xlu1.b32.cont [6/16] (narrow) %v10506_v61, 32  ;;  %v1370_v57 = vpop.permute.xlu0 %1369 }
 0x2de   : > { %845 = vxpose.xlu0.b32.cont [3/16] (narrow) %v10507_v62, 32 }
 0x2e1   : > { %817 = vxpose.xlu1.b32.cont [7/16] (narrow) %v8586_v31, 32  ;;  %v1348_v31 = vpop.permute.xlu1 %1347  ;;  %v1374_v61 = vpop.permute.xlu0 %1373 }
 0x2e2   : > { %846 = vxpose.xlu0.b32.cont [4/16] (narrow) %v10508_v1, 32 }
 0x2e5   : > { %818 = vxpose.xlu1.b32.cont [8/16] (narrow) %v10509_v5, 32 }
 0x2e6   : > { %847 = vxpose.xlu0.b32.cont [5/16] (narrow) %v10510_v6, 32 }
 0x2e9   : > { %819 = vxpose.xlu1.b32.cont [9/16] (narrow) %v8630_v16, 32  ;;  %v10523_v16 = vld [vmem:[#allocation65_spill] sm:$0xff] }
 0x2ea   : > { %848 = vxpose.xlu0.b32.cont [6/16] (narrow) %v10511_v10, 32 }
 0x2ed   : > { %820 = vxpose.xlu1.b32.cont [10/16] (narrow) %v8610_v35, 32  ;;  %v1352_v35 = vpop.permute.xlu1 %1351 }
 0x2ee   : > { %849 = vxpose.xlu0.b32.cont [7/16] (narrow) %v8594_v39, 32  ;;  %v10512_v39 = vld [vmem:[#allocation44_spill] sm:$0xff] }
 0x2f1   : > { %821 = vxpose.xlu1.b32.cont [11/16] (narrow) %v8674_v0, 32  ;;  %v10518_v0 = vld [vmem:[#allocation49_spill] sm:$0xff] }
 0x2f2   : > { %850 = vxpose.xlu0.b32.cont [8/16] (narrow) %v8572_v28, 32  ;;  %v10524_v28 = vld [vmem:[#allocation63_spill] sm:$0xff] }
 0x2f5   : > { %822 = vxpose.xlu1.b32.cont [12/16] (narrow) %v8654_v3, 32  ;;  %v10527_v3 = vld [vmem:[#allocation70_spill] sm:$0xff] }
 0x2f6   : > { %851 = vxpose.xlu0.b32.cont [9/16] (narrow) %v8638_v24, 32  ;;  %v10513_v24 = vld [vmem:[#allocation47_spill] sm:$0xff] }
 0x2f9   : > { %823 = vxpose.xlu1.b32.cont [13/16] (narrow) %v8718_v36, 32  ;;  %v10514_v36 = vld [vmem:[#allocation54_spill] sm:$0xff] }
 0x2fa   : > { %852 = vxpose.xlu0.b32.cont [10/16] (narrow) %v8616_v43, 32  ;;  %v10515_v43 = vld [vmem:[#allocation53_spill] sm:$0xff] }
 0x2fd   : > { %824 = vxpose.xlu1.b32.cont [14/16] (narrow) %v8698_v32, 32  ;;  %v10528_v32 = vld [vmem:[#allocation76_spill] sm:$0xff] }
 0x2fe   : > { %853 = vxpose.xlu0.b32.cont [11/16] (narrow) %v8682_v9, 32  ;;  %v10520_v9 = vld [vmem:[#allocation56_spill] sm:$0xff] }
 0x301   : > { %825 = vxpose.xlu1.b32.cont [15/16] (narrow) %v8758_v51, 32  ;;  %v10516_v51 = vld [vmem:[#allocation45_spill] sm:$0xff] }
 0x302   : > { %854 = vxpose.xlu0.b32.cont [12/16] (narrow) %v8660_v27, 32  ;;  %v10517_v27 = vld [vmem:[#allocation64_spill] sm:$0xff] }
 0x305   : > { %826 = vxpose.xlu1.b32.end [16/16] (narrow) %v8742_v12, 32 }
 0x306   : > { %855 = vxpose.xlu0.b32.cont [13/16] (narrow) %v8726_v20, 32  ;;  %v10519_v20 = vld [vmem:[#allocation61_spill] sm:$0xff] }
 0x309   : > { %1141 = vxpose.xlu1.b32.start [1/16] (narrow) %v10512_v39, 32  ;;  %v10544_v39 = vld [vmem:[#allocation30_spill] sm:$0xff] }
 0x30a   : > { %856 = vxpose.xlu0.b32.cont [14/16] (narrow) %v8704_v52, 32  ;;  %v10521_v52 = vld [vmem:[#allocation55_spill] sm:$0xff] }
 0x30d   : > { %1142 = vxpose.xlu1.b32.cont [2/16] (narrow) %v10513_v24, 32  ;;  %v10545_v24 = vld [vmem:[#allocation34_spill] sm:$0xff] }
 0x30e   : > { %857 = vxpose.xlu0.b32.cont [15/16] (narrow) %v8764_v63, 32  ;;  %v10526_v63 = vld [vmem:[#allocation71_spill] sm:$0xff] }
 0x311   : > { %1143 = vxpose.xlu1.b32.cont [3/16] (narrow) %v10514_v36, 32  ;;  %v10546_v36 = vld [vmem:[#allocation38_spill] sm:$0xff] }
 0x312   : > { %858 = vxpose.xlu0.b32.end [16/16] (narrow) %v8748_v48, 32  ;;  %v1356_v48 = vpop.permute.xlu1 %1355 }
 0x315   : > { %1144 = vxpose.xlu1.b32.cont [4/16] (narrow) %v10515_v43, 32  ;;  %v10547_v43 = vld [vmem:[#allocation10_spill] sm:$0xff] }
 0x316   : > { %1173 = vxpose.xlu0.b32.start [1/16] (narrow) %v10516_v51, 32  ;;  %v1360_v12 = vpop.permute.xlu1 %1359  ;;  %v10548_v51 = vld [vmem:[#allocation14_spill] sm:$0xff] }
 0x319   : > { %1145 = vxpose.xlu1.b32.cont [5/16] (narrow) %v10517_v27, 32  ;;  %v10549_v27 = vld [vmem:[#allocation19_spill] sm:$0xff] }
 0x31a   : > { %1174 = vxpose.xlu0.b32.cont [2/16] (narrow) %v10518_v0, 32  ;;  %v10550_v0 = vld [vmem:[#allocation23_spill] sm:$0xff] }
 0x31d   : > { %1146 = vxpose.xlu1.b32.cont [6/16] (narrow) %v10519_v20, 32  ;;  %v10551_v20 = vld [vmem:[#allocation27_spill] sm:$0xff] }
 0x31e   : > { %1175 = vxpose.xlu0.b32.cont [3/16] (narrow) %v10520_v9, 32  ;;  %v10552_v9 = vld [vmem:[#allocation31_spill] sm:$0xff] }
 0x321   : > { %1147 = vxpose.xlu1.b32.cont [7/16] (narrow) %v8601_v23, 32  ;;  %v10525_v23 = vld [vmem:[#allocation68_spill] sm:$0xff] }
 0x322   : > { %1176 = vxpose.xlu0.b32.cont [4/16] (narrow) %v10521_v52, 32  ;;  %v10553_v52 = vld [vmem:[#allocation35_spill] sm:$0xff] }
 0x325   : > { %1148 = vxpose.xlu1.b32.cont [8/16] (narrow) %v10522_v15, 32  ;;  %v10554_v15 = vld [vmem:[#allocation39_spill] sm:$0xff] }
 0x326   : > { %1177 = vxpose.xlu0.b32.cont [5/16] (narrow) %v10523_v16, 32 }
 0x329   : > { %1149 = vxpose.xlu1.b32.cont [9/16] (narrow) %v8645_v47, 32  ;;  %v10529_v47 = vld [vmem:[#allocation69_spill] sm:$0xff] }
 0x32a   : > { %1178 = vxpose.xlu0.b32.cont [6/16] (narrow) %v10524_v28, 32 }
 0x32d   : > { %1150 = vxpose.xlu1.b32.cont [10/16] (narrow) %v8623_v8, 32  ;;  %v10531_v8 = vld [vmem:[#allocation73_spill] sm:$0xff] }
 0x32e   : > { %1179 = vxpose.xlu0.b32.cont [7/16] (narrow) %v8608_v55, 32  ;;  %v10532_v55 = vld [vmem:[#allocation80_spill] sm:$0xff] }
 0x331   : > { %1151 = vxpose.xlu1.b32.cont [11/16] (narrow) %v8689_v17, 32  ;;  %v1364_v17 = vpop.permute.xlu1 %1363 }
 0x332   : > { %1180 = vxpose.xlu0.b32.cont [8/16] (narrow) %v10525_v23, 32 }
 0x335   : > { %1152 = vxpose.xlu1.b32.cont [12/16] (narrow) %v10526_v63, 32  ;;  %v1368_v7 = vpop.permute.xlu1 %1367 }
 0x336   : > { %1181 = vxpose.xlu0.b32.cont [9/16] (narrow) %v10527_v3, 32 }
 0x339   : > { %1153 = vxpose.xlu1.b32.cont [13/16] (narrow) %v10528_v32, 32  ;;  %v1372_v18 = vpop.permute.xlu1 %1371 }
 0x33a   : > { %1182 = vxpose.xlu0.b32.cont [10/16] (narrow) %v10529_v47, 32 }
 0x33d   : > { %1154 = vxpose.xlu1.b32.cont [14/16] (narrow) %v10530_v4, 32  ;;  %v626_v22 = vpop.trf.xlu1 }
 0x33e   : > { %1183 = vxpose.xlu0.b32.cont [11/16] (narrow) %v10531_v8, 32  ;;  %643 = vst [vmem:[#allocation2 + $0x8] sm:$0xff] %v626_v22 }
 0x341   : > { %1155 = vxpose.xlu1.b32.cont [15/16] (narrow) %v10532_v55, 32  ;;  %v627_v26 = vpop.trf.xlu1 }
 0x342   : > { %1184 = vxpose.xlu0.b32.cont [12/16] (narrow) %v10533_v44, 32  ;;  %645 = vst [vmem:[#allocation2 + $0x18] sm:$0xff] %v627_v26 }
 0x345   : > { %1156 = vxpose.xlu1.b32.end [16/16] (narrow) %v10534_v21, 32  ;;  %v628_v56 = vpop.trf.xlu1 }
 0x346   : > { %1185 = vxpose.xlu0.b32.cont [13/16] (narrow) %v10535_v59, 32  ;;  %647 = vst [vmem:[#allocation2 + $0x28] sm:$0xff] %v628_v56 }
 0x349   : > { %1439 = vxpose.xlu1.b32.start [1/16] (narrow) %v1344_v14, 32  ;;  %v629_v46 = vpop.trf.xlu1  ;;  %v1378_v14 = vpop.permute.xlu0 %1377 }
 0x34a   : > { %1186 = vxpose.xlu0.b32.cont [14/16] (narrow) %v10536_v60, 32  ;;  %649 = vst [vmem:[#allocation2 + $0x38] sm:$0xff] %v629_v46 }
 0x34d   : > { %1440 = vxpose.xlu1.b32.cont [2/16] (narrow) %v1346_v40, 32  ;;  %v827_v33 = vpop.trf.xlu1  ;;  %v1382_v16 = vpop.permute.xlu0 %1381 }
 0x34e   : > { %1187 = vxpose.xlu0.b32.cont [15/16] (narrow) %v10537_v29, 32  ;;  %876 = vst [vmem:[#allocation2 + $0x40] sm:$0xff] %v827_v33 }
 0x351   : > { %1441 = vxpose.xlu1.b32.cont [3/16] (narrow) %v1348_v31, 32  ;;  %v828_v41 = vpop.trf.xlu1  ;;  %v1386_v28 = vpop.permute.xlu0 %1385 }
 0x352   : > { %1188 = vxpose.xlu0.b32.end [16/16] (narrow) %v10538_v13, 32  ;;  %878 = vst [vmem:[#allocation2 + $0x50] sm:$0xff] %v828_v41 }
 0x355   : > { %1442 = vxpose.xlu1.b32.cont [4/16] (narrow) %v1350_v38, 32  ;;  %v829_v45 = vpop.trf.xlu1  ;;  %v1390_v31 = vpop.permute.xlu0 %1389 }
 0x356   : > { %880 = vst [vmem:[#allocation2 + $0x60] sm:$0xff] %v829_v45 }
 0x359   : > { %1443 = vxpose.xlu1.b32.cont [5/16] (narrow) %v1352_v35, 32  ;;  %v830_v53 = vpop.trf.xlu1  ;;  %v1394_v23 = vpop.permute.xlu0 %1393 }
 0x35a   : > { %882 = vst [vmem:[#allocation2 + $0x70] sm:$0xff] %v830_v53 }
 0x35d   : > { %1444 = vxpose.xlu1.b32.cont [6/16] (narrow) %v1354_v30, 32  ;;  %v1398_v3 = vpop.permute.xlu0 %1397 }
 0x361   : > { %1445 = vxpose.xlu1.b32.cont [7/16] (narrow) %v1356_v48, 32  ;;  %v1402_v47 = vpop.permute.xlu0 %1401 }
 0x365   : > { %1446 = vxpose.xlu1.b32.cont [8/16] (narrow) %v1358_v37, 32  ;;  %v1406_v4 = vpop.permute.xlu0 %1405 }
 0x369   : > { %1447 = vxpose.xlu1.b32.cont [9/16] (narrow) %v1360_v12, 32  ;;  %v594_v55 = vpop.trf.xlu0 }
 0x36a   : > { %642 = vst [vmem:[#allocation2] sm:$0xff] %v594_v55 }
 0x36d   : > { %1448 = vxpose.xlu1.b32.cont [10/16] (narrow) %v1362_v49, 32 }
 0x371   : > { %1449 = vxpose.xlu1.b32.cont [11/16] (narrow) %v1364_v17, 32  ;;  %v595_v17 = vpop.trf.xlu0 }
 0x372   : > { %644 = vst [vmem:[#allocation2 + $0x10] sm:$0xff] %v595_v17 }
 0x375   : > { %1450 = vxpose.xlu1.b32.cont [12/16] (narrow) %v1366_v54, 32  ;;  %v596_v59 = vpop.trf.xlu0 }
 0x376   : > { %646 = vst [vmem:[#allocation2 + $0x20] sm:$0xff] %v596_v59 }
 0x379   : > { %1451 = vxpose.xlu1.b32.cont [13/16] (narrow) %v1368_v7, 32  ;;  %v597_v60 = vpop.trf.xlu0 }
 0x37a   : > { %648 = vst [vmem:[#allocation2 + $0x30] sm:$0xff] %v597_v60 }
 0x37d   : > { %1452 = vxpose.xlu1.b32.cont [14/16] (narrow) %v1370_v57, 32  ;;  %v859_v29 = vpop.trf.xlu0 }
 0x37e   : > { %877 = vst [vmem:[#allocation2 + $0x48] sm:$0xff] %v859_v29 }
 0x381   : > { %1453 = vxpose.xlu1.b32.cont [15/16] (narrow) %v1372_v18, 32  ;;  %v860_v13 = vpop.trf.xlu0 }
 0x382   : > { %879 = vst [vmem:[#allocation2 + $0x58] sm:$0xff] %v860_v13 }
 0x385   : > { %1454 = vxpose.xlu1.b32.end [16/16] (narrow) %v1374_v61, 32  ;;  %v861_v38 = vpop.trf.xlu0 }
 0x386   : > { %881 = vst [vmem:[#allocation2 + $0x68] sm:$0xff] %v861_v38 }
 0x389   : > { %v1157_v62 = vpop.trf.xlu1  ;;  %v862_v56 = vpop.trf.xlu0 }
 0x38a   : > { %1206 = vst [vmem:[#allocation2 + $0x80] sm:$0xff] %v1157_v62  ;;  %883 = vst [vmem:[#allocation2 + $0x78] sm:$0xff] %v862_v56 }
 0x38d   : > { %v1158_v1 = vpop.trf.xlu1 }
 0x38e   : > { %1208 = vst [vmem:[#allocation2 + $0x90] sm:$0xff] %v1158_v1 }
 0x391   : > { %v1159_v5 = vpop.trf.xlu1 }
 0x392   : > { %1210 = vst [vmem:[#allocation2 + $0xa0] sm:$0xff] %v1159_v5 }
 0x395   : > { %v1160_v6 = vpop.trf.xlu1 }
 0x396   : > { %1212 = vst [vmem:[#allocation2 + $0xb0] sm:$0xff] %v1160_v6  ;;  %v1189_v46 = vpop.trf.xlu0 }
 0x397   : > { %1207 = vst [vmem:[#allocation2 + $0x88] sm:$0xff] %v1189_v46 }
 0x39a   : > { %v1190_v37 = vpop.trf.xlu0 }
 0x39b   : > { %1209 = vst [vmem:[#allocation2 + $0x98] sm:$0xff] %v1190_v37 }
 0x39e   : > { %v1191_v45 = vpop.trf.xlu0 }
 0x39f   : > { %1211 = vst [vmem:[#allocation2 + $0xa8] sm:$0xff] %v1191_v45 }
 0x3a2   : > { %v1192_v53 = vpop.trf.xlu0 }
 0x3a3   : > { %1375 = vrot.lane.b32.xlu1 %v8121_v19, %s7898_s6  ;;  %v10539_v19 = vld [vmem:[#allocation12_spill] sm:$0xff]  ;;  %1213 = vst [vmem:[#allocation2 + $0xb8] sm:$0xff] %v1192_v53 }
 0x3a7   : > { %1379 = vrot.lane.b32.xlu1 %v8151_v25, %s7898_s6  ;;  %v10540_v25 = vld [vmem:[#allocation15_spill] sm:$0xff] }
 0x3ab   : > { %1383 = vrot.lane.b32.xlu1 %v8185_v34, %s7898_s6 }
 0x3af   : > { %1387 = vrot.lane.b32.xlu1 %v8217_v42, %s7898_s6  ;;  %v10541_v42 = vld [vmem:[#allocation18_spill] sm:$0xff] }
 0x3b3   : > { %1391 = vrot.lane.b32.xlu1 %v8249_v50, %s7898_s6 }
 0x3b7   : > { %1395 = vrot.lane.b32.xlu1 %v8281_v58, %s7898_s6  ;;  %v10542_v58 = vld [vmem:[#allocation22_spill] sm:$0xff] }
 0x3bb   : > { %1399 = vrot.lane.b32.xlu1 %v8313_v2, %s7898_s6 }
 0x3bf   : > { %1403 = vrot.lane.b32.xlu1 %v8345_v11, %s7898_s6  ;;  %v10543_v11 = vld [vmem:[#allocation26_spill] sm:$0xff] }
 0x3c3   : > { %1514 = vrot.lane.b32.xlu1 %v10539_v19, %s7898_s6  ;;  %v10555_v19 = vld [vmem:[#allocation11_spill] sm:$0xff] }
 0x3c7   : > { %1516 = vrot.lane.b32.xlu1 %v10540_v25, %s7898_s6  ;;  %v10556_v25 = vld [vmem:[#allocation16_spill] sm:$0xff] }
 0x3c9   : > { %v1455_v34 = vpop.trf.xlu1 }
 0x3ca   : > { %1504 = vst [vmem:[#allocation2 + $0xc0] sm:$0xff] %v1455_v34  ;;  %v10557_v34 = vld [vmem:[#allocation20_spill] sm:$0xff] }
 0x3cb   : > { %1520 = vrot.lane.b32.xlu1 %v10541_v42, %s7898_s6  ;;  %v10558_v42 = vld [vmem:[#allocation24_spill] sm:$0xff] }
 0x3cd   : > { %v1456_v50 = vpop.trf.xlu1 }
 0x3ce   : > { %1506 = vst [vmem:[#allocation2 + $0xd0] sm:$0xff] %v1456_v50  ;;  %v10559_v50 = vld [vmem:[#allocation28_spill] sm:$0xff] }
 0x3cf   : > { %1524 = vrot.lane.b32.xlu1 %v10542_v58, %s7898_s6  ;;  %v10560_v58 = vld [vmem:[#allocation32_spill] sm:$0xff] }
 0x3d1   : > { %v1457_v2 = vpop.trf.xlu1 }
 0x3d2   : > { %1508 = vst [vmem:[#allocation2 + $0xe0] sm:$0xff] %v1457_v2  ;;  %v10561_v2 = vld [vmem:[#allocation36_spill] sm:$0xff] }
 0x3d3   : > { %1528 = vrot.lane.b32.xlu1 %v10543_v11, %s7898_s6 }
 0x3d5   : > { %v1458_v10 = vpop.trf.xlu1 }
 0x3d6   : > { %1510 = vst [vmem:[#allocation2 + $0xf0] sm:$0xff] %v1458_v10  ;;  %v10562_v10 = vld [vmem:[#allocation40_spill] sm:$0xff] }
 0x3d7   : > { %1532 = vrot.lane.b32.xlu1 %v10544_v39, %s7898_s6 }
 0x3db   : > { %1536 = vrot.lane.b32.xlu1 %v10545_v24, %s7898_s6  ;;  %v10563_v24 = vld [vmem:[#allocation13_spill] sm:$0xff] }
 0x3df   : > { %1540 = vrot.lane.b32.xlu1 %v10546_v36, %s7898_s6 }
 0x3e3   : > { %1544 = vrot.lane.b32.xlu1 %v10547_v43, %s7898_s6  ;;  %v10564_v43 = vld [vmem:[#allocation17_spill] sm:$0xff] }
 0x3e7   : > { %1548 = vrot.lane.b32.xlu1 %v10548_v51, %s7898_s6 }
 0x3eb   : > { %1552 = vrot.lane.b32.xlu1 %v10549_v27, %s7898_s6  ;;  %v10565_v27 = vld [vmem:[#allocation21_spill] sm:$0xff] }
 0x3ef   : > { %1556 = vrot.lane.b32.xlu1 %v10550_v0, %s7898_s6  ;;  %v10566_v0 = vld [vmem:[#allocation25_spill] sm:$0xff] }
 0x3f3   : > { %1560 = vrot.lane.b32.xlu1 %v10551_v20, %s7898_s6  ;;  %v10567_v20 = vld [vmem:[#allocation29_spill] sm:$0xff] }
 0x3f7   : > { %1564 = vrot.lane.b32.xlu1 %v10552_v9, %s7898_s6  ;;  %v10568_v9 = vld [vmem:[#allocation33_spill] sm:$0xff] }
 0x3fb   : > { %1568 = vrot.lane.b32.xlu1 %v10553_v52, %s7898_s6  ;;  %v10569_v52 = vld [vmem:[#allocation37_spill] sm:$0xff] }
 0x3ff   : > { %1572 = vrot.lane.b32.xlu1 %v10554_v15, %s7898_s6 }
 0x415   : > { %v1376_v35 = vpop.permute.xlu1 %1375 }
 0x416   : > { %1471 = vxpose.xlu0.b32.start [1/16] (narrow) %v1376_v35, 32 }
 0x419   : > { %v1380_v63 = vpop.permute.xlu1 %1379 }
 0x41a   : > { %1472 = vxpose.xlu0.b32.cont [2/16] (narrow) %v1378_v14, 32  ;;  %v10570_v14 = vld [vmem:[#allocation41_spill] sm:$0xff] }
 0x41d   : > { %v1384_v48 = vpop.permute.xlu1 %1383 }
 0x41e   : > { %1473 = vxpose.xlu0.b32.cont [3/16] (narrow) %v1380_v63, 32 }
 0x421   : > { %v1388_v32 = vpop.permute.xlu1 %1387 }
 0x422   : > { %1474 = vxpose.xlu0.b32.cont [4/16] (narrow) %v1382_v16, 32 }
 0x425   : > { %v1392_v12 = vpop.permute.xlu1 %1391 }
 0x426   : > { %1475 = vxpose.xlu0.b32.cont [5/16] (narrow) %v1384_v48, 32 }
 0x429   : > { %v1396_v8 = vpop.permute.xlu1 %1395 }
 0x42a   : > { %1476 = vxpose.xlu0.b32.cont [6/16] (narrow) %v1386_v28, 32 }
 0x42d   : > { %v1400_v44 = vpop.permute.xlu1 %1399 }
 0x42e   : > { %1477 = vxpose.xlu0.b32.cont [7/16] (narrow) %v1388_v32, 32 }
 0x431   : > { %v1404_v21 = vpop.permute.xlu1 %1403 }
 0x432   : > { %1478 = vxpose.xlu0.b32.cont [8/16] (narrow) %v1390_v31, 32 }
 0x435   : > { %v1515_v7 = vpop.permute.xlu1 %1514 }
 0x436   : > { %1610 = vst.msk [vmem:[#allocation3 + $0x308] sm:$0xff] %vm650_vm0, %v1515_v7  ;;  %1479 = vxpose.xlu0.b32.cont [9/16] (narrow) %v1392_v12, 32 }
 0x439   : > { %v1517_v40 = vpop.permute.xlu1 %1516 }
 0x43a   : > { %1611 = vst.msk [vmem:[#allocation3 + $0x310] sm:$0xff] %vm650_vm0, %v1517_v40  ;;  %1480 = vxpose.xlu0.b32.cont [10/16] (narrow) %v1394_v23, 32 }
 0x43d   : > { %v1521_v18 = vpop.permute.xlu1 %1520 }
 0x43e   : > { %1613 = vst.msk [vmem:[#allocation3 + $0x320] sm:$0xff] %vm650_vm0, %v1521_v18  ;;  %1481 = vxpose.xlu0.b32.cont [11/16] (narrow) %v1396_v8, 32 }
 0x441   : > { %v1525_v22 = vpop.permute.xlu1 %1524 }
 0x442   : > { %1615 = vst.msk [vmem:[#allocation3 + $0x330] sm:$0xff] %vm650_vm0, %v1525_v22  ;;  %1482 = vxpose.xlu0.b32.cont [12/16] (narrow) %v1398_v3, 32 }
 0x445   : > { %v1529_v26 = vpop.permute.xlu1 %1528 }
 0x446   : > { %1617 = vst.msk [vmem:[#allocation3 + $0x340] sm:$0xff] %vm650_vm0, %v1529_v26  ;;  %1483 = vxpose.xlu0.b32.cont [13/16] (narrow) %v1400_v44, 32 }
 0x449   : > { %v1533_v30 = vpop.permute.xlu1 %1532 }
 0x44a   : > { %1619 = vst.msk [vmem:[#allocation3 + $0x350] sm:$0xff] %vm650_vm0, %v1533_v30  ;;  %1484 = vxpose.xlu0.b32.cont [14/16] (narrow) %v1402_v47, 32 }
 0x44d   : > { %v1537_v33 = vpop.permute.xlu1 %1536 }
 0x44e   : > { %1621 = vst.msk [vmem:[#allocation3 + $0x360] sm:$0xff] %vm650_vm0, %v1537_v33  ;;  %1485 = vxpose.xlu0.b32.cont [15/16] (narrow) %v1404_v21, 32 }
 0x451   : > { %v1541_v41 = vpop.permute.xlu1 %1540 }
 0x452   : > { %1623 = vst.msk [vmem:[#allocation3 + $0x370] sm:$0xff] %vm650_vm0, %v1541_v41  ;;  %1486 = vxpose.xlu0.b32.end [16/16] (narrow) %v1406_v4, 32 }
 0x455   : > { %v1545_v49 = vpop.permute.xlu1 %1544 }
 0x456   : > { %1625 = vst.msk [vmem:[#allocation3 + $0x380] sm:$0xff] %vm650_vm0, %v1545_v49 }
 0x459   : > { %v1549_v54 = vpop.permute.xlu1 %1548 }
 0x45a   : > { %1627 = vst.msk [vmem:[#allocation3 + $0x390] sm:$0xff] %vm650_vm0, %v1549_v54 }
 0x45d   : > { %v1553_v57 = vpop.permute.xlu1 %1552 }
 0x45e   : > { %1629 = vst.msk [vmem:[#allocation3 + $0x3a0] sm:$0xff] %vm650_vm0, %v1553_v57 }
 0x461   : > { %v1557_v61 = vpop.permute.xlu1 %1556 }
 0x462   : > { %1631 = vst.msk [vmem:[#allocation3 + $0x3b0] sm:$0xff] %vm650_vm0, %v1557_v61 }
 0x465   : > { %v1561_v62 = vpop.permute.xlu1 %1560 }
 0x466   : > { %1633 = vst.msk [vmem:[#allocation3 + $0x3c0] sm:$0xff] %vm650_vm0, %v1561_v62 }
 0x469   : > { %v1565_v1 = vpop.permute.xlu1 %1564 }
 0x46a   : > { %1635 = vst.msk [vmem:[#allocation3 + $0x3d0] sm:$0xff] %vm650_vm0, %v1565_v1 }
 0x46d   : > { %v1569_v5 = vpop.permute.xlu1 %1568 }
 0x46e   : > { %1637 = vst.msk [vmem:[#allocation3 + $0x3e0] sm:$0xff] %vm650_vm0, %v1569_v5 }
 0x471   : > { %v1573_v6 = vpop.permute.xlu1 %1572 }
 0x472   : > { %1639 = vst.msk [vmem:[#allocation3 + $0x3f0] sm:$0xff] %vm650_vm0, %v1573_v6 }
 0x47b   : > { %1512 = vrot.lane.b32.xlu0 %v10555_v19, %s7898_s6 }
 0x47f   : > { %1518 = vrot.lane.b32.xlu0 %v10556_v25, %s7898_s6 }
 0x483   : > { %1522 = vrot.lane.b32.xlu0 %v10557_v34, %s7898_s6 }
 0x487   : > { %1526 = vrot.lane.b32.xlu0 %v10558_v42, %s7898_s6 }
 0x48b   : > { %1530 = vrot.lane.b32.xlu0 %v10559_v50, %s7898_s6 }
 0x48f   : > { %1534 = vrot.lane.b32.xlu0 %v10560_v58, %s7898_s6 }
 0x493   : > { %1538 = vrot.lane.b32.xlu0 %v10561_v2, %s7898_s6 }
 0x496   : > { %v1487_v11 = vpop.trf.xlu0 }
 0x497   : > { %1542 = vrot.lane.b32.xlu0 %v10562_v10, %s7898_s6  ;;  %1505 = vst [vmem:[#allocation2 + $0xc8] sm:$0xff] %v1487_v11 }
 0x49a   : > { %v1488_v39 = vpop.trf.xlu0 }
 0x49b   : > { %1546 = vrot.lane.b32.xlu0 %v10563_v24, %s7898_s6  ;;  %1507 = vst [vmem:[#allocation2 + $0xd8] sm:$0xff] %v1488_v39 }
 0x49e   : > { %v1489_v36 = vpop.trf.xlu0 }
 0x49f   : > { %1550 = vrot.lane.b32.xlu0 %v10564_v43, %s7898_s6  ;;  %1509 = vst [vmem:[#allocation2 + $0xe8] sm:$0xff] %v1489_v36 }
 0x4a2   : > { %v1490_v51 = vpop.trf.xlu0 }
 0x4a3   : > { %1554 = vrot.lane.b32.xlu0 %v10565_v27, %s7898_s6  ;;  %1511 = vst [vmem:[#allocation2 + $0xf8] sm:$0xff] %v1490_v51 }
 0x4a7   : > { %1558 = vrot.lane.b32.xlu0 %v10566_v0, %s7898_s6 }
 0x4ab   : > { %1562 = vrot.lane.b32.xlu0 %v10567_v20, %s7898_s6 }
 0x4af   : > { %1566 = vrot.lane.b32.xlu0 %v10568_v9, %s7898_s6 }
 0x4b3   : > { %1570 = vrot.lane.b32.xlu0 %v10569_v52, %s7898_s6 }
 0x4b7   : > { %1574 = vrot.lane.b32.xlu0 %v10570_v14, %s7898_s6 }
 0x4ed   : > { %v1513_v15 = vpop.permute.xlu0 %1512 }
 0x4ee   : > { %1609 = vst.msk [vmem:[#allocation3 + $0x300] sm:$0xff] %vm650_vm0, %v1513_v15 }
 0x4f1   : > { %v1519_v16 = vpop.permute.xlu0 %1518 }
 0x4f2   : > { %1612 = vst.msk [vmem:[#allocation3 + $0x318] sm:$0xff] %vm650_vm0, %v1519_v16 }
 0x4f5   : > { %v1523_v28 = vpop.permute.xlu0 %1522 }
 0x4f6   : > { %1614 = vst.msk [vmem:[#allocation3 + $0x328] sm:$0xff] %vm650_vm0, %v1523_v28 }
 0x4f9   : > { %v1527_v31 = vpop.permute.xlu0 %1526 }
 0x4fa   : > { %1616 = vst.msk [vmem:[#allocation3 + $0x338] sm:$0xff] %vm650_vm0, %v1527_v31 }
 0x4fd   : > { %v1531_v35 = vpop.permute.xlu0 %1530 }
 0x4fe   : > { %1618 = vst.msk [vmem:[#allocation3 + $0x348] sm:$0xff] %vm650_vm0, %v1531_v35 }
 0x501   : > { %v1535_v23 = vpop.permute.xlu0 %1534 }
 0x502   : > { %1620 = vst.msk [vmem:[#allocation3 + $0x358] sm:$0xff] %vm650_vm0, %v1535_v23 }
 0x505   : > { %v1539_v63 = vpop.permute.xlu0 %1538 }
 0x506   : > { %1622 = vst.msk [vmem:[#allocation3 + $0x368] sm:$0xff] %vm650_vm0, %v1539_v63 }
 0x509   : > { %v1543_v3 = vpop.permute.xlu0 %1542 }
 0x50a   : > { %1624 = vst.msk [vmem:[#allocation3 + $0x378] sm:$0xff] %vm650_vm0, %v1543_v3 }
 0x50d   : > { %v1547_v48 = vpop.permute.xlu0 %1546 }
 0x50e   : > { %1626 = vst.msk [vmem:[#allocation3 + $0x388] sm:$0xff] %vm650_vm0, %v1547_v48 }
 0x511   : > { %v1551_v32 = vpop.permute.xlu0 %1550 }
 0x512   : > { %1628 = vst.msk [vmem:[#allocation3 + $0x398] sm:$0xff] %vm650_vm0, %v1551_v32 }
 0x515   : > { %v1555_v47 = vpop.permute.xlu0 %1554 }
 0x516   : > { %1630 = vst.msk [vmem:[#allocation3 + $0x3a8] sm:$0xff] %vm650_vm0, %v1555_v47 }
 0x519   : > { %v1559_v12 = vpop.permute.xlu0 %1558 }
 0x51a   : > { %1632 = vst.msk [vmem:[#allocation3 + $0x3b8] sm:$0xff] %vm650_vm0, %v1559_v12 }
 0x51d   : > { %v1563_v4 = vpop.permute.xlu0 %1562 }
 0x51e   : > { %1634 = vst.msk [vmem:[#allocation3 + $0x3c8] sm:$0xff] %vm650_vm0, %v1563_v4 }
 0x521   : > { %v1567_v8 = vpop.permute.xlu0 %1566 }
 0x522   : > { %1636 = vst.msk [vmem:[#allocation3 + $0x3d8] sm:$0xff] %vm650_vm0, %v1567_v8 }
 0x525   : > { %v1571_v55 = vpop.permute.xlu0 %1570 }
 0x526   : > { %1638 = vst.msk [vmem:[#allocation3 + $0x3e8] sm:$0xff] %vm650_vm0, %v1571_v55 }
 0x529   : > { %v1575_v44 = vpop.permute.xlu0 %1574 }
 0x52a   : > { %1640 = vst.msk [vmem:[#allocation3 + $0x3f8] sm:$0xff] %vm650_vm0, %v1575_v44 }
 0x52b PF: > { %v1659_v17 = vld [vmem:[%s10374_s1] sm:$0xff]  ;;  %v1660_v21 = vld [vmem:[%s10374_s1 + $0x8] sm:$0xff]  ;;  %v1661_v59 = vld [vmem:[%s10374_s1 + $0x10] sm:$0xff]  ;;  %s5764_s12 = sshll.u32 %s7874_s21, 7  ;;  %v10416_v35 = vmov 0.0   ;;  %vm1828_vm1 = vcmask 261120  }
 0x52c   : > { %v6873_v7 = vpack.c.bf16 %v1660_v21, %v1659_v17  ;;  %v1662_v60 = vld [vmem:[%s10374_s1 + $0x18] sm:$0xff]  ;;  %v1663_v29 = vld [vmem:[%s10374_s1 + $0x20] sm:$0xff]  ;;  %v1664_v18 = vld [vmem:[%s10374_s1 + $0x28] sm:$0xff]  ;;  %s9035_s30 = scalar_lea.vmem %s8050_s11, %s5764_s12  ;;  %1941 = vmatprep.mubr.f32.mxu1 %v10416_v35  ;;  %s5955_s14 = sshll.u32 %s7874_s21, 4 }
 0x52d   : > { %v6877_v40 = vpack.c.bf16 %v1662_v60, %v1661_v59  ;;  %v6881_v13 = vpack.c.bf16 %v1664_v18, %v1663_v29  ;;  %v9038_v22 = vld [vmem:[%s9035_s30] sm:$0xff]  ;;  %v1665_v38 = vld [vmem:[%s10374_s1 + $0x30] sm:$0xff]  ;;  %v1666_v26 = vld [vmem:[%s10374_s1 + $0x38] sm:$0xff]  ;;  %s5956_s26 = sshll.u32 %s7878_s22, 5  ;;  %s5663_s11 = sshll.u32 %s8052_s17, 4  ;;  %s10315_s11 = int_to_ptr.vmem [resolvable:$true] %s5663_s11 }
 0x52e   : > { %6874 = vmatprep.subr.bf16.mxu0 %v6873_v7  ;;  %6521 = vmatprep.mubr.f32.mxu0 %v9038_v22  ;;  %v6885_v56 = vpack.c.bf16 %v1666_v26, %v1665_v38  ;;  %v1667_v30 = vld [vmem:[%s10374_s1 + $0x40] sm:$0xff]  ;;  %v1668_v46 = vld [vmem:[%s10374_s1 + $0x48] sm:$0xff]  ;;  %v1823_v37 = vld [vmem:[#allocation2 + $0x18] sm:$0xff]  ;;  %s10600_s22 = sand.u32 1, %s7866_s19   ;;  %s7792_s9 = scalar_lea.vmem %s10315_s11, 2048 }
 0x52f   : > { %6876 = vmatpush3.bf16.msra.mxu0 %v6873_v7  ;;  %v1821_v33 = vld [vmem:[#allocation2 + $0x8] sm:$0xff]  ;;  %v1820_v41 = vld [vmem:[#allocation2] sm:$0xff]  ;;  %v1822_v45 = vld [vmem:[#allocation2 + $0x10] sm:$0xff]  ;;  %v6889_v62 = vpack.c.bf16 %v1668_v46, %v1667_v30  ;;  %s10321_s6 = scalar_lea.sflag [#allocation6], %s10600_s22  ;;  %p7793_p10 = scmp.ne.s32.totalorder %s10315_s11, %s7792_s9 }
 0x530   : > { %6878 = vmatprep.subr.bf16.mxu0 %v6877_v40  ;;  %v6905_v49 = vpack.c.bf16 %v1823_v37, %v1821_v33  ;;  %v6907_v53 = vpack.c.bf16 %v1822_v45, %v1820_v41  ;;  %v1825_v54 = vld [vmem:[#allocation2 + $0x28] sm:$0xff]  ;;  %v1827_v57 = vld [vmem:[#allocation2 + $0x38] sm:$0xff]  ;;  %v1824_v61 = vld [vmem:[#allocation2 + $0x20] sm:$0xff]  ;;  %p10601_p12 = scmp.ne.s32.totalorder %s10419_s7, 0  ;;  %s7900_s16 = smov [#allocation7]  }
 0x531   : > { %v6909_v1 = vpack.c.bf16 %v1827_v57, %v1825_v54  ;;  %v1826_v5 = vld [vmem:[#allocation2 + $0x30] sm:$0xff]  ;;  %v1670_v19 = vld [vmem:[%s10374_s1 + $0x58] sm:$0xff]  ;;  %v1671_v42 = vld [vmem:[%s10374_s1 + $0x60] sm:$0xff]  ;;  %s7796_s10 = sshll.u32 %s7900_s16, 4  ;;  %s7797_s10 = int_to_ptr.vmem [resolvable:$false] %s7796_s10 }
 0x532   : > { %v1669_v6 = vld [vmem:[%s10374_s1 + $0x50] sm:$0xff]  ;;  %6906 = vmatprep.subr.bf16.mxu1 %v6905_v49  ;;  %v6911_v25 = vpack.c.bf16 %v1826_v5, %v1824_v61  ;;  %v1672_v50 = vld [vmem:[%s10374_s1 + $0x68] sm:$0xff]  ;;  %v1674_v11 = vld [vmem:[%s10374_s1 + $0x78] sm:$0xff]  ;;  %p7794_p0 = pnand %p7793_p10, %p10601_p12  ;;  %s7798_s15 = scalar_lea.vmem %s7797_s10, 4096 }
 0x533   : > { %6880 = vmatpush3.bf16.msra.mxu0 %v6877_v40  ;;  %6908 = vmatpush1.bf16.msra.mxu1 %v6907_v53  ;;  %v6893_v34 = vpack.c.bf16 %v1670_v19, %v1669_v6  ;;  %v6897_v58 = vpack.c.bf16 %v1672_v50, %v1671_v42  ;;  %v1673_v2 = vld [vmem:[%s10374_s1 + $0x70] sm:$0xff]  ;;  %v9072_v39 = vld [vmem:[%s9035_s30 + $0x8] sm:$0xff]  ;;  %v9080_v36 = vld [vmem:[%s9035_s30 + $0x18] sm:$0xff]  ;;  %p7799_p5 = scmp.lt.s32.totalorder %s10315_s11, %s7797_s10  ;;  %p7800_p6 = scmp.lt.s32.totalorder %s7798_s15, %s7792_s9 }
 0x534   : > { %6882 = vmatprep.subr.bf16.mxu0 %v6881_v13  ;;  %6910 = vmatprep.subr.bf16.mxu1 %v6909_v1  ;;  %v6901_v10 = vpack.c.bf16 %v1674_v11, %v1673_v2  ;;  %v9075_v24 = vld [vmem:[%s9035_s30 + $0x10] sm:$0xff]  ;;  %v9083_v43 = vld [vmem:[%s9035_s30 + $0x20] sm:$0xff]  ;;  %v9088_v51 = vld [vmem:[%s9035_s30 + $0x28] sm:$0xff]  ;;  %p7795_p2 = pneg %p7794_p0 }
 0x535   : > { %v9091_v27 = vld [vmem:[%s9035_s30 + $0x30] sm:$0xff]  ;;  %v9096_v0 = vld [vmem:[%s9035_s30 + $0x38] sm:$0xff]  ;;  %v9099_v20 = vld [vmem:[%s9035_s30 + $0x40] sm:$0xff]  ;;  %p7801_p7 = por %p7800_p6, %p7799_p5 }
 0x536   : > { %v9104_v9 = vld [vmem:[%s9035_s30 + $0x48] sm:$0xff]  ;;  %v9107_v52 = vld [vmem:[%s9035_s30 + $0x50] sm:$0xff]  ;;  %v9112_v14 = vld [vmem:[%s9035_s30 + $0x58] sm:$0xff] }
 0x537   : > { %6884 = vmatpush3.bf16.msra.mxu0 %v6881_v13  ;;  %6912 = vmatpush1.bf16.msra.mxu1 %v6911_v25  ;;  %v9115_v15 = vld [vmem:[%s9035_s30 + $0x60] sm:$0xff]  ;;  %v9120_v16 = vld [vmem:[%s9035_s30 + $0x68] sm:$0xff]  ;;  %v9123_v28 = vld [vmem:[%s9035_s30 + $0x70] sm:$0xff]  ;;  %p7802_p9 = pnand %p7801_p7, %p7795_p2 }
 0x538   : > { %6886 = vmatprep.subr.bf16.mxu0 %v6885_v56  ;;  %v9128_v31 = vld [vmem:[%s9035_s30 + $0x78] sm:$0xff]  ;;  %v5781_v23 = vld [vmem:[%s10374_s1 + $0x80] sm:$0xff]  ;;  %v5782_v63 = vld [vmem:[%s10374_s1 + $0x88] sm:$0xff] }
 0x539   : > { %v6945_v3 = vpack.c.bf16 %v5782_v63, %v5781_v23  ;;  %v5783_v48 = vld [vmem:[%s10374_s1 + $0x90] sm:$0xff]  ;;  %v5784_v32 = vld [vmem:[%s10374_s1 + $0x98] sm:$0xff]  ;;  %v5785_v8 = vld [vmem:[%s10374_s1 + $0xa0] sm:$0xff] }
 0x53a   : > { %v6949_v12 = vpack.c.bf16 %v5784_v32, %v5783_v48  ;;  %v5786_v55 = vld [vmem:[%s10374_s1 + $0xa8] sm:$0xff]  ;;  %v5787_v59 = vld [vmem:[%s10374_s1 + $0xb0] sm:$0xff]  ;;  %v5788_v7 = vld [vmem:[%s10374_s1 + $0xb8] sm:$0xff] }
 0x53b   : > { %6888 = vmatpush3.bf16.msra.mxu0 %v6885_v56  ;;  %6946 = vmatprep.subr.bf16.mxu1 %v6945_v3  ;;  %v6953_v17 = vpack.c.bf16 %v5786_v55, %v5785_v8  ;;  %v6957_v40 = vpack.c.bf16 %v5788_v7, %v5787_v59  ;;  %v5789_v18 = vld [vmem:[%s10374_s1 + $0xc0] sm:$0xff]  ;;  %v5790_v13 = vld [vmem:[%s10374_s1 + $0xc8] sm:$0xff]  ;;  %v5791_v30 = vld [vmem:[%s10374_s1 + $0xd0] sm:$0xff] }
 0x53c   : > { %6890 = vmatprep.subr.bf16.mxu0 %v6889_v62  ;;  %v6961_v26 = vpack.c.bf16 %v5790_v13, %v5789_v18  ;;  %v5792_v46 = vld [vmem:[%s10374_s1 + $0xd8] sm:$0xff]  ;;  %v5793_v45 = vld [vmem:[%s10374_s1 + $0xe0] sm:$0xff]  ;;  %v5794_v49 = vld [vmem:[%s10374_s1 + $0xe8] sm:$0xff] }
 0x53d   : > { %v6965_v37 = vpack.c.bf16 %v5792_v46, %v5791_v30  ;;  %v6969_v54 = vpack.c.bf16 %v5794_v49, %v5793_v45  ;;  %v5795_v61 = vld [vmem:[%s10374_s1 + $0xf0] sm:$0xff]  ;;  %v2606_v42 = vld [vmem:[#allocation2 + $0x40] sm:$0xff]  ;;  %v2611_v11 = vld [vmem:[#allocation2 + $0x68] sm:$0xff] }
 0x53e   : > { %v2233_v23 = vld [vmem:[#allocation3 + $0x18] sm:$0xff]  ;;  %v2250_v63 = vld [vmem:[#allocation3 + $0xa0] sm:$0xff]  ;;  %v2251_v48 = vld [vmem:[#allocation3 + $0xa8] sm:$0xff] }
 0x53f   : > { %6892 = vmatpush3.bf16.msra.mxu0 %v6889_v62  ;;  %v5796_v62 = vld [vmem:[%s10374_s1 + $0xf8] sm:$0xff]  ;;  %v2235_v8 = vld [vmem:[#allocation3 + $0x28] sm:$0xff] }
 0x540   : > { %6894 = vmatprep.subr.bf16.mxu0 %v6893_v34  ;;  %v6973_v5 = vpack.c.bf16 %v5796_v62, %v5795_v61 }
 0x543   : > { %6896 = vmatpush3.bf16.msra.mxu0 %v6893_v34  ;;  %v2609_v34 = vld [vmem:[#allocation2 + $0x58] sm:$0xff] }
 0x544   : > { %6898 = vmatprep.subr.bf16.mxu0 %v6897_v58 }
 0x547   : > { %6900 = vmatpush3.bf16.msra.mxu0 %v6897_v58  ;;  %v2608_v58 = vld [vmem:[#allocation2 + $0x50] sm:$0xff] }
 0x548   : > { %6902 = vmatprep.subr.bf16.mxu0 %v6901_v10  ;;  %v6979_v2 = vpack.c.bf16 %v2608_v58, %v2606_v42  ;;  %v2258_v58 = vld [vmem:[#allocation3 + $0xe0] sm:$0xff] }
 0x54b   : > { %6904 = vmatpush3.bf16.msra.mxu0 %v6901_v10  ;;  %v2613_v10 = vld [vmem:[#allocation2 + $0x78] sm:$0xff] }
 0x54e   : > { %6522 = vmatmul.mubr.f32.vlgmr.msra.gmra.mrb[0].mxu0 %v9072_v39 }
 0x54f   : > { %6524 = vmatprep.mubr.f32.mxu0 %v9075_v24 }
 0x552   : > { %6525 = vmatmul.mubr.f32.gmra.mrb[2].mxu0 %v9080_v36 }
 0x553   : > { %6527 = vmatprep.mubr.f32.mxu0 %v9083_v43 }
 0x556   : > { %6528 = vmatmul.mubr.f32.gmra.mrb[4].mxu0 %v9088_v51 }
 0x557   : > { %6530 = vmatprep.mubr.f32.mxu0 %v9091_v27 }
 0x55a   : > { %6531 = vmatmul.mubr.f32.gmra.mrb[6].mxu0 %v9096_v0 }
 0x55b   : > { %6533 = vmatprep.mubr.f32.mxu0 %v9099_v20 }
 0x55e   : > { %6534 = vmatmul.mubr.f32.gmra.mrb[8].mxu0 %v9104_v9 }
 0x55f   : > { %6536 = vmatprep.mubr.f32.mxu0 %v9107_v52 }
 0x562   : > { %6537 = vmatmul.mubr.f32.gmra.mrb[10].mxu0 %v9112_v14 }
 0x563   : > { %6539 = vmatprep.mubr.f32.mxu0 %v9115_v15 }
 0x566   : > { %6540 = vmatmul.mubr.f32.gmra.mrb[12].mxu0 %v9120_v16 }
 0x567   : > { %6542 = vmatprep.mubr.f32.mxu0 %v9123_v28 }
 0x56a   : > { %6543 = vmatmul.mubr.f32.gmra.mrb[14].mxu0 %v9128_v31 }
 0x621   : > { %v6523_v47 = vpop.f32.mrb[0].mxu0 }
 0x622   : > { %v1741_v4 = vpop.f32.mrb[1].mxu0 }
 0x623   : > { %5765 = vmatmul.mubr.msk.f32.vlgmr.msra.gmra.mrb[0].mxu1 %vm1828_vm1, %v1741_v4  ;;  %v2234_v4 = vld [vmem:[#allocation3 + $0x20] sm:$0xff] }
 0x624   : > { %6948 = vmatpush3.bf16.msra.mxu1 %v6945_v3  ;;  %1947 = vmatprep.mubr.f32.mxu1 %v10416_v35  ;;  %v6923_v7 = vpack.c.bf16 %v2235_v8, %v2234_v4 }
 0x625   : > { %v6526_v44 = vpop.f32.mrb[2].mxu0  ;;  %6950 = vmatprep.subr.bf16.mxu1 %v6949_v12 }
 0x626   : > { %v1751_v21 = vpop.f32.mrb[3].mxu0 }
 0x627   : > { %5766 = vmatmul.mubr.msk.f32.gmra.mrb[2].mxu1 %vm1828_vm1, %v6523_v47 }
 0x628   : > { %1953 = vmatprep.mubr.f32.mxu1 %v10416_v35  ;;  %6952 = vmatpush3.bf16.msra.mxu1 %v6949_v12  ;;  %v6921_v12 = vpack.c.bf16 %v2251_v48, %v2250_v63 }
 0x629   : > { %v6529_v60 = vpop.f32.mrb[4].mxu0  ;;  %6954 = vmatprep.subr.bf16.mxu1 %v6953_v17 }
 0x62a   : > { %v1761_v29 = vpop.f32.mrb[5].mxu0 }
 0x62b   : > { %5767 = vmatmul.mubr.msk.f32.gmra.mrb[4].mxu1 %vm1828_vm1, %v1751_v21 }
 0x62c   : > { %1959 = vmatprep.mubr.f32.mxu1 %v10416_v35  ;;  %6956 = vmatpush3.bf16.msra.mxu1 %v6953_v17  ;;  %v2253_v17 = vld [vmem:[#allocation3 + $0xb8] sm:$0xff] }
 0x62d   : > { %v6532_v38 = vpop.f32.mrb[6].mxu0  ;;  %6958 = vmatprep.subr.bf16.mxu1 %v6957_v40 }
 0x62e   : > { %v1771_v56 = vpop.f32.mrb[7].mxu0 }
 0x62f   : > { %5768 = vmatmul.mubr.msk.f32.gmra.mrb[6].mxu1 %vm1828_vm1, %v6526_v44  ;;  %v2252_v44 = vld [vmem:[#allocation3 + $0xb0] sm:$0xff] }
 0x630   : > { %1965 = vmatprep.mubr.f32.mxu1 %v10416_v35  ;;  %6960 = vmatpush3.bf16.msra.mxu1 %v6957_v40  ;;  %v2236_v40 = vld [vmem:[#allocation3 + $0x30] sm:$0xff] }
 0x631   : > { %v6535_v33 = vpop.f32.mrb[8].mxu0  ;;  %6962 = vmatprep.subr.bf16.mxu1 %v6961_v26 }
 0x632   : > { %v1781_v41 = vpop.f32.mrb[9].mxu0 }
 0x633   : > { %5769 = vmatmul.mubr.msk.f32.gmra.mrb[8].mxu1 %vm1828_vm1, %v1761_v29  ;;  %v2237_v29 = vld [vmem:[#allocation3 + $0x38] sm:$0xff] }
 0x634   : > { %1971 = vmatprep.mubr.f32.mxu1 %v10416_v35  ;;  %6964 = vmatpush3.bf16.msra.mxu1 %v6961_v26  ;;  %v6927_v26 = vpack.c.bf16 %v2237_v29, %v2236_v40 }
 0x635   : > { %v6538_v53 = vpop.f32.mrb[10].mxu0  ;;  %6966 = vmatprep.subr.bf16.mxu1 %v6965_v37 }
 0x636   : > { %v1791_v57 = vpop.f32.mrb[11].mxu0 }
 0x637   : > { %5770 = vmatmul.mubr.msk.f32.gmra.mrb[10].mxu1 %vm1828_vm1, %v6529_v60  ;;  %v6925_v60 = vpack.c.bf16 %v2253_v17, %v2252_v44 }
 0x638   : > { %1977 = vmatprep.mubr.f32.mxu1 %v10416_v35  ;;  %6968 = vmatpush3.bf16.msra.mxu1 %v6965_v37  ;;  %v2254_v37 = vld [vmem:[#allocation3 + $0xc0] sm:$0xff] }
 0x639   : > { %v6541_v1 = vpop.f32.mrb[12].mxu0  ;;  %6970 = vmatprep.subr.bf16.mxu1 %v6969_v54 }
 0x63a   : > { %v1801_v6 = vpop.f32.mrb[13].mxu0 }
 0x63b   : > { %5771 = vmatmul.mubr.msk.f32.gmra.mrb[12].mxu1 %vm1828_vm1, %v1771_v56 }
 0x63c   : > { %1983 = vmatprep.mubr.f32.mxu1 %v10416_v35  ;;  %6972 = vmatpush3.bf16.msra.mxu1 %v6969_v54  ;;  %v2239_v54 = vld [vmem:[#allocation3 + $0x48] sm:$0xff] }
 0x63d   : > { %v6544_v19 = vpop.f32.mrb[14].mxu0  ;;  %6974 = vmatprep.subr.bf16.mxu1 %v6973_v5 }
 0x63e   : > { %v1811_v25 = vpop.f32.mrb[15].mxu0 }
 0x63f   : > { %5772 = vmatmul.mubr.msk.f32.gmra.mrb[14].mxu1 %vm1828_vm1, %v6532_v38 }
 0x640   : > { %1989 = vmatprep.mubr.f32.mxu1 %v10416_v35  ;;  %6976 = vmatpush3.bf16.msra.mxu1 %v6973_v5  ;;  %v2257_v5 = vld [vmem:[#allocation3 + $0xd8] sm:$0xff] }
 0x643   : > { %5773 = vmatmul.mubr.msk.f32.gmra.mrb[16].mxu1 %vm1828_vm1, %v1781_v41  ;;  %v2255_v41 = vld [vmem:[#allocation3 + $0xc8] sm:$0xff] }
 0x644   : > { %1995 = vmatprep.mubr.f32.mxu1 %v10416_v35  ;;  %v6929_v49 = vpack.c.bf16 %v2255_v41, %v2254_v37 }
 0x647   : > { %5774 = vmatmul.mubr.msk.f32.gmra.mrb[18].mxu1 %vm1828_vm1, %v6535_v33 }
 0x648   : > { %2001 = vmatprep.mubr.f32.mxu1 %v10416_v35 }
 0x64b   : > { %5775 = vmatmul.mubr.msk.f32.gmra.mrb[20].mxu1 %vm1828_vm1, %v1791_v57 }
 0x64c   : > { %2007 = vmatprep.mubr.f32.mxu1 %v10416_v35 }
 0x64f   : > { %5776 = vmatmul.mubr.msk.f32.gmra.mrb[22].mxu1 %vm1828_vm1, %v6538_v53  ;;  %v2238_v53 = vld [vmem:[#allocation3 + $0x40] sm:$0xff] }
 0x650   : > { %2013 = vmatprep.mubr.f32.mxu1 %v10416_v35  ;;  %v6931_v61 = vpack.c.bf16 %v2239_v54, %v2238_v53 }
 0x653   : > { %5777 = vmatmul.mubr.msk.f32.gmra.mrb[24].mxu1 %vm1828_vm1, %v1801_v6 }
 0x654   : > { %2019 = vmatprep.mubr.f32.mxu1 %v10416_v35 }
 0x657   : > { %5778 = vmatmul.mubr.msk.f32.gmra.mrb[26].mxu1 %vm1828_vm1, %v6541_v1  ;;  %v2256_v1 = vld [vmem:[#allocation3 + $0xd0] sm:$0xff] }
 0x658   : > { %2025 = vmatprep.mubr.f32.mxu1 %v10416_v35 }
 0x65b   : > { %5779 = vmatmul.mubr.msk.f32.gmra.mrb[28].mxu1 %vm1828_vm1, %v1811_v25  ;;  %v2240_v25 = vld [vmem:[#allocation3 + $0x50] sm:$0xff] }
 0x65c   : > { %2031 = vmatprep.mubr.f32.mxu1 %v10416_v35 }
 0x65f   : > { %5780 = vmatmul.mubr.msk.f32.gmra.mrb[30].mxu1 %vm1828_vm1, %v6544_v19  ;;  %v6933_v19 = vpack.c.bf16 %v2257_v5, %v2256_v1 }
 0x660   : > { %6577 = vmatprep.mubr.f32.mxu1 %v9038_v22  ;;  %v2607_v22 = vld [vmem:[#allocation2 + $0x48] sm:$0xff] }
 0x661   : > { %v6977_v50 = vpack.c.bf16 %v2609_v34, %v2607_v22  ;;  %v2241_v22 = vld [vmem:[#allocation3 + $0x58] sm:$0xff] }
 0x662   : > { %v6935_v42 = vpack.c.bf16 %v2241_v22, %v2240_v25 }
 0x663   : > { %6578 = vmatmul.mubr.f32.vlgmr.msra.gmra.mrb[32].mxu1 %v9072_v39  ;;  %6978 = vmatprep.subr.bf16.mxu1 %v6977_v50  ;;  %v2610_v39 = vld [vmem:[#allocation2 + $0x60] sm:$0xff] }
 0x664   : > { %6580 = vmatprep.mubr.f32.mxu1 %v9075_v24  ;;  %6980 = vmatpush1.bf16.msra.mxu1 %v6979_v2  ;;  %v6981_v24 = vpack.c.bf16 %v2613_v10, %v2611_v11  ;;  %v2259_v2 = vld [vmem:[#allocation3 + $0xe8] sm:$0xff] }
 0x665   : > { %v6937_v10 = vpack.c.bf16 %v2259_v2, %v2258_v58 }
 0x666   : > { %6982 = vmatprep.subr.bf16.mxu1 %v6981_v24  ;;  %v2243_v24 = vld [vmem:[#allocation3 + $0x68] sm:$0xff] }
 0x667   : > { %6581 = vmatmul.mubr.f32.gmra.mrb[34].mxu1 %v9080_v36  ;;  %v2612_v36 = vld [vmem:[#allocation2 + $0x70] sm:$0xff] }
 0x668   : > { %6583 = vmatprep.mubr.f32.mxu1 %v9083_v43  ;;  %v6983_v43 = vpack.c.bf16 %v2612_v36, %v2610_v39  ;;  %v2242_v39 = vld [vmem:[#allocation3 + $0x60] sm:$0xff] }
 0x66a   : > { %6984 = vmatpush1.bf16.msra.mxu1 %v6983_v43  ;;  %v6939_v43 = vpack.c.bf16 %v2243_v24, %v2242_v39 }
 0x66b   : > { %6584 = vmatmul.mubr.f32.gmra.mrb[36].mxu1 %v9088_v51  ;;  %v2246_v51 = vld [vmem:[#allocation3 + $0x80] sm:$0xff] }
 0x66c   : > { %6586 = vmatprep.mubr.f32.mxu1 %v9091_v27  ;;  %v2247_v27 = vld [vmem:[#allocation3 + $0x88] sm:$0xff] }
 0x66f   : > { %6587 = vmatmul.mubr.f32.gmra.mrb[38].mxu1 %v9096_v0  ;;  %v2230_v0 = vld [vmem:[#allocation3] sm:$0xff] }
 0x670   : > { %6589 = vmatprep.mubr.f32.mxu1 %v9099_v20  ;;  %v6913_v20 = vpack.c.bf16 %v2247_v27, %v2246_v51  ;;  %v2260_v27 = vld [vmem:[#allocation3 + $0xf0] sm:$0xff] }
 0x672   : > { %6914 = vmatprep.subr.bf16.mxu0 %v6913_v20 }
 0x673   : > { %6590 = vmatmul.mubr.f32.gmra.mrb[40].mxu1 %v9104_v9  ;;  %v2231_v9 = vld [vmem:[#allocation3 + $0x8] sm:$0xff] }
 0x674   : > { %6592 = vmatprep.mubr.f32.mxu1 %v9107_v52  ;;  %v2248_v52 = vld [vmem:[#allocation3 + $0x90] sm:$0xff] }
 0x677   : > { %6593 = vmatmul.mubr.f32.gmra.mrb[42].mxu1 %v9112_v14  ;;  %v2249_v14 = vld [vmem:[#allocation3 + $0x98] sm:$0xff] }
 0x678   : > { %6595 = vmatprep.mubr.f32.mxu1 %v9115_v15 }
 0x67b   : > { %6596 = vmatmul.mubr.f32.gmra.mrb[44].mxu1 %v9120_v16  ;;  %v6915_v16 = vpack.c.bf16 %v2231_v9, %v2230_v0  ;;  %v2261_v0 = vld [vmem:[#allocation3 + $0xf8] sm:$0xff] }
 0x67c   : > { %6598 = vmatprep.mubr.f32.mxu1 %v9123_v28  ;;  %v6917_v28 = vpack.c.bf16 %v2249_v14, %v2248_v52  ;;  %v6941_v9 = vpack.c.bf16 %v2261_v0, %v2260_v27  ;;  %v2244_v52 = vld [vmem:[#allocation3 + $0x70] sm:$0xff]  ;;  %v2245_v14 = vld [vmem:[#allocation3 + $0x78] sm:$0xff] }
 0x67d   : > { %6916 = vmatpush3.bf16.msra.mxu0 %v6915_v16 }
 0x67e   : > { %6918 = vmatprep.subr.bf16.mxu0 %v6917_v28  ;;  %v6943_v28 = vpack.c.bf16 %v2245_v14, %v2244_v52 }
 0x67f   : > { %6599 = vmatmul.mubr.f32.gmra.mrb[46].mxu1 %v9128_v31  ;;  %v2232_v31 = vld [vmem:[#allocation3 + $0x10] sm:$0xff] }
 0x680   : > { %2726 = vmatprep.mubr.f32.mxu1 %v10416_v35  ;;  %v6919_v47 = vpack.c.bf16 %v2233_v23, %v2232_v31 }
 0x682   : > { %6920 = vmatpush3.bf16.msra.mxu0 %v6919_v47 }
 0x683   : > { %6922 = vmatprep.subr.bf16.mxu0 %v6921_v12 }
 0x686   : > { %6924 = vmatpush3.bf16.msra.mxu0 %v6923_v7 }
 0x687   : > { %6926 = vmatprep.subr.bf16.mxu0 %v6925_v60 }
 0x68a   : > { %6928 = vmatpush3.bf16.msra.mxu0 %v6927_v26 }
 0x68b   : > { %6930 = vmatprep.subr.bf16.mxu0 %v6929_v49 }
 0x68e   : > { %6932 = vmatpush3.bf16.msra.mxu0 %v6931_v61 }
 0x68f   : > { %6934 = vmatprep.subr.bf16.mxu0 %v6933_v19 }
 0x692   : > { %6936 = vmatpush3.bf16.msra.mxu0 %v6935_v42 }
 0x693   : > { %6938 = vmatprep.subr.bf16.mxu0 %v6937_v10 }
 0x696   : > { %6940 = vmatpush3.bf16.msra.mxu0 %v6939_v43 }
 0x697   : > { %6942 = vmatprep.subr.bf16.mxu0 %v6941_v9 }
 0x69a   : > { %6944 = vmatpush3.bf16.msra.mxu0 %v6943_v28 }
 0x6f6   : > { %v9228_v15 = vpop.f32.mrb[0].mxu1 }
 0x6f7   : > { %v9230_v3 = vpop.f32.mrb[1].mxu1 }
 0x6f8   : > { %v2038_v32 = vmax.f32 %v9228_v15, %v9230_v3 }
 0x6fa   : > { %2039 = vmax.xlane.f32.xlu0 %v2038_v32  ;;  %v9234_v55 = vpop.f32.mrb[2].mxu1 }
 0x6fb   : > { %v9236_v21 = vpop.f32.mrb[3].mxu1 }
 0x6fc   : > { %v2041_v59 = vmax.f32 %v9234_v55, %v9236_v21 }
 0x6fe   : > { %2042 = vmax.xlane.f32.xlu0 %v2041_v59  ;;  %v9240_v18 = vpop.f32.mrb[4].mxu1 }
 0x6ff   : > { %v9242_v13 = vpop.f32.mrb[5].mxu1 }
 0x700   : > { %v2044_v38 = vmax.f32 %v9240_v18, %v9242_v13 }
 0x702   : > { %2045 = vmax.xlane.f32.xlu1 %v2044_v38  ;;  %v9246_v56 = vpop.f32.mrb[6].mxu1 }
 0x703   : > { %v9248_v30 = vpop.f32.mrb[7].mxu1 }
 0x704   : > { %v2047_v46 = vmax.f32 %v9246_v56, %v9248_v30 }
 0x706   : > { %2048 = vmax.xlane.f32.xlu1 %v2047_v46  ;;  %v9252_v33 = vpop.f32.mrb[8].mxu1 }
 0x707   : > { %v9254_v45 = vpop.f32.mrb[9].mxu1 }
 0x708   : > { %v2050_v57 = vmax.f32 %v9252_v33, %v9254_v45 }
 0x70a   : > { %2051 = vmax.xlane.f32.xlu0 %v2050_v57  ;;  %v9258_v62 = vpop.f32.mrb[10].mxu1 }
 0x70b   : > { %v9260_v6 = vpop.f32.mrb[11].mxu1 }
 0x70c   : > { %v2053_v34 = vmax.f32 %v9258_v62, %v9260_v6 }
 0x70e   : > { %2054 = vmax.xlane.f32.xlu1 %v2053_v34  ;;  %v9264_v50 = vpop.f32.mrb[12].mxu1 }
 0x70f   : > { %v9266_v11 = vpop.f32.mrb[13].mxu1 }
 0x710   : > { %v2056_v36 = vmax.f32 %v9264_v50, %v9266_v11 }
 0x712   : > { %2057 = vmax.xlane.f32.xlu0 %v2056_v36  ;;  %v9270_v51 = vpop.f32.mrb[14].mxu1 }
 0x713   : > { %v9272_v20 = vpop.f32.mrb[15].mxu1 }
 0x714   : > { %v2059_v16 = vmax.f32 %v9270_v51, %v9272_v20 }
 0x716   : > { %2060 = vmax.xlane.f32.xlu1 %v2059_v16  ;;  %v9276_v31 = vpop.f32.mrb[16].mxu1 }
 0x717   : > { %v9278_v23 = vpop.f32.mrb[17].mxu1 }
 0x718   : > { %v2062_v63 = vmax.f32 %v9276_v31, %v9278_v23 }
 0x71a   : > { %2063 = vmax.xlane.f32.xlu0 %v2062_v63  ;;  %v9282_v48 = vpop.f32.mrb[18].mxu1 }
 0x71b   : > { %v9284_v32 = vpop.f32.mrb[19].mxu1 }
 0x71c   : > { %v2065_v47 = vmax.f32 %v9282_v48, %v9284_v32 }
 0x71e   : > { %2066 = vmax.xlane.f32.xlu1 %v2065_v47  ;;  %v9288_v12 = vpop.f32.mrb[20].mxu1 }
 0x71f   : > { %v9290_v4 = vpop.f32.mrb[21].mxu1 }
 0x720   : > { %v2068_v8 = vmax.f32 %v9288_v12, %v9290_v4 }
 0x722   : > { %2069 = vmax.xlane.f32.xlu0 %v2068_v8  ;;  %v9294_v44 = vpop.f32.mrb[22].mxu1 }
 0x723   : > { %v9296_v17 = vpop.f32.mrb[23].mxu1 }
 0x724   : > { %v2071_v59 = vmax.f32 %v9294_v44, %v9296_v17 }
 0x726   : > { %2072 = vmax.xlane.f32.xlu1 %v2071_v59  ;;  %v9300_v7 = vpop.f32.mrb[24].mxu1 }
 0x727   : > { %v9302_v60 = vpop.f32.mrb[25].mxu1 }
 0x728   : > { %v2074_v40 = vmax.f32 %v9300_v7, %v9302_v60 }
 0x72a   : > { %2075 = vmax.xlane.f32.xlu0 %v2074_v40  ;;  %v9306_v29 = vpop.f32.mrb[26].mxu1 }
 0x72b   : > { %v9308_v38 = vpop.f32.mrb[27].mxu1 }
 0x72c   : > { %v2077_v26 = vmax.f32 %v9306_v29, %v9308_v38 }
 0x72e   : > { %2078 = vmax.xlane.f32.xlu1 %v2077_v26  ;;  %v9312_v46 = vpop.f32.mrb[28].mxu1 }
 0x72f   : > { %v9314_v37 = vpop.f32.mrb[29].mxu1 }
 0x730   : > { %v2080_v41 = vmax.f32 %v9312_v46, %v9314_v37 }
 0x732   : > { %2081 = vmax.xlane.f32.xlu0 %v2080_v41  ;;  %v9318_v49 = vpop.f32.mrb[30].mxu1 }
 0x733   : > { %v9320_v53 = vpop.f32.mrb[31].mxu1 }
 0x734   : > { %v2083_v54 = vmax.f32 %v9318_v49, %v9320_v53 }
 0x736   : > { %v6579_v57 = vpop.f32.mrb[32].mxu1  ;;  %2084 = vmax.xlane.f32.xlu1 %v2083_v54 }
 0x737   : > { %v2526_v61 = vpop.f32.mrb[33].mxu1 }
 0x738   : > { %5797 = vmatmul.mubr.msk.f32.vlgmr.msra.gmra.mrb[48].mxu1 %vm1828_vm1, %v2526_v61 }
 0x739   : > { %2732 = vmatprep.mubr.f32.mxu1 %v10416_v35 }
 0x73a   : > { %v6582_v1 = vpop.f32.mrb[34].mxu1 }
 0x73b   : > { %v2536_v5 = vpop.f32.mrb[35].mxu1 }
 0x73c   : > { %5798 = vmatmul.mubr.msk.f32.gmra.mrb[50].mxu1 %vm1828_vm1, %v6579_v57 }
 0x73d   : > { %2738 = vmatprep.mubr.f32.mxu1 %v10416_v35 }
 0x73e   : > { %v6585_v19 = vpop.f32.mrb[36].mxu1 }
 0x73f   : > { %v2546_v25 = vpop.f32.mrb[37].mxu1 }
 0x740   : > { %5799 = vmatmul.mubr.msk.f32.gmra.mrb[52].mxu1 %vm1828_vm1, %v2536_v5 }
 0x741   : > { %2744 = vmatprep.mubr.f32.mxu1 %v10416_v35 }
 0x742   : > { %v6588_v22 = vpop.f32.mrb[38].mxu1 }
 0x743   : > { %v2556_v34 = vpop.f32.mrb[39].mxu1 }
 0x744   : > { %5800 = vmatmul.mubr.msk.f32.gmra.mrb[54].mxu1 %vm1828_vm1, %v6582_v1 }
 0x745   : > { %2750 = vmatprep.mubr.f32.mxu1 %v10416_v35 }
 0x746   : > { %v6591_v42 = vpop.f32.mrb[40].mxu1 }
 0x747   : > { %v2566_v58 = vpop.f32.mrb[41].mxu1 }
 0x748   : > { %5801 = vmatmul.mubr.msk.f32.gmra.mrb[56].mxu1 %vm1828_vm1, %v2546_v25 }
 0x749   : > { %2756 = vmatprep.mubr.f32.mxu1 %v10416_v35 }
 0x74a   : > { %v6594_v2 = vpop.f32.mrb[42].mxu1 }
 0x74b   : > { %v2576_v10 = vpop.f32.mrb[43].mxu1 }
 0x74c   : > { %5802 = vmatmul.mubr.msk.f32.gmra.mrb[58].mxu1 %vm1828_vm1, %v6585_v19 }
 0x74d   : > { %2762 = vmatprep.mubr.f32.mxu1 %v10416_v35 }
 0x74e   : > { %v6597_v39 = vpop.f32.mrb[44].mxu1 }
 0x74f   : > { %v2586_v24 = vpop.f32.mrb[45].mxu1 }
 0x750   : > { %5803 = vmatmul.mubr.msk.f32.gmra.mrb[60].mxu1 %vm1828_vm1, %v2556_v34 }
 0x751   : > { %2768 = vmatprep.mubr.f32.mxu1 %v10416_v35 }
 0x752   : > { %v6600_v36 = vpop.f32.mrb[46].mxu1 }
 0x753   : > { %v2596_v43 = vpop.f32.mrb[47].mxu1 }
 0x754   : > { %5804 = vmatmul.mubr.msk.f32.gmra.mrb[62].mxu1 %vm1828_vm1, %v6588_v22 }
 0x755   : > { %2774 = vmatprep.mubr.f32.mxu1 %v10416_v35 }
 0x758   : > { %5805 = vmatmul.mubr.msk.f32.gmra.mrb[64].mxu1 %vm1828_vm1, %v2566_v58 }
 0x759   : > { %2780 = vmatprep.mubr.f32.mxu1 %v10416_v35 }
 0x75c   : > { %5806 = vmatmul.mubr.msk.f32.gmra.mrb[66].mxu1 %vm1828_vm1, %v6591_v42 }
 0x75d   : > { %2786 = vmatprep.mubr.f32.mxu1 %v10416_v35 }
 0x760   : > { %5807 = vmatmul.mubr.msk.f32.gmra.mrb[68].mxu1 %vm1828_vm1, %v2576_v10 }
 0x761   : > { %2792 = vmatprep.mubr.f32.mxu1 %v10416_v35 }
 0x764   : > { %5808 = vmatmul.mubr.msk.f32.gmra.mrb[70].mxu1 %vm1828_vm1, %v6594_v2 }
 0x765   : > { %2798 = vmatprep.mubr.f32.mxu1 %v10416_v35 }
 0x768   : > { %5809 = vmatmul.mubr.msk.f32.gmra.mrb[72].mxu1 %vm1828_vm1, %v2586_v24 }
 0x769   : > { %2804 = vmatprep.mubr.f32.mxu1 %v10416_v35 }
 0x76c   : > { %5810 = vmatmul.mubr.msk.f32.gmra.mrb[74].mxu1 %vm1828_vm1, %v6597_v39 }
 0x76d   : > { %2810 = vmatprep.mubr.f32.mxu1 %v10416_v35 }
 0x770   : > { %5811 = vmatmul.mubr.msk.f32.gmra.mrb[76].mxu1 %vm1828_vm1, %v2596_v43 }
 0x771   : > { %2816 = vmatprep.mubr.f32.mxu1 %v10416_v35 }
 0x774   : > { %5812 = vmatmul.mubr.msk.f32.gmra.mrb[78].mxu1 %vm1828_vm1, %v6600_v36 }
 0x787   : > { %v2040_v27 = vpop.xlane.xlu0 %2039 }
 0x788   : > { %v2086_v0 = vsub.f32 %v9228_v15, %v2040_v27  ;;  %v2087_v9 = vsub.f32 %v9230_v3, %v2040_v27 }
 0x78a   : > { %v2118_v52 = vmul.f32 1.442695, %v2086_v0  ;;  %v2120_v14 = vmul.f32 1.442695, %v2087_v9 }
 0x78b   : > { %v2043_v16 = vpop.xlane.xlu0 %2042 }
 0x78c   : > { %7364 = vpow2.f32 %v2118_v52  ;;  %v2088_v28 = vsub.f32 %v9234_v55, %v2043_v16  ;;  %v2089_v63 = vsub.f32 %v9236_v21, %v2043_v16 }
 0x78d   : > { %7366 = vpow2.f32 %v2120_v14 }
 0x78e   : > { %v2122_v47 = vmul.f32 1.442695, %v2088_v28  ;;  %v2124_v8 = vmul.f32 1.442695, %v2089_v63 }
 0x78f   : > { %v2046_v59 = vpop.xlane.xlu1 %2045 }
 0x790   : > { %7368 = vpow2.f32 %v2122_v47  ;;  %v2090_v40 = vsub.f32 %v9240_v18, %v2046_v59  ;;  %v2091_v26 = vsub.f32 %v9242_v13, %v2046_v59 }
 0x791   : > { %7370 = vpow2.f32 %v2124_v8 }
 0x792   : > { %v2126_v15 = vmul.f32 1.442695, %v2090_v40  ;;  %v2128_v3 = vmul.f32 1.442695, %v2091_v26 }
 0x793   : > { %v2049_v41 = vpop.xlane.xlu1 %2048 }
 0x794   : > { %7372 = vpow2.f32 %v2126_v15  ;;  %v2092_v54 = vsub.f32 %v9246_v56, %v2049_v41  ;;  %v2093_v55 = vsub.f32 %v9248_v30, %v2049_v41 }
 0x795   : > { %7374 = vpow2.f32 %v2128_v3 }
 0x796   : > { %v7365_v21 = vpop.eup %7364  ;;  %v2130_v57 = vmul.f32 1.442695, %v2092_v54  ;;  %v2132_v61 = vmul.f32 1.442695, %v2093_v55 }
 0x797   : > { %v7367_v1 = vpop.eup %7366  ;;  %v2052_v5 = vpop.xlane.xlu0 %2051 }
 0x798   : > { %7376 = vpow2.f32 %v2130_v57  ;;  %2326 = vmatprep.mubr.f32.mxu0 %v7367_v1  ;;  %v2094_v18 = vsub.f32 %v9252_v33, %v2052_v5  ;;  %v2095_v13 = vsub.f32 %v9254_v45, %v2052_v5  ;;  %v9365_v19 = vadd.f32 %v7367_v1, %v7365_v21 }
 0x799   : > { %7378 = vpow2.f32 %v2132_v61  ;;  %2327 = vmatmul.mubr.f32.vlgmr.msra.gmra.mrb[16].mxu0 %v7365_v21 }
 0x79a   : > { %v7369_v25 = vpop.eup %7368  ;;  %v2134_v56 = vmul.f32 1.442695, %v2094_v18  ;;  %v2136_v22 = vmul.f32 1.442695, %v2095_v13 }
 0x79b   : > { %v7371_v30 = vpop.eup %7370  ;;  %v2055_v34 = vpop.xlane.xlu1 %2054 }
 0x79c   : > { %7380 = vpow2.f32 %v2134_v56  ;;  %2331 = vmatprep.mubr.f32.mxu0 %v7371_v30  ;;  %v2096_v42 = vsub.f32 %v9258_v62, %v2055_v34  ;;  %v2097_v58 = vsub.f32 %v9260_v6, %v2055_v34  ;;  %v9369_v2 = vadd.f32 %v7371_v30, %v7369_v25 }
 0x79d   : > { %7382 = vpow2.f32 %v2136_v22  ;;  %2332 = vmatmul.mubr.f32.gmra.mrb[18].mxu0 %v7369_v25 }
 0x79e   : > { %v7373_v33 = vpop.eup %7372  ;;  %v2138_v45 = vmul.f32 1.442695, %v2096_v42  ;;  %v2140_v10 = vmul.f32 1.442695, %v2097_v58 }
 0x79f   : > { %v7375_v39 = vpop.eup %7374  ;;  %v2058_v24 = vpop.xlane.xlu0 %2057 }
 0x7a0   : > { %7384 = vpow2.f32 %v2138_v45  ;;  %2336 = vmatprep.mubr.f32.mxu0 %v7375_v39  ;;  %v2098_v36 = vsub.f32 %v9264_v50, %v2058_v24  ;;  %v2099_v43 = vsub.f32 %v9266_v11, %v2058_v24  ;;  %v9373_v27 = vadd.f32 %v7375_v39, %v7373_v33 }
 0x7a1   : > { %7386 = vpow2.f32 %v2140_v10  ;;  %2337 = vmatmul.mubr.f32.gmra.mrb[20].mxu0 %v7373_v33 }
 0x7a2   : > { %v7377_v62 = vpop.eup %7376  ;;  %v2142_v6 = vmul.f32 1.442695, %v2098_v36  ;;  %v2144_v0 = vmul.f32 1.442695, %v2099_v43 }
 0x7a3   : > { %v7379_v9 = vpop.eup %7378  ;;  %v2061_v52 = vpop.xlane.xlu1 %2060 }
 0x7a4   : > { %7388 = vpow2.f32 %v2142_v6  ;;  %2341 = vmatprep.mubr.f32.mxu0 %v7379_v9  ;;  %v2100_v14 = vsub.f32 %v9270_v51, %v2061_v52  ;;  %v2101_v16 = vsub.f32 %v9272_v20, %v2061_v52  ;;  %v9377_v28 = vadd.f32 %v7379_v9, %v7377_v62 }
 0x7a5   : > { %7390 = vpow2.f32 %v2144_v0  ;;  %2342 = vmatmul.mubr.f32.gmra.mrb[22].mxu0 %v7377_v62 }
 0x7a6   : > { %v7381_v50 = vpop.eup %7380  ;;  %v2146_v11 = vmul.f32 1.442695, %v2100_v14  ;;  %v2148_v63 = vmul.f32 1.442695, %v2101_v16 }
 0x7a7   : > { %v7383_v47 = vpop.eup %7382  ;;  %v2064_v8 = vpop.xlane.xlu0 %2063 }
 0x7a8   : > { %7392 = vpow2.f32 %v2146_v11  ;;  %2346 = vmatprep.mubr.f32.mxu0 %v7383_v47  ;;  %v2102_v59 = vsub.f32 %v9276_v31, %v2064_v8  ;;  %v2103_v40 = vsub.f32 %v9278_v23, %v2064_v8  ;;  %v9381_v26 = vadd.f32 %v7383_v47, %v7381_v50 }
 0x7a9   : > { %7394 = vpow2.f32 %v2148_v63  ;;  %2347 = vmatmul.mubr.f32.gmra.mrb[24].mxu0 %v7381_v50 }
 0x7aa   : > { %v7385_v51 = vpop.eup %7384  ;;  %v2150_v20 = vmul.f32 1.442695, %v2102_v59  ;;  %v2152_v15 = vmul.f32 1.442695, %v2103_v40 }
 0x7ab   : > { %v7387_v3 = vpop.eup %7386  ;;  %v2067_v41 = vpop.xlane.xlu1 %2066 }
 0x7ac   : > { %7396 = vpow2.f32 %v2150_v20  ;;  %2351 = vmatprep.mubr.f32.mxu0 %v7387_v3  ;;  %v2104_v54 = vsub.f32 %v9282_v48, %v2067_v41  ;;  %v2105_v55 = vsub.f32 %v9284_v32, %v2067_v41  ;;  %v9385_v21 = vadd.f32 %v7387_v3, %v7385_v51 }
 0x7ad   : > { %7398 = vpow2.f32 %v2152_v15  ;;  %2352 = vmatmul.mubr.f32.gmra.mrb[26].mxu0 %v7385_v51 }
 0x7ae   : > { %v7389_v31 = vpop.eup %7388  ;;  %v2154_v23 = vmul.f32 1.442695, %v2104_v54  ;;  %v2156_v57 = vmul.f32 1.442695, %v2105_v55 }
 0x7af   : > { %v7391_v61 = vpop.eup %7390  ;;  %v2070_v1 = vpop.xlane.xlu0 %2069 }
 0x7b0   : > { %7400 = vpow2.f32 %v2154_v23  ;;  %2356 = vmatprep.mubr.f32.mxu0 %v7391_v61  ;;  %v2106_v5 = vsub.f32 %v9288_v12, %v2070_v1  ;;  %v2107_v18 = vsub.f32 %v9290_v4, %v2070_v1  ;;  %v9389_v13 = vadd.f32 %v7391_v61, %v7389_v31 }
 0x7b1   : > { %7402 = vpow2.f32 %v2156_v57  ;;  %2357 = vmatmul.mubr.f32.gmra.mrb[28].mxu0 %v7389_v31 }
 0x7b2   : > { %v7393_v48 = vpop.eup %7392  ;;  %v2158_v32 = vmul.f32 1.442695, %v2106_v5  ;;  %v2160_v25 = vmul.f32 1.442695, %v2107_v18  ;;  %v3032_v5 = vld [vmem:[#allocation3 + $0x180] sm:$0xff]  ;;  %v3033_v18 = vld [vmem:[#allocation3 + $0x188] sm:$0xff] }
 0x7b3   : > { %v7395_v56 = vpop.eup %7394  ;;  %v2073_v22 = vpop.xlane.xlu1 %2072 }
 0x7b4   : > { %7404 = vpow2.f32 %v2158_v32  ;;  %2361 = vmatprep.mubr.f32.mxu0 %v7395_v56  ;;  %v2108_v30 = vsub.f32 %v9294_v44, %v2073_v22  ;;  %v2109_v34 = vsub.f32 %v9296_v17, %v2073_v22  ;;  %v9393_v42 = vadd.f32 %v7395_v56, %v7393_v48  ;;  %v3034_v22 = vld [vmem:[#allocation3 + $0x190] sm:$0xff] }
 0x7b5   : > { %7406 = vpow2.f32 %v2160_v25  ;;  %2362 = vmatmul.mubr.f32.gmra.mrb[30].mxu0 %v7393_v48  ;;  %v3016_v48 = vld [vmem:[#allocation3 + $0x100] sm:$0xff]  ;;  %v6985_v32 = vpack.c.bf16 %v3033_v18, %v3032_v5  ;;  %v3017_v25 = vld [vmem:[#allocation3 + $0x108] sm:$0xff] }
 0x7b6   : > { %v7397_v12 = vpop.eup %7396  ;;  %v2162_v4 = vmul.f32 1.442695, %v2108_v30  ;;  %v2164_v58 = vmul.f32 1.442695, %v2109_v34  ;;  %v6987_v56 = vpack.c.bf16 %v3017_v25, %v3016_v48  ;;  %v3035_v30 = vld [vmem:[#allocation3 + $0x198] sm:$0xff]  ;;  %v3018_v34 = vld [vmem:[#allocation3 + $0x110] sm:$0xff] }
 0x7b7   : > { %v7399_v33 = vpop.eup %7398  ;;  %v2076_v45 = vpop.xlane.xlu0 %2075  ;;  %6986 = vmatprep.subr.bf16.mxu0 %v6985_v32  ;;  %v3044_v25 = vld [vmem:[#allocation3 + $0x1e0] sm:$0xff] }
 0x7b8   : > { %7408 = vpow2.f32 %v2162_v4  ;;  %2366 = vmatprep.mubr.f32.mxu0 %v7399_v33  ;;  %v2110_v10 = vsub.f32 %v9300_v7, %v2076_v45  ;;  %v2111_v39 = vsub.f32 %v9302_v60, %v2076_v45  ;;  %v9397_v24 = vadd.f32 %v7399_v33, %v7397_v12  ;;  %6988 = vmatpush3.bf16.msra.mxu0 %v6987_v56  ;;  %v3019_v4 = vld [vmem:[#allocation3 + $0x118] sm:$0xff]  ;;  %v3036_v33 = vld [vmem:[#allocation3 + $0x1a0] sm:$0xff]  ;;  %v3037_v45 = vld [vmem:[#allocation3 + $0x1a8] sm:$0xff] }
 0x7b9   : > { %7410 = vpow2.f32 %v2164_v58  ;;  %2367 = vmatmul.mubr.f32.gmra.mrb[32].mxu0 %v7397_v12  ;;  %v6989_v12 = vpack.c.bf16 %v3035_v30, %v3034_v22  ;;  %v6991_v58 = vpack.c.bf16 %v3019_v4, %v3018_v34  ;;  %v3045_v56 = vld [vmem:[#allocation3 + $0x1e8] sm:$0xff]  ;;  %v3028_v4 = vld [vmem:[#allocation3 + $0x160] sm:$0xff] }
 0x7ba   : > { %v7401_v44 = vpop.eup %7400  ;;  %v2166_v17 = vmul.f32 1.442695, %v2110_v10  ;;  %v2168_v36 = vmul.f32 1.442695, %v2111_v39  ;;  %v3020_v10 = vld [vmem:[#allocation3 + $0x120] sm:$0xff]  ;;  %v6993_v39 = vpack.c.bf16 %v3037_v45, %v3036_v33  ;;  %v7009_v30 = vpack.c.bf16 %v3045_v56, %v3044_v25 }
 0x7bb   : > { %v7403_v43 = vpop.eup %7402  ;;  %v2079_v62 = vpop.xlane.xlu1 %2078  ;;  %6990 = vmatprep.subr.bf16.mxu0 %v6989_v12 }
 0x7bc   : > { %7412 = vpow2.f32 %v2166_v17  ;;  %2371 = vmatprep.mubr.f32.mxu0 %v7403_v43  ;;  %v2112_v6 = vsub.f32 %v9306_v29, %v2079_v62  ;;  %v2113_v0 = vsub.f32 %v9308_v38, %v2079_v62  ;;  %v9401_v9 = vadd.f32 %v7403_v43, %v7401_v44  ;;  %6992 = vmatpush3.bf16.msra.mxu0 %v6991_v58  ;;  %v3039_v43 = vld [vmem:[#allocation3 + $0x1b8] sm:$0xff]  ;;  %v3022_v62 = vld [vmem:[#allocation3 + $0x130] sm:$0xff]  ;;  %v3029_v58 = vld [vmem:[#allocation3 + $0x168] sm:$0xff] }
 0x7bd   : > { %7414 = vpow2.f32 %v2168_v36  ;;  %2372 = vmatmul.mubr.f32.gmra.mrb[34].mxu0 %v7401_v44  ;;  %v3021_v44 = vld [vmem:[#allocation3 + $0x128] sm:$0xff]  ;;  %6994 = vmatprep.subr.bf16.mxu0 %v6993_v39  ;;  %v3038_v36 = vld [vmem:[#allocation3 + $0x1b0] sm:$0xff]  ;;  %v7011_v45 = vpack.c.bf16 %v3029_v58, %v3028_v4 }
 0x7be   : > { %v7405_v7 = vpop.eup %7404  ;;  %v2170_v60 = vmul.f32 1.442695, %v2112_v6  ;;  %v2172_v52 = vmul.f32 1.442695, %v2113_v0  ;;  %v6995_v17 = vpack.c.bf16 %v3021_v44, %v3020_v10  ;;  %v6997_v6 = vpack.c.bf16 %v3039_v43, %v3038_v36  ;;  %v3023_v0 = vld [vmem:[#allocation3 + $0x138] sm:$0xff]  ;;  %v3046_v44 = vld [vmem:[#allocation3 + $0x1f0] sm:$0xff] }
 0x7bf   : > { %v7407_v14 = vpop.eup %7406  ;;  %v2082_v16 = vpop.xlane.xlu0 %2081 }
 0x7c0   : > { %7416 = vpow2.f32 %v2170_v60  ;;  %2376 = vmatprep.mubr.f32.mxu0 %v7407_v14  ;;  %v2114_v50 = vsub.f32 %v9312_v46, %v2082_v16  ;;  %v2115_v11 = vsub.f32 %v9314_v37, %v2082_v16  ;;  %v9405_v63 = vadd.f32 %v7407_v14, %v7405_v7  ;;  %6996 = vmatpush3.bf16.msra.mxu0 %v6995_v17  ;;  %v3040_v16 = vld [vmem:[#allocation3 + $0x1c0] sm:$0xff]  ;;  %v3047_v17 = vld [vmem:[#allocation3 + $0x1f8] sm:$0xff] }
 0x7c1   : > { %7418 = vpow2.f32 %v2172_v52  ;;  %2377 = vmatmul.mubr.f32.gmra.mrb[36].mxu0 %v7405_v7  ;;  %v6999_v7 = vpack.c.bf16 %v3023_v0, %v3022_v62  ;;  %6998 = vmatprep.subr.bf16.mxu0 %v6997_v6  ;;  %v7013_v43 = vpack.c.bf16 %v3047_v17, %v3046_v44  ;;  %v3030_v6 = vld [vmem:[#allocation3 + $0x170] sm:$0xff]  ;;  %v3031_v0 = vld [vmem:[#allocation3 + $0x178] sm:$0xff] }
 0x7c2   : > { %v7409_v29 = vpop.eup %7408  ;;  %v2174_v38 = vmul.f32 1.442695, %v2114_v50  ;;  %v2176_v47 = vmul.f32 1.442695, %v2115_v11  ;;  %v3041_v50 = vld [vmem:[#allocation3 + $0x1c8] sm:$0xff]  ;;  %v3024_v11 = vld [vmem:[#allocation3 + $0x140] sm:$0xff] }
 0x7c3   : > { %v7411_v8 = vpop.eup %7410  ;;  %v2085_v59 = vpop.xlane.xlu1 %2084 }
 0x7c4   : > { %7420 = vpow2.f32 %v2174_v38  ;;  %2381 = vmatprep.mubr.f32.mxu0 %v7411_v8  ;;  %v2116_v40 = vsub.f32 %v9318_v49, %v2085_v59  ;;  %v2117_v51 = vsub.f32 %v9320_v53, %v2085_v59  ;;  %v9409_v20 = vadd.f32 %v7411_v8, %v7409_v29  ;;  %7000 = vmatpush3.bf16.msra.mxu0 %v6999_v7 }
 0x7c5   : > { %7422 = vpow2.f32 %v2176_v47  ;;  %2382 = vmatmul.mubr.f32.gmra.mrb[38].mxu0 %v7409_v29  ;;  %v7001_v38 = vpack.c.bf16 %v3041_v50, %v3040_v16  ;;  %v3025_v47 = vld [vmem:[#allocation3 + $0x148] sm:$0xff] }
 0x7c6   : > { %v7413_v46 = vpop.eup %7412  ;;  %v2178_v37 = vmul.f32 1.442695, %v2116_v40  ;;  %v2180_v15 = vmul.f32 1.442695, %v2117_v51  ;;  %v7003_v59 = vpack.c.bf16 %v3025_v47, %v3024_v11  ;;  %v5850_v47 = vld [vmem:[%s10374_s1 + $0x108] sm:$0xff] }
 0x7c7   : > { %v7415_v3 = vpop.eup %7414  ;;  %7002 = vmatprep.subr.bf16.mxu0 %v7001_v38  ;;  %v5849_v38 = vld [vmem:[%s10374_s1 + $0x100] sm:$0xff] }
 0x7c8   : > { %7424 = vpow2.f32 %v2178_v37  ;;  %2386 = vmatprep.mubr.f32.mxu0 %v7415_v3  ;;  %v9411_v41 = vadd.f32 %v7415_v3, %v7413_v46  ;;  %7004 = vmatpush3.bf16.msra.mxu0 %v7003_v59  ;;  %v3043_v3 = vld [vmem:[#allocation3 + $0x1d8] sm:$0xff] }
 0x7c9   : > { %7426 = vpow2.f32 %v2180_v15  ;;  %2387 = vmatmul.mubr.f32.gmra.mrb[40].mxu0 %v7413_v46  ;;  %v3042_v15 = vld [vmem:[#allocation3 + $0x1d0] sm:$0xff] }
 0x7ca   : > { %v7417_v54 = vpop.eup %7416 }
 0x7cb   : > { %v7419_v55 = vpop.eup %7418 }
 0x7cc   : > { %2391 = vmatprep.mubr.f32.mxu0 %v7419_v55  ;;  %v9413_v49 = vadd.f32 %v7419_v55, %v7417_v54 }
 0x7cd   : > { %2392 = vmatmul.mubr.f32.gmra.mrb[42].mxu0 %v7417_v54  ;;  %v3026_v54 = vld [vmem:[#allocation3 + $0x150] sm:$0xff] }
 0x7ce   : > { %10571 = vst [vmem:[#allocation82_spill] sm:$0xff] %v9413_v49  ;;  %v7421_v53 = vpop.eup %7420 }
 0x7cf   : > { %v7423_v31 = vpop.eup %7422 }
 0x7d0   : > { %2396 = vmatprep.mubr.f32.mxu0 %v7423_v31  ;;  %v9415_v23 = vadd.f32 %v7423_v31, %v7421_v53  ;;  %v3027_v31 = vld [vmem:[#allocation3 + $0x158] sm:$0xff] }
 0x7d1   : > { %2397 = vmatmul.mubr.f32.gmra.mrb[44].mxu0 %v7421_v53  ;;  %v7005_v53 = vpack.c.bf16 %v3043_v3, %v3042_v15 }
 0x7d2   : > { %v7425_v57 = vpop.eup %7424 }
 0x7d3   : > { %v7427_v61 = vpop.eup %7426  ;;  %7006 = vmatprep.subr.bf16.mxu0 %v7005_v53 }
 0x7d4   : > { %2401 = vmatprep.mubr.f32.mxu0 %v7427_v61  ;;  %v9417_v1 = vadd.f32 %v7427_v61, %v7425_v57  ;;  %v7007_v61 = vpack.c.bf16 %v3027_v31, %v3026_v54 }
 0x7d5   : > { %2402 = vmatmul.mubr.f32.gmra.mrb[46].mxu0 %v7425_v57 }
 0x7d6   : > { %10572 = vst [vmem:[#allocation83_spill] sm:$0xff] %v9417_v1  ;;  %7008 = vmatpush3.bf16.msra.mxu0 %v7007_v61 }
 0x7d7   : > { %7010 = vmatprep.subr.bf16.mxu0 %v7009_v30 }
 0x7da   : > { %7012 = vmatpush3.bf16.msra.mxu0 %v7011_v45 }
 0x7db   : > { %7014 = vmatprep.subr.bf16.mxu0 %v7013_v43 }
 0x80b   : > { %v9419_v60 = vpop.f32.mrb[48].mxu1 }
 0x80c   : > { %v9421_v52 = vpop.f32.mrb[49].mxu1 }
 0x80d   : > { %v2823_v14 = vmax.f32 %v9419_v60, %v9421_v52 }
 0x80f   : > { %2824 = vmax.xlane.f32.xlu0 %v2823_v14  ;;  %v9425_v29 = vpop.f32.mrb[50].mxu1  ;;  %v7015_v14 = vpack.c.bf16 %v3031_v0, %v3030_v6 }
 0x810   : > { %v9427_v8 = vpop.f32.mrb[51].mxu1 }
 0x811   : > { %v2826_v40 = vmax.f32 %v9425_v29, %v9427_v8  ;;  %7016 = vmatpush3.bf16.msra.mxu0 %v7015_v14 }
 0x813   : > { %v9431_v51 = vpop.f32.mrb[52].mxu1  ;;  %2827 = vmax.xlane.f32.xlu1 %v2826_v40  ;;  %v9481_v40 = vpack.c.bf16 %v5850_v47, %v5849_v38 }
 0x814   : > { %v9433_v46 = vpop.f32.mrb[53].mxu1 }
 0x815   : > { %v2829_v37 = vmax.f32 %v9431_v51, %v9433_v46  ;;  %7034 = vmatprep.subr.bf16.mxu0 %v9481_v40 }
 0x817   : > { %2830 = vmax.xlane.f32.xlu0 %v2829_v37  ;;  %v9437_v55 = vpop.f32.mrb[54].mxu1 }
 0x818   : > { %v9439_v57 = vpop.f32.mrb[55].mxu1 }
 0x819   : > { %v2832_v5 = vmax.f32 %v9437_v55, %v9439_v57 }
 0x81b   : > { %v9443_v18 = vpop.f32.mrb[56].mxu1  ;;  %2833 = vmax.xlane.f32.xlu1 %v2832_v5 }
 0x81c   : > { %v9445_v48 = vpop.f32.mrb[57].mxu1 }
 0x81d   : > { %v2835_v32 = vmax.f32 %v9443_v18, %v9445_v48 }
 0x81f   : > { %2836 = vmax.xlane.f32.xlu0 %v2835_v32  ;;  %v9449_v22 = vpop.f32.mrb[58].mxu1 }
 0x820   : > { %v9451_v34 = vpop.f32.mrb[59].mxu1 }
 0x821   : > { %v2838_v12 = vmax.f32 %v9449_v22, %v9451_v34 }
 0x823   : > { %v9455_v33 = vpop.f32.mrb[60].mxu1  ;;  %2839 = vmax.xlane.f32.xlu1 %v2838_v12 }
 0x824   : > { %v9457_v10 = vpop.f32.mrb[61].mxu1 }
 0x825   : > { %v2841_v39 = vmax.f32 %v9455_v33, %v9457_v10 }
 0x827   : > { %2842 = vmax.xlane.f32.xlu0 %v2841_v39  ;;  %v9461_v36 = vpop.f32.mrb[62].mxu1 }
 0x828   : > { %v9463_v62 = vpop.f32.mrb[63].mxu1 }
 0x829   : > { %v2844_v7 = vmax.f32 %v9461_v36, %v9463_v62 }
 0x82b   : > { %v9467_v16 = vpop.f32.mrb[64].mxu1  ;;  %2845 = vmax.xlane.f32.xlu1 %v2844_v7 }
 0x82c   : > { %v9469_v50 = vpop.f32.mrb[65].mxu1 }
 0x82d   : > { %v2847_v11 = vmax.f32 %v9467_v16, %v9469_v50 }
 0x82f   : > { %2848 = vmax.xlane.f32.xlu0 %v2847_v11  ;;  %v9479_v59 = vpop.f32.mrb[66].mxu1 }
 0x830   : > { %v9483_v37 = vpop.f32.mrb[67].mxu1 }
 0x831   : > { %v2850_v15 = vmax.f32 %v9479_v59, %v9483_v37 }
 0x833   : > { %v9488_v3 = vpop.f32.mrb[68].mxu1  ;;  %2851 = vmax.xlane.f32.xlu1 %v2850_v15 }
 0x834   : > { %v9490_v54 = vpop.f32.mrb[69].mxu1 }
 0x835   : > { %v2853_v53 = vmax.f32 %v9488_v3, %v9490_v54 }
 0x837   : > { %2854 = vmax.xlane.f32.xlu0 %v2853_v53  ;;  %v9494_v31 = vpop.f32.mrb[70].mxu1 }
 0x838   : > { %v9496_v61 = vpop.f32.mrb[71].mxu1 }
 0x839   : > { %v2856_v5 = vmax.f32 %v9494_v31, %v9496_v61 }
 0x83b   : > { %v9500_v32 = vpop.f32.mrb[72].mxu1  ;;  %2857 = vmax.xlane.f32.xlu1 %v2856_v5 }
 0x83c   : > { %v9502_v25 = vpop.f32.mrb[73].mxu1 }
 0x83d   : > { %v2859_v56 = vmax.f32 %v9500_v32, %v9502_v25 }
 0x83f   : > { %2860 = vmax.xlane.f32.xlu0 %v2859_v56  ;;  %v9506_v30 = vpop.f32.mrb[74].mxu1 }
 0x840   : > { %v9508_v12 = vpop.f32.mrb[75].mxu1 }
 0x841   : > { %v2862_v4 = vmax.f32 %v9506_v30, %v9508_v12 }
 0x843   : > { %v9512_v58 = vpop.f32.mrb[76].mxu1  ;;  %2863 = vmax.xlane.f32.xlu1 %v2862_v4 }
 0x844   : > { %v9514_v45 = vpop.f32.mrb[77].mxu1 }
 0x845   : > { %v2865_v39 = vmax.f32 %v9512_v58, %v9514_v45 }
 0x847   : > { %2866 = vmax.xlane.f32.xlu0 %v2865_v39  ;;  %v9518_v44 = vpop.f32.mrb[78].mxu1 }
 0x848   : > { %v9520_v17 = vpop.f32.mrb[79].mxu1 }
 0x849   : > { %v2868_v43 = vmax.f32 %v9518_v44, %v9520_v17 }
 0x84b   : > { %2869 = vmax.xlane.f32.xlu1 %v2868_v43 }
 0x86c   : > { %v6025_v6 = vpop.f32.mrb[16].mxu0 }
 0x86d   : > { %v6026_v0 = vpop.f32.mrb[17].mxu0 }
 0x86e   : > { %v9524_v7 = vadd.f32 %v6026_v0, %v6025_v6 }
 0x870   : > { %10573 = vst [vmem:[#allocation84_spill] sm:$0xff] %v9524_v7  ;;  %v6028_v14 = vpop.f32.mrb[18].mxu0 }
 0x871   : > { %v6029_v11 = vpop.f32.mrb[19].mxu0 }
 0x872   : > { %v9526_v38 = vadd.f32 %v6029_v11, %v6028_v14 }
 0x874   : > { %10574 = vst [vmem:[#allocation85_spill] sm:$0xff] %v9526_v38  ;;  %v6031_v47 = vpop.f32.mrb[20].mxu0 }
 0x875   : > { %v6032_v15 = vpop.f32.mrb[21].mxu0 }
 0x876   : > { %v9528_v53 = vadd.f32 %v6032_v15, %v6031_v47 }
 0x878   : > { %10575 = vst [vmem:[#allocation86_spill] sm:$0xff] %v9528_v53  ;;  %v6034_v5 = vpop.f32.mrb[22].mxu0 }
 0x879   : > { %v6035_v56 = vpop.f32.mrb[23].mxu0 }
 0x87a   : > { %v9530_v4 = vadd.f32 %v6035_v56, %v6034_v5 }
 0x87c   : > { %10576 = vst [vmem:[#allocation87_spill] sm:$0xff] %v9530_v4  ;;  %v6037_v39 = vpop.f32.mrb[24].mxu0 }
 0x87d   : > { %v6038_v35 = vpop.f32.mrb[25].mxu0 }
 0x87e   : > { %v9532_v1 = vadd.f32 %v6038_v35, %v6037_v39 }
 0x880   : > { %10577 = vst [vmem:[#allocation88_spill] sm:$0xff] %v9532_v1  ;;  %v6040_v43 = vpop.f32.mrb[26].mxu0 }
 0x881   : > { %v6041_v49 = vpop.f32.mrb[27].mxu0 }
 0x882   : > { %v9534_v6 = vadd.f32 %v6041_v49, %v6040_v43 }
 0x884   : > { %10578 = vst [vmem:[#allocation89_spill] sm:$0xff] %v9534_v6  ;;  %v6043_v0 = vpop.f32.mrb[28].mxu0 }
 0x885   : > { %v6044_v7 = vpop.f32.mrb[29].mxu0 }
 0x886   : > { %v9536_v14 = vadd.f32 %v6044_v7, %v6043_v0 }
 0x888   : > { %10579 = vst [vmem:[#allocation90_spill] sm:$0xff] %v9536_v14  ;;  %v6046_v11 = vpop.f32.mrb[30].mxu0 }
 0x889   : > { %v6047_v38 = vpop.f32.mrb[31].mxu0 }
 0x88a   : > { %v9538_v47 = vadd.f32 %v6047_v38, %v6046_v11 }
 0x88c   : > { %10580 = vst [vmem:[#allocation91_spill] sm:$0xff] %v9538_v47  ;;  %v6049_v15 = vpop.f32.mrb[32].mxu0 }
 0x88d   : > { %v6050_v53 = vpop.f32.mrb[33].mxu0 }
 0x88e   : > { %v9540_v5 = vadd.f32 %v6050_v53, %v6049_v15 }
 0x890   : > { %10581 = vst [vmem:[#allocation92_spill] sm:$0xff] %v9540_v5  ;;  %v6052_v56 = vpop.f32.mrb[34].mxu0 }
 0x891   : > { %v6053_v4 = vpop.f32.mrb[35].mxu0 }
 0x892   : > { %v9542_v35 = vadd.f32 %v6053_v4, %v6052_v56 }
 0x894   : > { %10582 = vst [vmem:[#allocation93_spill] sm:$0xff] %v9542_v35  ;;  %v6055_v39 = vpop.f32.mrb[36].mxu0 }
 0x895   : > { %v6056_v1 = vpop.f32.mrb[37].mxu0 }
 0x896   : > { %v9544_v49 = vadd.f32 %v6056_v1, %v6055_v39 }
 0x898   : > { %10583 = vst [vmem:[#allocation94_spill] sm:$0xff] %v9544_v49  ;;  %v6058_v43 = vpop.f32.mrb[38].mxu0 }
 0x899   : > { %v6059_v6 = vpop.f32.mrb[39].mxu0 }
 0x89a   : > { %v9546_v7 = vadd.f32 %v6059_v6, %v6058_v43 }
 0x89c   : > { %10584 = vst [vmem:[#allocation95_spill] sm:$0xff] %v9546_v7  ;;  %v6061_v0 = vpop.f32.mrb[40].mxu0  ;;  %v2825_v14 = vpop.xlane.xlu0 %2824 }
 0x89d   : > { %v6062_v38 = vpop.f32.mrb[41].mxu0  ;;  %v2871_v11 = vsub.f32 %v9419_v60, %v2825_v14  ;;  %v2872_v53 = vsub.f32 %v9421_v52, %v2825_v14 }
 0x89e   : > { %v9550_v15 = vadd.f32 %v6062_v38, %v6061_v0 }
 0x89f   : > { %v2903_v5 = vmul.f32 1.442695, %v2871_v11  ;;  %v2905_v4 = vmul.f32 1.442695, %v2872_v53 }
 0x8a0   : > { %v6064_v56 = vpop.f32.mrb[42].mxu0  ;;  %v2828_v35 = vpop.xlane.xlu1 %2827 }
 0x8a1   : > { %7428 = vpow2.f32 %v2903_v5  ;;  %v6065_v1 = vpop.f32.mrb[43].mxu0  ;;  %v2873_v39 = vsub.f32 %v9425_v29, %v2828_v35  ;;  %v2874_v6 = vsub.f32 %v9427_v8, %v2828_v35 }
 0x8a2   : > { %7430 = vpow2.f32 %v2905_v4  ;;  %v9554_v43 = vadd.f32 %v6065_v1, %v6064_v56 }
 0x8a3   : > { %v2907_v7 = vmul.f32 1.442695, %v2873_v39  ;;  %v2909_v49 = vmul.f32 1.442695, %v2874_v6 }
 0x8a4   : > { %v6067_v60 = vpop.f32.mrb[44].mxu0  ;;  %v2831_v47 = vpop.xlane.xlu0 %2830 }
 0x8a5   : > { %7432 = vpow2.f32 %v2907_v7  ;;  %v6068_v52 = vpop.f32.mrb[45].mxu0  ;;  %v2875_v14 = vsub.f32 %v9431_v51, %v2831_v47  ;;  %v2876_v0 = vsub.f32 %v9433_v46, %v2831_v47  ;;  %v5851_v7 = vld [vmem:[%s10374_s1 + $0x110] sm:$0xff]  ;;  %v5852_v51 = vld [vmem:[%s10374_s1 + $0x118] sm:$0xff] }
 0x8a6   : > { %7434 = vpow2.f32 %v2909_v49  ;;  %v9558_v5 = vadd.f32 %v6068_v52, %v6067_v60  ;;  %v7037_v6 = vpack.c.bf16 %v5852_v51, %v5851_v7  ;;  %v5853_v52 = vld [vmem:[%s10374_s1 + $0x120] sm:$0xff] }
 0x8a7   : > { %v2911_v38 = vmul.f32 1.442695, %v2875_v14  ;;  %v2913_v29 = vmul.f32 1.442695, %v2876_v0  ;;  %v5854_v14 = vld [vmem:[%s10374_s1 + $0x128] sm:$0xff] }
 0x8a8   : > { %v6070_v11 = vpop.f32.mrb[46].mxu0  ;;  %v2834_v8 = vpop.xlane.xlu1 %2833 }
 0x8a9   : > { %7436 = vpow2.f32 %v2911_v38  ;;  %v6071_v35 = vpop.f32.mrb[47].mxu0  ;;  %v2877_v53 = vsub.f32 %v9437_v55, %v2834_v8  ;;  %v2878_v4 = vsub.f32 %v9439_v57, %v2834_v8 }
 0x8aa   : > { %7438 = vpow2.f32 %v2913_v29  ;;  %v9568_v46 = vadd.f32 %v6071_v35, %v6070_v11  ;;  %v7041_v11 = vpack.c.bf16 %v5854_v14, %v5853_v52 }
 0x8ab   : > { %v7429_v47 = vpop.eup %7428  ;;  %v2915_v49 = vmul.f32 1.442695, %v2877_v53  ;;  %v2917_v56 = vmul.f32 1.442695, %v2878_v4  ;;  %v5855_v4 = vld [vmem:[%s10374_s1 + $0x130] sm:$0xff] }
 0x8ac   : > { %v7431_v1 = vpop.eup %7430  ;;  %v2837_v39 = vpop.xlane.xlu0 %2836 }
 0x8ad   : > { %7440 = vpow2.f32 %v2915_v49  ;;  %v2879_v55 = vsub.f32 %v9443_v18, %v2837_v39  ;;  %v2880_v57 = vsub.f32 %v9445_v48, %v2837_v39  ;;  %3112 = vmatprep.mubr.f32.mxu0 %v7431_v1  ;;  %v2967_v60 = vadd.f32 %v7431_v1, %v7429_v47 }
 0x8ae   : > { %7442 = vpow2.f32 %v2917_v56  ;;  %3113 = vmatmul.mubr.f32.vlgmr.msra.gmra.mrb[48].mxu0 %v7429_v47 }
 0x8af   : > { %v7433_v0 = vpop.eup %7432  ;;  %v2919_v38 = vmul.f32 1.442695, %v2879_v55  ;;  %v2921_v29 = vmul.f32 1.442695, %v2880_v57  ;;  %7036 = vmatpush3.bf16.msra.mxu0 %v9481_v40  ;;  %2968 = vadd.xlane.f32.xlu0 %v2967_v60  ;;  %v5856_v40 = vld [vmem:[%s10374_s1 + $0x138] sm:$0xff]  ;;  %v5857_v55 = vld [vmem:[%s10374_s1 + $0x140] sm:$0xff] }
 0x8b0   : > { %v7435_v18 = vpop.eup %7434  ;;  %v2840_v48 = vpop.xlane.xlu1 %2839  ;;  %7038 = vmatprep.subr.bf16.mxu0 %v7037_v6  ;;  %v5858_v57 = vld [vmem:[%s10374_s1 + $0x148] sm:$0xff] }
 0x8b1   : > { %7444 = vpow2.f32 %v2919_v38  ;;  %3117 = vmatprep.mubr.f32.mxu0 %v7435_v18  ;;  %v2881_v8 = vsub.f32 %v9449_v22, %v2840_v48  ;;  %v2882_v35 = vsub.f32 %v9451_v34, %v2840_v48  ;;  %v2970_v53 = vadd.f32 %v7435_v18, %v7433_v0  ;;  %v5859_v18 = vld [vmem:[%s10374_s1 + $0x150] sm:$0xff]  ;;  %v5860_v48 = vld [vmem:[%s10374_s1 + $0x158] sm:$0xff] }
 0x8b2   : > { %7446 = vpow2.f32 %v2921_v29  ;;  %3118 = vmatmul.mubr.f32.gmra.mrb[50].mxu0 %v7433_v0  ;;  %v7045_v34 = vpack.c.bf16 %v5856_v40, %v5855_v4 }
 0x8b3   : > { %v7437_v7 = vpop.eup %7436  ;;  %v2923_v51 = vmul.f32 1.442695, %v2881_v8  ;;  %v2925_v47 = vmul.f32 1.442695, %v2882_v35  ;;  %2971 = vadd.xlane.f32.xlu1 %v2970_v53  ;;  %7040 = vmatpush3.bf16.msra.mxu0 %v7037_v6 }
 0x8b4   : > { %v7439_v49 = vpop.eup %7438  ;;  %v2843_v22 = vpop.xlane.xlu0 %2842  ;;  %7042 = vmatprep.subr.bf16.mxu0 %v7041_v11 }
 0x8b5   : > { %7448 = vpow2.f32 %v2923_v51  ;;  %v2883_v56 = vsub.f32 %v9455_v33, %v2843_v22  ;;  %v2884_v1 = vsub.f32 %v9457_v10, %v2843_v22  ;;  %3122 = vmatprep.mubr.f32.mxu0 %v7439_v49  ;;  %v2973_v39 = vadd.f32 %v7439_v49, %v7437_v7  ;;  %v5861_v51 = vld [vmem:[%s10374_s1 + $0x160] sm:$0xff] }
 0x8b6   : > { %7450 = vpow2.f32 %v2925_v47  ;;  %3123 = vmatmul.mubr.f32.gmra.mrb[52].mxu0 %v7437_v7  ;;  %v7049_v10 = vpack.c.bf16 %v5858_v57, %v5857_v55  ;;  %v5862_v47 = vld [vmem:[%s10374_s1 + $0x168] sm:$0xff]  ;;  %v5863_v57 = vld [vmem:[%s10374_s1 + $0x170] sm:$0xff] }
 0x8b7   : > { %v7441_v6 = vpop.eup %7440  ;;  %v2927_v60 = vmul.f32 1.442695, %v2883_v56  ;;  %v2929_v52 = vmul.f32 1.442695, %v2884_v1  ;;  %2974 = vadd.xlane.f32.xlu0 %v2973_v39  ;;  %7044 = vmatpush3.bf16.msra.mxu0 %v7041_v11 }
 0x8b8   : > { %v7443_v33 = vpop.eup %7442  ;;  %v2846_v14 = vpop.xlane.xlu1 %2845  ;;  %7046 = vmatprep.subr.bf16.mxu0 %v7045_v34 }
 0x8b9   : > { %7452 = vpow2.f32 %v2927_v60  ;;  %3127 = vmatprep.mubr.f32.mxu0 %v7443_v33  ;;  %v2885_v0 = vsub.f32 %v9461_v36, %v2846_v14  ;;  %v2886_v38 = vsub.f32 %v9463_v62, %v2846_v14  ;;  %v2976_v29 = vadd.f32 %v7443_v33, %v7441_v6 }
 0x8ba   : > { %7454 = vpow2.f32 %v2929_v52  ;;  %3128 = vmatmul.mubr.f32.gmra.mrb[54].mxu0 %v7441_v6  ;;  %v7053_v62 = vpack.c.bf16 %v5860_v48, %v5859_v18  ;;  %v5864_v6 = vld [vmem:[%s10374_s1 + $0x178] sm:$0xff] }
 0x8bb   : > { %v7445_v11 = vpop.eup %7444  ;;  %v2931_v8 = vmul.f32 1.442695, %v2885_v0  ;;  %v2933_v35 = vmul.f32 1.442695, %v2886_v38  ;;  %2977 = vadd.xlane.f32.xlu1 %v2976_v29  ;;  %7048 = vmatpush3.bf16.msra.mxu0 %v7045_v34 }
 0x8bc   : > { %v7447_v53 = vpop.eup %7446  ;;  %v2849_v36 = vpop.xlane.xlu0 %2848  ;;  %7050 = vmatprep.subr.bf16.mxu0 %v7049_v10 }
 0x8bd   : > { %7456 = vpow2.f32 %v2931_v8  ;;  %v2887_v4 = vsub.f32 %v9467_v16, %v2849_v36  ;;  %v2888_v40 = vsub.f32 %v9469_v50, %v2849_v36  ;;  %3132 = vmatprep.mubr.f32.mxu0 %v7447_v53  ;;  %v2979_v7 = vadd.f32 %v7447_v53, %v7445_v11 }
 0x8be   : > { %7458 = vpow2.f32 %v2933_v35  ;;  %3133 = vmatmul.mubr.f32.gmra.mrb[56].mxu0 %v7445_v11  ;;  %v7057_v50 = vpack.c.bf16 %v5862_v47, %v5861_v51 }
 0x8bf   : > { %v7449_v49 = vpop.eup %7448  ;;  %v2935_v22 = vmul.f32 1.442695, %v2887_v4  ;;  %v2937_v34 = vmul.f32 1.442695, %v2888_v40  ;;  %2980 = vadd.xlane.f32.xlu0 %v2979_v7  ;;  %7052 = vmatpush3.bf16.msra.mxu0 %v7049_v10 }
 0x8c0   : > { %v7451_v16 = vpop.eup %7450  ;;  %v2852_v56 = vpop.xlane.xlu1 %2851  ;;  %7054 = vmatprep.subr.bf16.mxu0 %v7053_v62 }
 0x8c1   : > { %7460 = vpow2.f32 %v2935_v22  ;;  %3137 = vmatprep.mubr.f32.mxu0 %v7451_v16  ;;  %v2889_v1 = vsub.f32 %v9479_v59, %v2852_v56  ;;  %v2890_v39 = vsub.f32 %v9483_v37, %v2852_v56  ;;  %v2982_v55 = vadd.f32 %v7451_v16, %v7449_v49 }
 0x8c2   : > { %7462 = vpow2.f32 %v2937_v34  ;;  %3138 = vmatmul.mubr.f32.gmra.mrb[58].mxu0 %v7449_v49  ;;  %v7061_v37 = vpack.c.bf16 %v5864_v6, %v5863_v57 }
 0x8c3   : > { %v7453_v60 = vpop.eup %7452  ;;  %v2939_v52 = vmul.f32 1.442695, %v2889_v1  ;;  %v2941_v33 = vmul.f32 1.442695, %v2890_v39  ;;  %2983 = vadd.xlane.f32.xlu1 %v2982_v55  ;;  %7056 = vmatpush3.bf16.msra.mxu0 %v7053_v62 }
 0x8c4   : > { %v7455_v14 = vpop.eup %7454  ;;  %v2855_v59 = vpop.xlane.xlu0 %2854  ;;  %7058 = vmatprep.subr.bf16.mxu0 %v7057_v50 }
 0x8c5   : > { %7464 = vpow2.f32 %v2939_v52  ;;  %v2891_v10 = vsub.f32 %v9488_v3, %v2855_v59  ;;  %v2892_v0 = vsub.f32 %v9490_v54, %v2855_v59  ;;  %3142 = vmatprep.mubr.f32.mxu0 %v7455_v14  ;;  %v2985_v38 = vadd.f32 %v7455_v14, %v7453_v60 }
 0x8c6   : > { %7466 = vpow2.f32 %v2941_v33  ;;  %3143 = vmatmul.mubr.f32.gmra.mrb[60].mxu0 %v7453_v60 }
 0x8c7   : > { %v7457_v29 = vpop.eup %7456  ;;  %v2943_v18 = vmul.f32 1.442695, %v2891_v10  ;;  %v2945_v48 = vmul.f32 1.442695, %v2892_v0  ;;  %2986 = vadd.xlane.f32.xlu0 %v2985_v38  ;;  %7060 = vmatpush3.bf16.msra.mxu0 %v7057_v50 }
 0x8c8   : > { %v7459_v11 = vpop.eup %7458  ;;  %v2858_v8 = vpop.xlane.xlu1 %2857  ;;  %7062 = vmatprep.subr.bf16.mxu0 %v7061_v37 }
 0x8c9   : > { %7468 = vpow2.f32 %v2943_v18  ;;  %3147 = vmatprep.mubr.f32.mxu0 %v7459_v11  ;;  %v2893_v35 = vsub.f32 %v9494_v31, %v2858_v8  ;;  %v2894_v3 = vsub.f32 %v9496_v61, %v2858_v8  ;;  %v2988_v53 = vadd.f32 %v7459_v11, %v7457_v29 }
 0x8ca   : > { %7470 = vpow2.f32 %v2945_v48  ;;  %3148 = vmatmul.mubr.f32.gmra.mrb[62].mxu0 %v7457_v29 }
 0x8cb   : > { %v7461_v54 = vpop.eup %7460  ;;  %v2947_v36 = vmul.f32 1.442695, %v2893_v35  ;;  %v2949_v62 = vmul.f32 1.442695, %v2894_v3  ;;  %2989 = vadd.xlane.f32.xlu1 %v2988_v53  ;;  %7064 = vmatpush3.bf16.msra.mxu0 %v7061_v37 }
 0x8cc   : > { %v7463_v4 = vpop.eup %7462  ;;  %v2861_v40 = vpop.xlane.xlu0 %2860 }
 0x8cd   : > { %7472 = vpow2.f32 %v2947_v36  ;;  %v2895_v7 = vsub.f32 %v9500_v32, %v2861_v40  ;;  %v2896_v51 = vsub.f32 %v9502_v25, %v2861_v40  ;;  %3152 = vmatprep.mubr.f32.mxu0 %v7463_v4  ;;  %v2991_v47 = vadd.f32 %v7463_v4, %v7461_v54  ;;  %v9637_v36 = vld [vmem:[%s9035_s30 + $0x8] sm:$0xff]  ;;  %v9653_v4 = vld [vmem:[%s9035_s30 + $0x20] sm:$0xff]  ;;  %v9693_v40 = vld [vmem:[%s9035_s30 + $0x58] sm:$0xff] }
 0x8ce   : > { %7474 = vpow2.f32 %v2949_v62  ;;  %3153 = vmatmul.mubr.f32.gmra.mrb[64].mxu0 %v7461_v54  ;;  %v9633_v54 = vld [vmem:[%s9035_s30] sm:$0xff]  ;;  %v9643_v62 = vld [vmem:[%s9035_s30 + $0x10] sm:$0xff] }
 0x8cf   : > { %v7465_v31 = vpop.eup %7464  ;;  %v2951_v61 = vmul.f32 1.442695, %v2895_v7  ;;  %v2953_v49 = vmul.f32 1.442695, %v2896_v51  ;;  %2992 = vadd.xlane.f32.xlu0 %v2991_v47  ;;  %v5815_v7 = vld [vmem:[%s10376_s3 + $0x30] sm:$0xff]  ;;  %v5816_v51 = vld [vmem:[%s10376_s3 + $0x38] sm:$0xff] }
 0x8d0   : > { %v7467_v22 = vpop.eup %7466  ;;  %v2864_v34 = vpop.xlane.xlu1 %2863  ;;  %v9709_v47 = vld [vmem:[%s9035_s30 + $0x68] sm:$0xff] }
 0x8d1   : > { %7476 = vpow2.f32 %v2951_v61  ;;  %3157 = vmatprep.mubr.f32.mxu0 %v7467_v22  ;;  %v2897_v16 = vsub.f32 %v9506_v30, %v2864_v34  ;;  %v2898_v56 = vsub.f32 %v9508_v12, %v2864_v34  ;;  %v2994_v50 = vadd.f32 %v7467_v22, %v7465_v31  ;;  %v9719_v61 = vld [vmem:[%s9035_s30 + $0x78] sm:$0xff]  ;;  %v3780_v34 = vld [vmem:[#allocation2 + $0x88] sm:$0xff] }
 0x8d2   : > { %7478 = vpow2.f32 %v2953_v49  ;;  %3158 = vmatmul.mubr.f32.gmra.mrb[66].mxu0 %v7465_v31  ;;  %v9715_v31 = vld [vmem:[%s9035_s30 + $0x70] sm:$0xff]  ;;  %v10586_v49 = vld [vmem:[#allocation83_spill] sm:$0xff]  ;;  %v10587_v22 = vmov 0.0  }
 0x8d3   : > { %v7469_v32 = vpop.eup %7468  ;;  %v2955_v25 = vmul.f32 1.442695, %v2897_v16  ;;  %v2957_v1 = vmul.f32 1.442695, %v2898_v56  ;;  %2995 = vadd.xlane.f32.xlu1 %v2994_v50  ;;  %v3782_v16 = vld [vmem:[#allocation2 + $0x98] sm:$0xff]  ;;  %v3779_v56 = vld [vmem:[#allocation2 + $0x80] sm:$0xff] }
 0x8d4   : > { %v7471_v39 = vpop.eup %7470  ;;  %v2867_v55 = vpop.xlane.xlu0 %2866  ;;  %v3781_v50 = vld [vmem:[#allocation2 + $0x90] sm:$0xff] }
 0x8d5   : > { %7480 = vpow2.f32 %v2955_v25  ;;  %v2899_v57 = vsub.f32 %v9512_v58, %v2867_v55  ;;  %v2900_v6 = vsub.f32 %v9514_v45, %v2867_v55  ;;  %3162 = vmatprep.mubr.f32.mxu0 %v7471_v39  ;;  %v2997_v60 = vadd.f32 %v7471_v39, %v7469_v32  ;;  %v3784_v25 = vld [vmem:[#allocation2 + $0xa8] sm:$0xff]  ;;  %v3783_v39 = vld [vmem:[#allocation2 + $0xa0] sm:$0xff] }
 0x8d6   : > { %7482 = vpow2.f32 %v2957_v1  ;;  %3163 = vmatmul.mubr.f32.gmra.mrb[68].mxu0 %v7469_v32  ;;  %v7067_v32 = vpack.c.bf16 %v3781_v50, %v3779_v56  ;;  %v3786_v1 = vld [vmem:[#allocation2 + $0xb8] sm:$0xff] }
 0x8d7   : > { %v7473_v30 = vpop.eup %7472  ;;  %v2959_v12 = vmul.f32 1.442695, %v2899_v57  ;;  %v2961_v52 = vmul.f32 1.442695, %v2900_v6  ;;  %2998 = vadd.xlane.f32.xlu0 %v2997_v60  ;;  %v7069_v55 = vpack.c.bf16 %v3786_v1, %v3784_v25  ;;  %v3785_v57 = vld [vmem:[#allocation2 + $0xb0] sm:$0xff]  ;;  %v2439_v60 = vld [vmem:[%s10376_s3] sm:$0xff] }
 0x8d8   : > { %v7475_v33 = vpop.eup %7474  ;;  %v2870_v14 = vpop.xlane.xlu1 %2869  ;;  %v7071_v6 = vpack.c.bf16 %v3785_v57, %v3783_v39 }
 0x8d9   : > { %7484 = vpow2.f32 %v2959_v12  ;;  %3167 = vmatprep.mubr.f32.mxu0 %v7475_v33  ;;  %v2901_v59 = vsub.f32 %v9518_v44, %v2870_v14  ;;  %v2902_v37 = vsub.f32 %v9520_v17, %v2870_v14  ;;  %v3000_v10 = vadd.f32 %v7475_v33, %v7473_v30  ;;  %v5902_v33 = vld [vmem:[%s10374_s1 + $0x188] sm:$0xff] }
 0x8da   : > { %7486 = vpow2.f32 %v2961_v52  ;;  %3168 = vmatmul.mubr.f32.gmra.mrb[70].mxu0 %v7473_v30  ;;  %v2440_v30 = vld [vmem:[%s10376_s3 + $0x8] sm:$0xff]  ;;  %v5901_v52 = vld [vmem:[%s10374_s1 + $0x180] sm:$0xff] }
 0x8db   : > { %v7477_v58 = vpop.eup %7476  ;;  %v2963_v45 = vmul.f32 1.442695, %v2901_v59  ;;  %v2965_v0 = vmul.f32 1.442695, %v2902_v37  ;;  %3001 = vadd.xlane.f32.xlu1 %v3000_v10  ;;  %v7025_v12 = vpack.c.bf16 %v2440_v30, %v2439_v60  ;;  %v9736_v14 = vpack.c.bf16 %v5902_v33, %v5901_v52 }
 0x8dc   : > { %v7479_v38 = vpop.eup %7478 }
 0x8dd   : > { %7488 = vpow2.f32 %v2963_v45  ;;  %3172 = vmatprep.mubr.f32.mxu0 %v7479_v38  ;;  %v3003_v29 = vadd.f32 %v7479_v38, %v7477_v58 }
 0x8de   : > { %7490 = vpow2.f32 %v2965_v0  ;;  %3173 = vmatmul.mubr.f32.gmra.mrb[72].mxu0 %v7477_v58 }
 0x8df   : > { %v7481_v18 = vpop.eup %7480  ;;  %3004 = vadd.xlane.f32.xlu0 %v3003_v29 }
 0x8e0   : > { %v7483_v48 = vpop.eup %7482 }
 0x8e1   : > { %3177 = vmatprep.mubr.f32.mxu0 %v7483_v48  ;;  %v3006_v44 = vadd.f32 %v7483_v48, %v7481_v18 }
 0x8e2   : > { %3178 = vmatmul.mubr.f32.gmra.mrb[74].mxu0 %v7481_v18 }
 0x8e3   : > { %v7485_v17 = vpop.eup %7484  ;;  %3007 = vadd.xlane.f32.xlu1 %v3006_v44 }
 0x8e4   : > { %v7487_v11 = vpop.eup %7486 }
 0x8e5   : > { %3182 = vmatprep.mubr.f32.mxu0 %v7487_v11  ;;  %v3009_v8 = vadd.f32 %v7487_v11, %v7485_v17  ;;  %v2442_v11 = vld [vmem:[%s10376_s3 + $0x18] sm:$0xff] }
 0x8e6   : > { %3183 = vmatmul.mubr.f32.gmra.mrb[76].mxu0 %v7485_v17  ;;  %v2441_v17 = vld [vmem:[%s10376_s3 + $0x10] sm:$0xff] }
 0x8e7   : > { %v7489_v35 = vpop.eup %7488  ;;  %3010 = vadd.xlane.f32.xlu0 %v3009_v8 }
 0x8e8   : > { %v7491_v3 = vpop.eup %7490 }
 0x8e9   : > { %3187 = vmatprep.mubr.f32.mxu0 %v7491_v3  ;;  %v3012_v53 = vadd.f32 %v7491_v3, %v7489_v35 }
 0x8ea   : > { %3188 = vmatmul.mubr.f32.gmra.mrb[78].mxu0 %v7489_v35 }
 0x8eb   : > { %2183 = vadd.xlane.f32.xlu0 %v9365_v19  ;;  %3013 = vadd.xlane.f32.xlu1 %v3012_v53  ;;  %v9647_v19 = vld [vmem:[%s9035_s30 + $0x18] sm:$0xff] }
 0x8ec   : > { %6697 = vmatprep.mubr.f32.mxu0 %v9633_v54 }
 0x8ee   : > { %6698 = vmatmul.mubr.f32.vlgmr.msra.gmra.mrb[80].mxu0 %v9637_v36 }
 0x8ef   : > { %2189 = vadd.xlane.f32.xlu0 %v9373_v27  ;;  %2186 = vadd.xlane.f32.xlu1 %v9369_v2  ;;  %v9657_v27 = vld [vmem:[%s9035_s30 + $0x28] sm:$0xff]  ;;  %v9663_v2 = vld [vmem:[%s9035_s30 + $0x30] sm:$0xff] }
 0x8f0   : > { %6700 = vmatprep.mubr.f32.mxu0 %v9643_v62 }
 0x8f2   : > { %6701 = vmatmul.mubr.f32.gmra.mrb[82].mxu0 %v9647_v19 }
 0x8f3   : > { %2195 = vadd.xlane.f32.xlu0 %v9381_v26  ;;  %2192 = vadd.xlane.f32.xlu1 %v9377_v28  ;;  %v9667_v26 = vld [vmem:[%s9035_s30 + $0x38] sm:$0xff]  ;;  %v9673_v28 = vld [vmem:[%s9035_s30 + $0x40] sm:$0xff] }
 0x8f4   : > { %6703 = vmatprep.mubr.f32.mxu0 %v9653_v4 }
 0x8f6   : > { %6704 = vmatmul.mubr.f32.gmra.mrb[84].mxu0 %v9657_v27 }
 0x8f7   : > { %2201 = vadd.xlane.f32.xlu0 %v9389_v13  ;;  %2198 = vadd.xlane.f32.xlu1 %v9385_v21  ;;  %v9677_v13 = vld [vmem:[%s9035_s30 + $0x48] sm:$0xff]  ;;  %v9683_v21 = vld [vmem:[%s9035_s30 + $0x50] sm:$0xff] }
 0x8f8   : > { %6706 = vmatprep.mubr.f32.mxu0 %v9663_v2 }
 0x8fa   : > { %6707 = vmatmul.mubr.f32.gmra.mrb[86].mxu0 %v9667_v26 }
 0x8fb   : > { %2207 = vadd.xlane.f32.xlu0 %v9397_v24  ;;  %2204 = vadd.xlane.f32.xlu1 %v9393_v42  ;;  %v5813_v42 = vld [vmem:[%s10376_s3 + $0x20] sm:$0xff]  ;;  %v5814_v24 = vld [vmem:[%s10376_s3 + $0x28] sm:$0xff] }
 0x8fc   : > { %6709 = vmatprep.mubr.f32.mxu0 %v9673_v28 }
 0x8fe   : > { %6710 = vmatmul.mubr.f32.gmra.mrb[88].mxu0 %v9677_v13 }
 0x8ff   : > { %2213 = vadd.xlane.f32.xlu0 %v9405_v63  ;;  %2210 = vadd.xlane.f32.xlu1 %v9401_v9  ;;  %v7017_v63 = vpack.c.bf16 %v5814_v24, %v5813_v42  ;;  %v9699_v9 = vld [vmem:[%s9035_s30 + $0x60] sm:$0xff]  ;;  %v7029_v24 = vpack.c.bf16 %v2442_v11, %v2441_v17  ;;  %s5660_s30 = sadd.s32 %s5956_s26, %s5955_s14 }
 0x900   : > { %6712 = vmatprep.mubr.f32.mxu0 %v9683_v21  ;;  %s5957_s0 = sshll.u32 %s5660_s30, 7 }
 0x901   : > { %7018 = vmatprep.subr.bf16.mxu1 %v7017_v63  ;;  %s10313_s21 = scalar_lea.hbm %s10378_s5, %s5957_s0 }
 0x902   : > { %6713 = vmatmul.mubr.f32.gmra.mrb[90].mxu0 %v9693_v40  ;;  %7020 = vmatpush3.bf16.msra.mxu1 %v7017_v63 }
 0x903   : > { %2219 = vadd.xlane.f32.xlu0 %v9411_v41  ;;  %2216 = vadd.xlane.f32.xlu1 %v9409_v20  ;;  %v7021_v20 = vpack.c.bf16 %v5816_v51, %v5815_v7  ;;  %v10585_v41 = vld [vmem:[#allocation82_spill] sm:$0xff] }
 0x904   : > { %6715 = vmatprep.mubr.f32.mxu0 %v9699_v9 }
 0x905   : > { %7022 = vmatprep.subr.bf16.mxu1 %v7021_v20 }
 0x906   : > { %6716 = vmatmul.mubr.f32.gmra.mrb[92].mxu0 %v9709_v47  ;;  %7024 = vmatpush3.bf16.msra.mxu1 %v7021_v20 }
 0x907   : > { %2225 = vadd.xlane.f32.xlu0 %v9415_v23  ;;  %2222 = vadd.xlane.f32.xlu1 %v10585_v41  ;;  %v7065_v23 = vpack.c.bf16 %v3782_v16, %v3780_v34 }
 0x908   : > { %6718 = vmatprep.mubr.f32.mxu0 %v9715_v31  ;;  %7026 = vmatprep.subr.bf16.mxu1 %v7025_v12 }
 0x909   : > { %7066 = vmatprep.subr.bf16.mxu0 %v7065_v23 }
 0x90a   : > { %6719 = vmatmul.mubr.f32.gmra.mrb[94].mxu0 %v9719_v61 }
 0x90b   : > { %2228 = vadd.xlane.f32.xlu1 %v10586_v49  ;;  %3899 = vmatprep.mubr.f32.mxu0 %v10587_v22 }
 0x90c   : > { %7068 = vmatpush1.bf16.msra.mxu0 %v7067_v32 }
 0x90d   : > { %7070 = vmatprep.subr.bf16.mxu0 %v7069_v55 }
 0x910   : > { %7072 = vmatpush1.bf16.msra.mxu0 %v7071_v6 }
 0x911   : > { %7114 = vmatprep.subr.bf16.mxu0 %v9736_v14 }
 0x93c   : > { %v2969_v59 = vpop.xlane.xlu0 %2968 }
 0x93d   : > { %7492 = vrcp.f32 %v2969_v59 }
 0x940   : > { %v2972_v37 = vpop.xlane.xlu1 %2971 }
 0x941   : > { %7494 = vrcp.f32 %v2972_v37 }
 0x944   : > { %v2975_v10 = vpop.xlane.xlu0 %2974 }
 0x945   : > { %7496 = vrcp.f32 %v2975_v10 }
 0x947   : > { %v7493_v29 = vpop.eup %7492 }
 0x948   : > { %v2978_v0 = vpop.xlane.xlu1 %2977 }
 0x949   : > { %7498 = vrcp.f32 %v2978_v0 }
 0x94b   : > { %v7495_v3 = vpop.eup %7494 }
 0x94c   : > { %v2981_v8 = vpop.xlane.xlu0 %2980 }
 0x94d   : > { %7500 = vrcp.f32 %v2981_v8 }
 0x94f   : > { %v7497_v20 = vpop.eup %7496 }
 0x950   : > { %v2984_v7 = vpop.xlane.xlu1 %2983 }
 0x951   : > { %7502 = vrcp.f32 %v2984_v7 }
 0x953   : > { %v7499_v23 = vpop.eup %7498 }
 0x954   : > { %v2987_v34 = vpop.xlane.xlu0 %2986 }
 0x955   : > { %7504 = vrcp.f32 %v2987_v34 }
 0x957   : > { %v7501_v57 = vpop.eup %7500 }
 0x958   : > { %v2990_v50 = vpop.xlane.xlu1 %2989 }
 0x959   : > { %7506 = vrcp.f32 %v2990_v50 }
 0x95b   : > { %v7503_v59 = vpop.eup %7502 }
 0x95c   : > { %v2993_v1 = vpop.xlane.xlu0 %2992 }
 0x95d   : > { %7508 = vrcp.f32 %v2993_v1 }
 0x960   : > { %v2996_v6 = vpop.xlane.xlu1 %2995 }
 0x961   : > { %7510 = vrcp.f32 %v2996_v6 }
 0x968   : > { %v3002_v37 = vpop.xlane.xlu1 %3001 }
 0x981   : > { %v6137_v58 = vpop.f32.mrb[48].mxu0 }
 0x982   : > { %v6138_v45 = vpop.f32.mrb[49].mxu0 }
 0x983   : > { %v6139_v38 = vadd.f32 %v6138_v45, %v6137_v58 }
 0x985   : > { %v3209_v18 = vmul.f32 %v7493_v29, %v6139_v38  ;;  %v6140_v48 = vpop.f32.mrb[50].mxu0  ;;  %v7505_v29 = vpop.eup %7504 }
 0x986   : > { %v6141_v44 = vpop.f32.mrb[51].mxu0 }
 0x987   : > { %v6142_v35 = vadd.f32 %v6141_v44, %v6140_v48  ;;  %6609 = vmatprep.mubr.msk.f32.mxu1 %vm1828_vm1, %v3209_v18  ;;  %v3008_v18 = vpop.xlane.xlu1 %3007 }
 0x989   : > { %v3210_v53 = vmul.f32 %v7495_v3, %v6142_v35  ;;  %v6143_v42 = vpop.f32.mrb[52].mxu0  ;;  %v7507_v35 = vpop.eup %7506 }
 0x98a   : > { %v6144_v63 = vpop.f32.mrb[53].mxu0  ;;  %v7509_v7 = vpop.eup %7508 }
 0x98b   : > { %v6145_v51 = vadd.f32 %v6144_v63, %v6143_v42  ;;  %6610 = vmatmul.mubr.msk.f32.vlgmr.msra.gmra.mrb[80].mxu1 %vm1828_vm1, %v3210_v53  ;;  %v3014_v3 = vpop.xlane.xlu1 %3013 }
 0x98c   : > { %7028 = vmatpush3.bf16.msra.mxu1 %v7025_v12  ;;  %v2999_v12 = vpop.xlane.xlu0 %2998 }
 0x98d   : > { %v3211_v41 = vmul.f32 %v7497_v20, %v6145_v51  ;;  %v6146_v49 = vpop.f32.mrb[54].mxu0  ;;  %7030 = vmatprep.subr.bf16.mxu1 %v7029_v24  ;;  %7512 = vrcp.f32 %v2999_v12 }
 0x98e   : > { %v6147_v16 = vpop.f32.mrb[55].mxu0  ;;  %7514 = vrcp.f32 %v3002_v37 }
 0x98f   : > { %v6148_v56 = vadd.f32 %v6147_v16, %v6146_v49  ;;  %6612 = vmatprep.mubr.msk.f32.mxu1 %vm1828_vm1, %v3211_v41  ;;  %v2187_v34 = vpop.xlane.xlu1 %2186 }
 0x990   : > { %7032 = vmatpush3.bf16.msra.mxu1 %v7029_v24  ;;  %v3005_v45 = vpop.xlane.xlu0 %3004 }
 0x991   : > { %v3212_v32 = vmul.f32 %v7499_v23, %v6148_v56  ;;  %v6149_v25 = vpop.f32.mrb[56].mxu0  ;;  %v7511_v56 = vpop.eup %7510  ;;  %7516 = vrcp.f32 %v3005_v45 }
 0x992   : > { %v6150_v39 = vpop.f32.mrb[57].mxu0  ;;  %7518 = vrcp.f32 %v3008_v18 }
 0x993   : > { %v6151_v55 = vadd.f32 %v6150_v39, %v6149_v25  ;;  %6613 = vmatmul.mubr.msk.f32.gmra.mrb[82].mxu1 %vm1828_vm1, %v3212_v32 }
 0x994   : > { %v3011_v17 = vpop.xlane.xlu0 %3010 }
 0x995   : > { %v3213_v60 = vmul.f32 %v7501_v57, %v6151_v55  ;;  %v6152_v30 = vpop.f32.mrb[58].mxu0  ;;  %v2193_v55 = vpop.xlane.xlu1 %2192  ;;  %7520 = vrcp.f32 %v3011_v17 }
 0x996   : > { %v6153_v52 = vpop.f32.mrb[59].mxu0 }
 0x997   : > { %v6154_v33 = vadd.f32 %v6153_v52, %v6152_v30  ;;  %6615 = vmatprep.mubr.msk.f32.mxu1 %vm1828_vm1, %v3213_v60  ;;  %v7513_v39 = vpop.eup %7512 }
 0x998   : > { %v2184_v51 = vpop.xlane.xlu0 %2183  ;;  %v7515_v12 = vpop.eup %7514 }
 0x999   : > { %v3214_v10 = vmul.f32 %v7503_v59, %v6154_v33  ;;  %v6155_v58 = vpop.f32.mrb[60].mxu0  ;;  %7522 = vrcp.f32 %v2184_v51  ;;  %v5903_v51 = vld [vmem:[%s10374_s1 + $0x190] sm:$0xff] }
 0x99a   : > { %v6156_v0 = vpop.f32.mrb[61].mxu0  ;;  %7524 = vrcp.f32 %v3014_v3 }
 0x99b   : > { %v6157_v38 = vadd.f32 %v6156_v0, %v6155_v58  ;;  %6616 = vmatmul.mubr.msk.f32.gmra.mrb[84].mxu1 %vm1828_vm1, %v3214_v10  ;;  %v2199_v10 = vpop.xlane.xlu1 %2198  ;;  %v7517_v45 = vpop.eup %7516  ;;  %7526 = vrcp.f32 %v2187_v34 }
 0x99c   : > { %v2190_v32 = vpop.xlane.xlu0 %2189 }
 0x99d   : > { %v3215_v48 = vmul.f32 %v7505_v29, %v6157_v38  ;;  %v6158_v44 = vpop.f32.mrb[62].mxu0  ;;  %7528 = vrcp.f32 %v2190_v32 }
 0x99e   : > { %v6159_v11 = vpop.f32.mrb[63].mxu0  ;;  %7530 = vrcp.f32 %v2193_v55 }
 0x99f   : > { %v6160_v8 = vadd.f32 %v6159_v11, %v6158_v44  ;;  %6618 = vmatprep.mubr.msk.f32.mxu1 %vm1828_vm1, %v3215_v48  ;;  %v7519_v44 = vpop.eup %7518  ;;  %v2205_v11 = vpop.xlane.xlu1 %2204 }
 0x9a0   : > { %v2196_v52 = vpop.xlane.xlu0 %2195 }
 0x9a1   : > { %v3216_v53 = vmul.f32 %v7507_v35, %v6160_v8  ;;  %v6161_v42 = vpop.f32.mrb[64].mxu0  ;;  %7532 = vrcp.f32 %v2196_v52 }
 0x9a2   : > { %v6162_v24 = vpop.f32.mrb[65].mxu0  ;;  %7534 = vrcp.f32 %v2199_v10 }
 0x9a3   : > { %v6163_v63 = vadd.f32 %v6162_v24, %v6161_v42  ;;  %6619 = vmatmul.mubr.msk.f32.gmra.mrb[86].mxu1 %vm1828_vm1, %v3216_v53  ;;  %v7521_v42 = vpop.eup %7520 }
 0x9a4   : > { %v2202_v29 = vpop.xlane.xlu0 %2201 }
 0x9a5   : > { %v3217_v20 = vmul.f32 %v7509_v7, %v6163_v63  ;;  %v6164_v41 = vpop.f32.mrb[66].mxu0  ;;  %7536 = vrcp.f32 %v2202_v29 }
 0x9a6   : > { %v6165_v49 = vpop.f32.mrb[67].mxu0  ;;  %7538 = vrcp.f32 %v2205_v11 }
 0x9a7   : > { %v6166_v16 = vadd.f32 %v6165_v49, %v6164_v41  ;;  %6621 = vmatprep.mubr.msk.f32.mxu1 %vm1828_vm1, %v3217_v20  ;;  %v5904_v20 = vld [vmem:[%s10374_s1 + $0x198] sm:$0xff]  ;;  %v7523_v41 = vpop.eup %7522  ;;  %v2211_v49 = vpop.xlane.xlu1 %2210 }
 0x9a8   : > { %v2208_v24 = vpop.xlane.xlu0 %2207 }
 0x9a9   : > { %v3218_v23 = vmul.f32 %v7511_v56, %v6166_v16  ;;  %v6167_v50 = vpop.f32.mrb[68].mxu0  ;;  %v7525_v16 = vpop.eup %7524  ;;  %7540 = vrcp.f32 %v2208_v24 }
 0x9aa   : > { %v6168_v25 = vpop.f32.mrb[69].mxu0  ;;  %v7527_v32 = vpop.eup %7526  ;;  %7542 = vrcp.f32 %v2211_v49 }
 0x9ab   : > { %v6169_v1 = vadd.f32 %v6168_v25, %v6167_v50  ;;  %6622 = vmatmul.mubr.msk.f32.gmra.mrb[88].mxu1 %vm1828_vm1, %v3218_v23  ;;  %v7117_v50 = vpack.c.bf16 %v5904_v20, %v5903_v51  ;;  %v2217_v52 = vpop.xlane.xlu1 %2216 }
 0x9ac   : > { %v2214_v25 = vpop.xlane.xlu0 %2213 }
 0x9ad   : > { %v3219_v57 = vmul.f32 %v7513_v39, %v6169_v1  ;;  %v6170_v6 = vpop.f32.mrb[70].mxu0  ;;  %v10588_v39 = vld [vmem:[#allocation84_spill] sm:$0xff]  ;;  %7544 = vrcp.f32 %v2214_v25  ;;  %v5912_v25 = vld [vmem:[%s10374_s1 + $0x1d8] sm:$0xff] }
 0x9ae   : > { %v6171_v60 = vpop.f32.mrb[71].mxu0  ;;  %v2423_v55 = vmul.f32 %v7523_v41, %v10588_v39  ;;  %7546 = vrcp.f32 %v2217_v52  ;;  %v10595_v39 = vld [vmem:[#allocation91_spill] sm:$0xff] }
 0x9af   : > { %v6172_v30 = vadd.f32 %v6171_v60, %v6170_v6  ;;  %6624 = vmatprep.mubr.msk.f32.mxu1 %vm1828_vm1, %v3219_v57  ;;  %v7529_v57 = vpop.eup %7528  ;;  %v5905_v6 = vld [vmem:[%s10374_s1 + $0x1a0] sm:$0xff]  ;;  %v5906_v60 = vld [vmem:[%s10374_s1 + $0x1a8] sm:$0xff]  ;;  %v2223_v24 = vpop.xlane.xlu1 %2222 }
 0x9b0   : > { %v2220_v29 = vpop.xlane.xlu0 %2219 }
 0x9b1   : > { %v3220_v33 = vmul.f32 %v7515_v12, %v6172_v30  ;;  %v6173_v59 = vpop.f32.mrb[72].mxu0  ;;  %v10589_v30 = vld [vmem:[#allocation85_spill] sm:$0xff]  ;;  %7548 = vrcp.f32 %v2220_v29 }
 0x9b2   : > { %v6174_v37 = vpop.f32.mrb[73].mxu0  ;;  %v2424_v12 = vmul.f32 %v7527_v32, %v10589_v30  ;;  %v5911_v32 = vld [vmem:[%s10374_s1 + $0x1d0] sm:$0xff]  ;;  %7550 = vrcp.f32 %v2223_v24 }
 0x9b3   : > { %v6175_v58 = vadd.f32 %v6174_v37, %v6173_v59  ;;  %6625 = vmatmul.mubr.msk.f32.gmra.mrb[90].mxu1 %vm1828_vm1, %v3220_v33  ;;  %v7531_v59 = vpop.eup %7530  ;;  %v10590_v37 = vld [vmem:[#allocation86_spill] sm:$0xff]  ;;  %v7133_v52 = vpack.c.bf16 %v5912_v25, %v5911_v32 }
 0x9b4   : > { %v2425_v10 = vmul.f32 %v7529_v57, %v10590_v37  ;;  %v2226_v49 = vpop.xlane.xlu0 %2225  ;;  %v5914_v37 = vld [vmem:[%s10374_s1 + $0x1e8] sm:$0xff]  ;;  %v4209_v32 = vld [vmem:[#allocation3 + $0x2a0] sm:$0xff] }
 0x9b5   : > { %v3221_v0 = vmul.f32 %v7517_v45, %v6175_v58  ;;  %v6176_v38 = vpop.f32.mrb[74].mxu0  ;;  %v7121_v45 = vpack.c.bf16 %v5906_v60, %v5905_v6  ;;  %7552 = vrcp.f32 %v2226_v49  ;;  %v10596_v60 = vld [vmem:[#allocation92_spill] sm:$0xff] }
 0x9b6   : > { %v6177_v18 = vpop.f32.mrb[75].mxu0 }
 0x9b7   : > { %v6178_v48 = vadd.f32 %v6177_v18, %v6176_v38  ;;  %6627 = vmatprep.mubr.msk.f32.mxu1 %vm1828_vm1, %v3221_v0  ;;  %v7533_v0 = vpop.eup %7532  ;;  %v5908_v38 = vld [vmem:[%s10374_s1 + $0x1b8] sm:$0xff]  ;;  %v10591_v18 = vld [vmem:[#allocation87_spill] sm:$0xff] }
 0x9b8   : > { %v7535_v11 = vpop.eup %7534 }
 0x9b9   : > { %v3222_v17 = vmul.f32 %v7519_v44, %v6178_v48  ;;  %v6179_v8 = vpop.f32.mrb[76].mxu0  ;;  %v2426_v48 = vmul.f32 %v7531_v59, %v10591_v18  ;;  %v5913_v59 = vld [vmem:[%s10374_s1 + $0x1e0] sm:$0xff] }
 0x9ba   : > { %v6180_v35 = vpop.f32.mrb[77].mxu0  ;;  %v7137_v18 = vpack.c.bf16 %v5914_v37, %v5913_v59 }
 0x9bb   : > { %v6181_v53 = vadd.f32 %v6180_v35, %v6179_v8  ;;  %6628 = vmatmul.mubr.msk.f32.gmra.mrb[92].mxu1 %vm1828_vm1, %v3222_v17  ;;  %v10592_v17 = vld [vmem:[#allocation88_spill] sm:$0xff] }
 0x9bc   : > { %v2427_v8 = vmul.f32 %v7533_v0, %v10592_v17  ;;  %v5916_v17 = vld [vmem:[%s10374_s1 + $0x1f8] sm:$0xff] }
 0x9bd   : > { %v3223_v3 = vmul.f32 %v7521_v42, %v6181_v53  ;;  %v6182_v63 = vpop.f32.mrb[78].mxu0  ;;  %v7537_v42 = vpop.eup %7536 }
 0x9be   : > { %v6183_v7 = vpop.f32.mrb[79].mxu0  ;;  %v7539_v41 = vpop.eup %7538 }
 0x9bf   : > { %v6184_v34 = vadd.f32 %v6183_v7, %v6182_v63  ;;  %6630 = vmatprep.mubr.msk.f32.mxu1 %vm1828_vm1, %v3223_v3  ;;  %v5909_v3 = vld [vmem:[%s10374_s1 + $0x1c0] sm:$0xff]  ;;  %v5910_v63 = vld [vmem:[%s10374_s1 + $0x1c8] sm:$0xff]  ;;  %v10593_v7 = vld [vmem:[#allocation89_spill] sm:$0xff] }
 0x9c0   : > { %v2428_v51 = vmul.f32 %v7535_v11, %v10593_v7  ;;  %v5915_v11 = vld [vmem:[%s10374_s1 + $0x1f0] sm:$0xff] }
 0x9c1   : > { %v3224_v56 = vmul.f32 %v7525_v16, %v6184_v34  ;;  %v6699_v23 = vpop.f32.mrb[80].mxu0  ;;  %v10594_v34 = vld [vmem:[#allocation90_spill] sm:$0xff] }
 0x9c2   : > { %v3699_v1 = vpop.f32.mrb[81].mxu0  ;;  %v2429_v16 = vmul.f32 %v7537_v42, %v10594_v34 }
 0x9c3   : > { %6631 = vmatmul.mubr.msk.f32.gmra.mrb[94].mxu1 %vm1828_vm1, %v3224_v56  ;;  %5865 = vmatmul.mubr.msk.f32.vlgmr.msra.gmra.mrb[96].mxu0 %vm1828_vm1, %v3699_v1  ;;  %v2229_v1 = vpop.xlane.xlu1 %2228 }
 0x9c4   : > { %7116 = vmatpush3.bf16.msra.mxu0 %v9736_v14  ;;  %6641 = vmatprep.mubr.msk.f32.mxu1 %vm1828_vm1, %v2423_v55  ;;  %v5907_v14 = vld [vmem:[%s10374_s1 + $0x1b0] sm:$0xff]  ;;  %v2430_v55 = vmul.f32 %v7539_v41, %v10595_v39  ;;  %7554 = vrcp.f32 %v2229_v1  ;;  %v4210_v1 = vld [vmem:[#allocation3 + $0x2a8] sm:$0xff] }
 0x9c5   : > { %3905 = vmatprep.mubr.f32.mxu0 %v10587_v22  ;;  %v6702_v33 = vpop.f32.mrb[82].mxu0  ;;  %7118 = vmatprep.subr.bf16.mxu0 %v7117_v50  ;;  %v7125_v53 = vpack.c.bf16 %v5908_v38, %v5907_v14  ;;  %v10598_v14 = vld [vmem:[#allocation94_spill] sm:$0xff] }
 0x9c6   : > { %v3709_v58 = vpop.f32.mrb[83].mxu0 }
 0x9c7   : > { %6642 = vmatmul.mubr.msk.f32.vlgmr.msra.gmra.mrb[80].mxu1 %vm1828_vm1, %v2424_v12  ;;  %5866 = vmatmul.mubr.msk.f32.gmra.mrb[98].mxu0 %vm1828_vm1, %v6699_v23  ;;  %v7129_v23 = vpack.c.bf16 %v5910_v63, %v5909_v3  ;;  %v7141_v3 = vpack.c.bf16 %v5916_v17, %v5915_v11 }
 0x9c8   : > { %6644 = vmatprep.mubr.msk.f32.mxu1 %vm1828_vm1, %v2425_v10  ;;  %3911 = vmatprep.mubr.f32.mxu0 %v10587_v22  ;;  %v10597_v10 = vld [vmem:[#allocation93_spill] sm:$0xff] }
 0x9c9   : > { %7120 = vmatpush3.bf16.msra.mxu0 %v7117_v50  ;;  %v6705_v44 = vpop.f32.mrb[84].mxu0  ;;  %v7541_v50 = vpop.eup %7540 }
 0x9ca   : > { %v3719_v35 = vpop.f32.mrb[85].mxu0  ;;  %7122 = vmatprep.subr.bf16.mxu0 %v7121_v45  ;;  %v7543_v6 = vpop.eup %7542  ;;  %v2431_v30 = vmul.f32 %v7541_v50, %v10596_v60  ;;  %v4192_v50 = vld [vmem:[#allocation3 + $0x218] sm:$0xff]  ;;  %v4194_v60 = vld [vmem:[#allocation3 + $0x228] sm:$0xff] }
 0x9cb   : > { %6645 = vmatmul.mubr.msk.f32.gmra.mrb[82].mxu1 %vm1828_vm1, %v2426_v48  ;;  %5867 = vmatmul.mubr.msk.f32.gmra.mrb[100].mxu0 %vm1828_vm1, %v3709_v58  ;;  %v2432_v58 = vmul.f32 %v7543_v6, %v10597_v10  ;;  %v4193_v6 = vld [vmem:[#allocation3 + $0x220] sm:$0xff] }
 0x9cc   : > { %6647 = vmatprep.mubr.msk.f32.mxu1 %vm1828_vm1, %v2427_v8  ;;  %3917 = vmatprep.mubr.f32.mxu0 %v10587_v22  ;;  %v10599_v8 = vld [vmem:[#allocation95_spill] sm:$0xff]  ;;  %v7083_v37 = vpack.c.bf16 %v4194_v60, %v4193_v6 }
 0x9cd   : > { %7124 = vmatpush3.bf16.msra.mxu0 %v7121_v45  ;;  %v9803_v20 = vpop.f32.mrb[86].mxu0 }
 0x9ce   : > { %v3729_v56 = vpop.f32.mrb[87].mxu0  ;;  %7126 = vmatprep.subr.bf16.mxu0 %v7125_v53 }
 0x9cf   : > { %6648 = vmatmul.mubr.msk.f32.gmra.mrb[84].mxu1 %vm1828_vm1, %v2428_v51  ;;  %5868 = vmatmul.mubr.msk.f32.gmra.mrb[102].mxu0 %vm1828_vm1, %v6702_v33  ;;  %v7545_v33 = vpop.eup %7544 }
 0x9d0   : > { %6650 = vmatprep.mubr.msk.f32.mxu1 %vm1828_vm1, %v2429_v16  ;;  %3923 = vmatprep.mubr.f32.mxu0 %v10587_v22  ;;  %v7547_v0 = vpop.eup %7546  ;;  %v2433_v38 = vmul.f32 %v7545_v33, %v10598_v14 }
 0x9d1   : > { %7128 = vmatpush3.bf16.msra.mxu0 %v7125_v53  ;;  %v6711_v57 = vpop.f32.mrb[88].mxu0  ;;  %v7549_v48 = vpop.eup %7548 }
 0x9d2   : > { %v3739_v12 = vpop.f32.mrb[89].mxu0  ;;  %7130 = vmatprep.subr.bf16.mxu0 %v7129_v23  ;;  %v7551_v42 = vpop.eup %7550  ;;  %v2435_v24 = vmul.f32 %v7549_v48, %v9550_v15 }
 0x9d3   : > { %6651 = vmatmul.mubr.msk.f32.gmra.mrb[86].mxu1 %vm1828_vm1, %v2430_v55  ;;  %5869 = vmatmul.mubr.msk.f32.gmra.mrb[104].mxu0 %vm1828_vm1, %v3719_v35  ;;  %v2434_v35 = vmul.f32 %v7547_v0, %v10599_v8  ;;  %v7553_v63 = vpop.eup %7552  ;;  %v2436_v7 = vmul.f32 %v7551_v42, %v9554_v43  ;;  %v4776_v43 = vld [vmem:[#allocation2 + $0xc8] sm:$0xff]  ;;  %v4213_v8 = vld [vmem:[#allocation3 + $0x2c0] sm:$0xff] }
 0x9d4   : > { %6653 = vmatprep.mubr.msk.f32.mxu1 %vm1828_vm1, %v2431_v30  ;;  %3929 = vmatprep.mubr.f32.mxu0 %v10587_v22  ;;  %v7555_v41 = vpop.eup %7554  ;;  %v2437_v49 = vmul.f32 %v7553_v63, %v9558_v5  ;;  %v4778_v5 = vld [vmem:[#allocation2 + $0xd8] sm:$0xff] }
 0x9d5   : > { %7132 = vmatpush3.bf16.msra.mxu0 %v7129_v23  ;;  %v6714_v45 = vpop.f32.mrb[90].mxu0  ;;  %v2438_v34 = vmul.f32 %v7555_v41, %v9568_v46  ;;  %v4775_v46 = vld [vmem:[#allocation2 + $0xc0] sm:$0xff]  ;;  %v4191_v23 = vld [vmem:[#allocation3 + $0x210] sm:$0xff]  ;;  %v4216_v41 = vld [vmem:[#allocation3 + $0x2d8] sm:$0xff] }
 0x9d6   : > { %v3749_v29 = vpop.f32.mrb[91].mxu0  ;;  %7134 = vmatprep.subr.bf16.mxu0 %v7133_v52  ;;  %v7079_v55 = vpack.c.bf16 %v4192_v50, %v4191_v23 }
 0x9d7   : > { %6654 = vmatmul.mubr.msk.f32.gmra.mrb[88].mxu1 %vm1828_vm1, %v2432_v58  ;;  %5870 = vmatmul.mubr.msk.f32.gmra.mrb[106].mxu0 %vm1828_vm1, %v6705_v44  ;;  %v4195_v58 = vld [vmem:[#allocation3 + $0x230] sm:$0xff] }
 0x9d8   : > { %6656 = vmatprep.mubr.msk.f32.mxu1 %vm1828_vm1, %v2433_v38  ;;  %3935 = vmatprep.mubr.f32.mxu0 %v10587_v22 }
 0x9d9   : > { %7136 = vmatpush3.bf16.msra.mxu0 %v7133_v52  ;;  %v6717_v53 = vpop.f32.mrb[92].mxu0  ;;  %v4212_v52 = vld [vmem:[#allocation3 + $0x2b8] sm:$0xff] }
 0x9da   : > { %v3759_v44 = vpop.f32.mrb[93].mxu0  ;;  %7138 = vmatprep.subr.bf16.mxu0 %v7137_v18 }
 0x9db   : > { %6657 = vmatmul.mubr.msk.f32.gmra.mrb[90].mxu1 %vm1828_vm1, %v2434_v35  ;;  %5871 = vmatmul.mubr.msk.f32.gmra.mrb[108].mxu0 %vm1828_vm1, %v3729_v56  ;;  %v4214_v35 = vld [vmem:[#allocation3 + $0x2c8] sm:$0xff] }
 0x9dc   : > { %6659 = vmatprep.mubr.msk.f32.mxu1 %vm1828_vm1, %v2435_v24  ;;  %3941 = vmatprep.mubr.f32.mxu0 %v10587_v22  ;;  %v7089_v42 = vpack.c.bf16 %v4214_v35, %v4213_v8  ;;  %v4197_v24 = vld [vmem:[#allocation3 + $0x240] sm:$0xff] }
 0x9dd   : > { %7140 = vmatpush3.bf16.msra.mxu0 %v7137_v18  ;;  %v6720_v51 = vpop.f32.mrb[94].mxu0 }
 0x9de   : > { %v3769_v15 = vpop.f32.mrb[95].mxu0  ;;  %7142 = vmatprep.subr.bf16.mxu0 %v7141_v3 }
 0x9df   : > { %6660 = vmatmul.mubr.msk.f32.gmra.mrb[92].mxu1 %vm1828_vm1, %v2436_v7  ;;  %5872 = vmatmul.mubr.msk.f32.gmra.mrb[110].mxu0 %vm1828_vm1, %v9803_v20 }
 0x9e0   : > { %6662 = vmatprep.mubr.msk.f32.mxu1 %vm1828_vm1, %v2437_v49  ;;  %3947 = vmatprep.mubr.f32.mxu0 %v10587_v22 }
 0x9e1   : > { %7144 = vmatpush3.bf16.msra.mxu0 %v7141_v3 }
 0x9e3   : > { %6663 = vmatmul.mubr.msk.f32.gmra.mrb[94].mxu1 %vm1828_vm1, %v2438_v34  ;;  %5873 = vmatmul.mubr.msk.f32.gmra.mrb[112].mxu0 %vm1828_vm1, %v3739_v12  ;;  %v4211_v12 = vld [vmem:[#allocation3 + $0x2b0] sm:$0xff] }
 0x9e4   : > { %3953 = vmatprep.mubr.f32.mxu0 %v10587_v22  ;;  %v7085_v10 = vpack.c.bf16 %v4212_v52, %v4211_v12  ;;  %v4199_v34 = vld [vmem:[#allocation3 + $0x250] sm:$0xff] }
 0x9e7   : > { %5874 = vmatmul.mubr.msk.f32.gmra.mrb[114].mxu0 %vm1828_vm1, %v6711_v57  ;;  %v7081_v57 = vpack.c.bf16 %v4210_v1, %v4209_v32 }
 0x9e8   : > { %3959 = vmatprep.mubr.f32.mxu0 %v10587_v22 }
 0x9eb   : > { %5875 = vmatmul.mubr.msk.f32.gmra.mrb[116].mxu0 %vm1828_vm1, %v3749_v29 }
 0x9ec   : > { %3965 = vmatprep.mubr.f32.mxu0 %v10587_v22 }
 0x9ef   : > { %5876 = vmatmul.mubr.msk.f32.gmra.mrb[118].mxu0 %vm1828_vm1, %v6714_v45  ;;  %v4196_v45 = vld [vmem:[#allocation3 + $0x238] sm:$0xff] }
 0x9f0   : > { %3971 = vmatprep.mubr.f32.mxu0 %v10587_v22  ;;  %v7087_v29 = vpack.c.bf16 %v4196_v45, %v4195_v58 }
 0x9f3   : > { %5877 = vmatmul.mubr.msk.f32.gmra.mrb[120].mxu0 %vm1828_vm1, %v3759_v44  ;;  %v4198_v44 = vld [vmem:[#allocation3 + $0x248] sm:$0xff] }
 0x9f4   : > { %3977 = vmatprep.mubr.f32.mxu0 %v10587_v22  ;;  %v7091_v63 = vpack.c.bf16 %v4198_v44, %v4197_v24 }
 0x9f7   : > { %5878 = vmatmul.mubr.msk.f32.gmra.mrb[122].mxu0 %vm1828_vm1, %v6717_v53 }
 0x9f8   : > { %3983 = vmatprep.mubr.f32.mxu0 %v10587_v22 }
 0x9fb   : > { %5879 = vmatmul.mubr.msk.f32.gmra.mrb[124].mxu0 %vm1828_vm1, %v3769_v15 }
 0x9fc   : > { %3989 = vmatprep.mubr.f32.mxu0 %v10587_v22 }
 0x9ff   : > { %5880 = vmatmul.mubr.msk.f32.gmra.mrb[126].mxu0 %vm1828_vm1, %v6720_v51  ;;  %v4215_v51 = vld [vmem:[#allocation3 + $0x2d0] sm:$0xff] }
 0xa00   : > { %6785 = vmatprep.mubr.f32.mxu0 %v9633_v54  ;;  %v7145_v54 = vpack.c.bf16 %v4778_v5, %v4776_v43  ;;  %v7093_v15 = vpack.c.bf16 %v4216_v41, %v4215_v51  ;;  %v4200_v43 = vld [vmem:[#allocation3 + $0x258] sm:$0xff] }
 0xa02   : > { %7146 = vmatprep.subr.bf16.mxu0 %v7145_v54 }
 0xa03   : > { %6786 = vmatmul.mubr.f32.vlgmr.msra.gmra.mrb[128].mxu0 %v9637_v36  ;;  %v4777_v36 = vld [vmem:[#allocation2 + $0xd0] sm:$0xff] }
 0xa04   : > { %6788 = vmatprep.mubr.f32.mxu0 %v9643_v62  ;;  %v7147_v62 = vpack.c.bf16 %v4777_v36, %v4775_v46  ;;  %v7095_v46 = vpack.c.bf16 %v4200_v43, %v4199_v34  ;;  %v4217_v36 = vld [vmem:[#allocation3 + $0x2e0] sm:$0xff] }
 0xa06   : > { %7148 = vmatpush1.bf16.msra.mxu0 %v7147_v62  ;;  %v4218_v62 = vld [vmem:[#allocation3 + $0x2e8] sm:$0xff] }
 0xa07   : > { %6789 = vmatmul.mubr.f32.gmra.mrb[130].mxu0 %v9647_v19  ;;  %v4780_v19 = vld [vmem:[#allocation2 + $0xe8] sm:$0xff] }
 0xa08   : > { %6791 = vmatprep.mubr.f32.mxu0 %v9653_v4  ;;  %v4782_v4 = vld [vmem:[#allocation2 + $0xf8] sm:$0xff] }
 0xa0b   : > { %6792 = vmatmul.mubr.f32.gmra.mrb[132].mxu0 %v9657_v27  ;;  %v4779_v27 = vld [vmem:[#allocation2 + $0xe0] sm:$0xff] }
 0xa0c   : > { %6794 = vmatprep.mubr.f32.mxu0 %v9663_v2  ;;  %v7149_v2 = vpack.c.bf16 %v4782_v4, %v4780_v19  ;;  %v7097_v4 = vpack.c.bf16 %v4218_v62, %v4217_v36 }
 0xa0e   : > { %7150 = vmatprep.subr.bf16.mxu0 %v7149_v2  ;;  %v4202_v2 = vld [vmem:[#allocation3 + $0x268] sm:$0xff] }
 0xa0f   : > { %6795 = vmatmul.mubr.f32.gmra.mrb[134].mxu0 %v9667_v26  ;;  %v4781_v26 = vld [vmem:[#allocation2 + $0xf0] sm:$0xff] }
 0xa10   : > { %6797 = vmatprep.mubr.f32.mxu0 %v9673_v28  ;;  %v7151_v28 = vpack.c.bf16 %v4781_v26, %v4779_v27  ;;  %v4201_v27 = vld [vmem:[#allocation3 + $0x260] sm:$0xff] }
 0xa12   : > { %7152 = vmatpush1.bf16.msra.mxu0 %v7151_v28  ;;  %v7099_v28 = vpack.c.bf16 %v4202_v2, %v4201_v27 }
 0xa13   : > { %6798 = vmatmul.mubr.f32.gmra.mrb[136].mxu0 %v9677_v13  ;;  %v4205_v13 = vld [vmem:[#allocation3 + $0x280] sm:$0xff] }
 0xa14   : > { %6800 = vmatprep.mubr.f32.mxu0 %v9683_v21  ;;  %v4206_v21 = vld [vmem:[#allocation3 + $0x288] sm:$0xff] }
 0xa17   : > { %6801 = vmatmul.mubr.f32.gmra.mrb[138].mxu0 %v9693_v40  ;;  %v4189_v40 = vld [vmem:[#allocation3 + $0x200] sm:$0xff] }
 0xa18   : > { %6803 = vmatprep.mubr.f32.mxu0 %v9699_v9  ;;  %v7073_v9 = vpack.c.bf16 %v4206_v21, %v4205_v13  ;;  %v4219_v21 = vld [vmem:[#allocation3 + $0x2f0] sm:$0xff] }
 0xa1a   : > { %7074 = vmatprep.subr.bf16.mxu1 %v7073_v9 }
 0xa1b   : > { %6804 = vmatmul.mubr.f32.gmra.mrb[140].mxu0 %v9709_v47  ;;  %v4190_v47 = vld [vmem:[#allocation3 + $0x208] sm:$0xff] }
 0xa1c   : > { %6806 = vmatprep.mubr.f32.mxu0 %v9715_v31  ;;  %v4207_v31 = vld [vmem:[#allocation3 + $0x290] sm:$0xff]  ;;  %v7075_v16 = vpack.c.bf16 %v4190_v47, %v4189_v40  ;;  %v4220_v40 = vld [vmem:[#allocation3 + $0x2f8] sm:$0xff] }
 0xa1d   : > { %v7101_v47 = vpack.c.bf16 %v4220_v40, %v4219_v21 }
 0xa1e   : > { %7076 = vmatpush3.bf16.msra.mxu1 %v7075_v16 }
 0xa1f   : > { %6807 = vmatmul.mubr.f32.gmra.mrb[142].mxu0 %v9719_v61  ;;  %v4208_v61 = vld [vmem:[#allocation3 + $0x298] sm:$0xff] }
 0xa20   : > { %4895 = vmatprep.mubr.f32.mxu0 %v10587_v22  ;;  %v7077_v56 = vpack.c.bf16 %v4208_v61, %v4207_v31  ;;  %v4203_v31 = vld [vmem:[#allocation3 + $0x270] sm:$0xff]  ;;  %v4204_v61 = vld [vmem:[#allocation3 + $0x278] sm:$0xff] }
 0xa22   : > { %7078 = vmatprep.subr.bf16.mxu1 %v7077_v56  ;;  %v7103_v56 = vpack.c.bf16 %v4204_v61, %v4203_v31 }
 0xa23   : > { %7080 = vmatpush3.bf16.msra.mxu1 %v7079_v55 }
 0xa24   : > { %7082 = vmatprep.subr.bf16.mxu1 %v7081_v57 }
 0xa27   : > { %7084 = vmatpush3.bf16.msra.mxu1 %v7083_v37 }
 0xa28   : > { %7086 = vmatprep.subr.bf16.mxu1 %v7085_v10 }
 0xa2b   : > { %7088 = vmatpush3.bf16.msra.mxu1 %v7087_v29 }
 0xa2c   : > { %7090 = vmatprep.subr.bf16.mxu1 %v7089_v42 }
 0xa2f   : > { %7092 = vmatpush3.bf16.msra.mxu1 %v7091_v63 }
 0xa30   : > { %7094 = vmatprep.subr.bf16.mxu1 %v7093_v15 }
 0xa33   : > { %7096 = vmatpush3.bf16.msra.mxu1 %v7095_v46 }
 0xa34   : > { %7098 = vmatprep.subr.bf16.mxu1 %v7097_v4 }
 0xa37   : > { %7100 = vmatpush3.bf16.msra.mxu1 %v7099_v28 }
 0xa38   : > { %7102 = vmatprep.subr.bf16.mxu1 %v7101_v47 }
 0xa3b   : > { %7104 = vmatpush3.bf16.msra.mxu1 %v7103_v56 }
 0xa96   : > { %v9887_v20 = vpop.f32.mrb[96].mxu0 }
 0xa97   : > { %v9889_v25 = vpop.f32.mrb[97].mxu0 }
 0xa98   : > { %v3996_v39 = vmax.f32 %v9887_v20, %v9889_v25 }
 0xa9a   : > { %3997 = vmax.xlane.f32.xlu0 %v3996_v39  ;;  %v9893_v30 = vpop.f32.mrb[98].mxu0 }
 0xa9b   : > { %v9895_v33 = vpop.f32.mrb[99].mxu0 }
 0xa9c   : > { %v3999_v59 = vmax.f32 %v9893_v30, %v9895_v33 }
 0xa9e   : > { %v9899_v0 = vpop.f32.mrb[100].mxu0  ;;  %4000 = vmax.xlane.f32.xlu1 %v3999_v59 }
 0xa9f   : > { %v9901_v14 = vpop.f32.mrb[101].mxu0 }
 0xaa0   : > { %v4002_v38 = vmax.f32 %v9899_v0, %v9901_v14 }
 0xaa2   : > { %4003 = vmax.xlane.f32.xlu0 %v4002_v38  ;;  %v9905_v18 = vpop.f32.mrb[102].mxu0 }
 0xaa3   : > { %v9907_v48 = vpop.f32.mrb[103].mxu0 }
 0xaa4   : > { %v4005_v11 = vmax.f32 %v9905_v18, %v9907_v48 }
 0xaa6   : > { %v9911_v17 = vpop.f32.mrb[104].mxu0  ;;  %4006 = vmax.xlane.f32.xlu1 %v4005_v11 }
 0xaa7   : > { %v9913_v53 = vpop.f32.mrb[105].mxu0 }
 0xaa8   : > { %v4008_v3 = vmax.f32 %v9911_v17, %v9913_v53 }
 0xaaa   : > { %4009 = vmax.xlane.f32.xlu0 %v4008_v3  ;;  %v9917_v7 = vpop.f32.mrb[106].mxu0 }
 0xaab   : > { %v9919_v49 = vpop.f32.mrb[107].mxu0 }
 0xaac   : > { %v4011_v5 = vmax.f32 %v9917_v7, %v9919_v49 }
 0xaae   : > { %v9923_v54 = vpop.f32.mrb[108].mxu0  ;;  %4012 = vmax.xlane.f32.xlu1 %v4011_v5 }
 0xaaf   : > { %v9925_v19 = vpop.f32.mrb[109].mxu0 }
 0xab0   : > { %v4014_v26 = vmax.f32 %v9923_v54, %v9925_v19 }
 0xab2   : > { %4015 = vmax.xlane.f32.xlu0 %v4014_v26  ;;  %v9929_v13 = vpop.f32.mrb[110].mxu0 }
 0xab3   : > { %v9931_v9 = vpop.f32.mrb[111].mxu0 }
 0xab4   : > { %v4017_v16 = vmax.f32 %v9929_v13, %v9931_v9 }
 0xab6   : > { %v9935_v23 = vpop.f32.mrb[112].mxu0  ;;  %4018 = vmax.xlane.f32.xlu1 %v4017_v16 }
 0xab7   : > { %v9937_v50 = vpop.f32.mrb[113].mxu0 }
 0xab8   : > { %v4020_v32 = vmax.f32 %v9935_v23, %v9937_v50 }
 0xaba   : > { %4021 = vmax.xlane.f32.xlu0 %v4020_v32  ;;  %v9941_v1 = vpop.f32.mrb[114].mxu0 }
 0xabb   : > { %v9943_v39 = vpop.f32.mrb[115].mxu0 }
 0xabc   : > { %v4023_v55 = vmax.f32 %v9941_v1, %v9943_v39 }
 0xabe   : > { %v9947_v57 = vpop.f32.mrb[116].mxu0  ;;  %4024 = vmax.xlane.f32.xlu1 %v4023_v55 }
 0xabf   : > { %v9949_v6 = vpop.f32.mrb[117].mxu0 }
 0xac0   : > { %v4026_v60 = vmax.f32 %v9947_v57, %v9949_v6 }
 0xac2   : > { %4027 = vmax.xlane.f32.xlu0 %v4026_v60  ;;  %v9953_v12 = vpop.f32.mrb[118].mxu0 }
 0xac3   : > { %v9955_v52 = vpop.f32.mrb[119].mxu0 }
 0xac4   : > { %v4029_v59 = vmax.f32 %v9953_v12, %v9955_v52 }
 0xac6   : > { %v9959_v37 = vpop.f32.mrb[120].mxu0  ;;  %4030 = vmax.xlane.f32.xlu1 %v4029_v59 }
 0xac7   : > { %v9961_v10 = vpop.f32.mrb[121].mxu0 }
 0xac8   : > { %v4032_v58 = vmax.f32 %v9959_v37, %v9961_v10 }
 0xaca   : > { %4033 = vmax.xlane.f32.xlu0 %v4032_v58  ;;  %v9965_v45 = vpop.f32.mrb[122].mxu0 }
 0xacb   : > { %v9967_v38 = vpop.f32.mrb[123].mxu0 }
 0xacc   : > { %v4035_v29 = vmax.f32 %v9965_v45, %v9967_v38 }
 0xace   : > { %v9971_v11 = vpop.f32.mrb[124].mxu0  ;;  %4036 = vmax.xlane.f32.xlu1 %v4035_v29 }
 0xacf   : > { %v9973_v8 = vpop.f32.mrb[125].mxu0 }
 0xad0   : > { %v4038_v35 = vmax.f32 %v9971_v11, %v9973_v8 }
 0xad2   : > { %4039 = vmax.xlane.f32.xlu0 %v4038_v35  ;;  %v9977_v42 = vpop.f32.mrb[126].mxu0 }
 0xad3   : > { %v9979_v24 = vpop.f32.mrb[127].mxu0 }
 0xad4   : > { %v4041_v44 = vmax.f32 %v9977_v42, %v9979_v24 }
 0xad6   : > { %v6787_v3 = vpop.f32.mrb[128].mxu0  ;;  %4042 = vmax.xlane.f32.xlu1 %v4041_v44 }
 0xad7   : > { %v4695_v63 = vpop.f32.mrb[129].mxu0 }
 0xad8   : > { %5917 = vmatmul.mubr.msk.f32.vlgmr.msra.gmra.mrb[144].mxu0 %vm1828_vm1, %v4695_v63 }
 0xad9   : > { %4901 = vmatprep.mubr.f32.mxu0 %v10587_v22 }
 0xada   : > { %v6790_v51 = vpop.f32.mrb[130].mxu0 }
 0xadb   : > { %v4705_v41 = vpop.f32.mrb[131].mxu0 }
 0xadc   : > { %5918 = vmatmul.mubr.msk.f32.gmra.mrb[146].mxu0 %vm1828_vm1, %v6787_v3 }
 0xadd   : > { %4907 = vmatprep.mubr.f32.mxu0 %v10587_v22 }
 0xade   : > { %v6793_v15 = vpop.f32.mrb[132].mxu0 }
 0xadf   : > { %v4715_v34 = vpop.f32.mrb[133].mxu0 }
 0xae0   : > { %5919 = vmatmul.mubr.msk.f32.gmra.mrb[148].mxu0 %vm1828_vm1, %v4705_v41 }
 0xae1   : > { %4913 = vmatprep.mubr.f32.mxu0 %v10587_v22 }
 0xae2   : > { %v6796_v43 = vpop.f32.mrb[134].mxu0 }
 0xae3   : > { %v4725_v5 = vpop.f32.mrb[135].mxu0 }
 0xae4   : > { %5920 = vmatmul.mubr.msk.f32.gmra.mrb[150].mxu0 %vm1828_vm1, %v6790_v51 }
 0xae5   : > { %4919 = vmatprep.mubr.f32.mxu0 %v10587_v22 }
 0xae6   : > { %v6799_v46 = vpop.f32.mrb[136].mxu0 }
 0xae7   : > { %v4735_v36 = vpop.f32.mrb[137].mxu0 }
 0xae8   : > { %5921 = vmatmul.mubr.msk.f32.gmra.mrb[152].mxu0 %vm1828_vm1, %v4715_v34 }
 0xae9   : > { %4925 = vmatprep.mubr.f32.mxu0 %v10587_v22 }
 0xaea   : > { %v6802_v62 = vpop.f32.mrb[138].mxu0 }
 0xaeb   : > { %v4745_v4 = vpop.f32.mrb[139].mxu0 }
 0xaec   : > { %5922 = vmatmul.mubr.msk.f32.gmra.mrb[154].mxu0 %vm1828_vm1, %v6793_v15 }
 0xaed   : > { %4931 = vmatprep.mubr.f32.mxu0 %v10587_v22 }
 0xaee   : > { %v6805_v27 = vpop.f32.mrb[140].mxu0 }
 0xaef   : > { %v4755_v2 = vpop.f32.mrb[141].mxu0 }
 0xaf0   : > { %5923 = vmatmul.mubr.msk.f32.gmra.mrb[156].mxu0 %vm1828_vm1, %v4725_v5 }
 0xaf1   : > { %4937 = vmatprep.mubr.f32.mxu0 %v10587_v22 }
 0xaf2   : > { %v6808_v26 = vpop.f32.mrb[142].mxu0 }
 0xaf3   : > { %v4765_v28 = vpop.f32.mrb[143].mxu0 }
 0xaf4   : > { %5924 = vmatmul.mubr.msk.f32.gmra.mrb[158].mxu0 %vm1828_vm1, %v6796_v43 }
 0xaf5   : > { %4943 = vmatprep.mubr.f32.mxu0 %v10587_v22 }
 0xaf8   : > { %5925 = vmatmul.mubr.msk.f32.gmra.mrb[160].mxu0 %vm1828_vm1, %v4735_v36 }
 0xaf9   : > { %4949 = vmatprep.mubr.f32.mxu0 %v10587_v22 }
 0xafc   : > { %5926 = vmatmul.mubr.msk.f32.gmra.mrb[162].mxu0 %vm1828_vm1, %v6799_v46 }
 0xafd   : > { %4955 = vmatprep.mubr.f32.mxu0 %v10587_v22 }
 0xb00   : > { %5927 = vmatmul.mubr.msk.f32.gmra.mrb[164].mxu0 %vm1828_vm1, %v4745_v4 }
 0xb01   : > { %4961 = vmatprep.mubr.f32.mxu0 %v10587_v22 }
 0xb04   : > { %5928 = vmatmul.mubr.msk.f32.gmra.mrb[166].mxu0 %vm1828_vm1, %v6802_v62 }
 0xb05   : > { %4967 = vmatprep.mubr.f32.mxu0 %v10587_v22 }
 0xb08   : > { %5929 = vmatmul.mubr.msk.f32.gmra.mrb[168].mxu0 %vm1828_vm1, %v4755_v2 }
 0xb09   : > { %4973 = vmatprep.mubr.f32.mxu0 %v10587_v22 }
 0xb0c   : > { %5930 = vmatmul.mubr.msk.f32.gmra.mrb[170].mxu0 %vm1828_vm1, %v6805_v27 }
 0xb0d   : > { %4979 = vmatprep.mubr.f32.mxu0 %v10587_v22 }
 0xb10   : > { %5931 = vmatmul.mubr.msk.f32.gmra.mrb[172].mxu0 %vm1828_vm1, %v4765_v28 }
 0xb11   : > { %4985 = vmatprep.mubr.f32.mxu0 %v10587_v22 }
 0xb14   : > { %5932 = vmatmul.mubr.msk.f32.gmra.mrb[174].mxu0 %vm1828_vm1, %v6808_v26 }
 0xb27   : > { %v3998_v21 = vpop.xlane.xlu0 %3997 }
 0xb28   : > { %v4044_v40 = vsub.f32 %v9887_v20, %v3998_v21  ;;  %v4045_v47 = vsub.f32 %v9889_v25, %v3998_v21 }
 0xb2a   : > { %v4076_v31 = vmul.f32 1.442695, %v4044_v40  ;;  %v4078_v61 = vmul.f32 1.442695, %v4045_v47 }
 0xb2b   : > { %v4001_v16 = vpop.xlane.xlu1 %4000 }
 0xb2c   : > { %7556 = vpow2.f32 %v4076_v31  ;;  %v4046_v56 = vsub.f32 %v9893_v30, %v4001_v16  ;;  %v4047_v32 = vsub.f32 %v9895_v33, %v4001_v16 }
 0xb2d   : > { %7558 = vpow2.f32 %v4078_v61 }
 0xb2e   : > { %v4080_v55 = vmul.f32 1.442695, %v4046_v56  ;;  %v4082_v60 = vmul.f32 1.442695, %v4047_v32 }
 0xb2f   : > { %v4004_v59 = vpop.xlane.xlu0 %4003 }
 0xb30   : > { %7560 = vpow2.f32 %v4080_v55  ;;  %v4048_v22 = vsub.f32 %v9899_v0, %v4004_v59  ;;  %v4049_v58 = vsub.f32 %v9901_v14, %v4004_v59 }
 0xb31   : > { %7562 = vpow2.f32 %v4082_v60 }
 0xb32   : > { %v4084_v20 = vmul.f32 1.442695, %v4048_v22  ;;  %v4086_v25 = vmul.f32 1.442695, %v4049_v58 }
 0xb33   : > { %v4007_v29 = vpop.xlane.xlu1 %4006 }
 0xb34   : > { %7564 = vpow2.f32 %v4084_v20  ;;  %v4050_v35 = vsub.f32 %v9905_v18, %v4007_v29  ;;  %v4051_v30 = vsub.f32 %v9907_v48, %v4007_v29 }
 0xb35   : > { %7566 = vpow2.f32 %v4086_v25 }
 0xb36   : > { %v7557_v33 = vpop.eup %7556  ;;  %v4088_v44 = vmul.f32 1.442695, %v4050_v35  ;;  %v4090_v3 = vmul.f32 1.442695, %v4051_v30 }
 0xb37   : > { %v7559_v63 = vpop.eup %7558  ;;  %v4010_v51 = vpop.xlane.xlu0 %4009 }
 0xb38   : > { %7568 = vpow2.f32 %v4088_v44  ;;  %v4052_v0 = vsub.f32 %v9911_v17, %v4010_v51  ;;  %v4053_v14 = vsub.f32 %v9913_v53, %v4010_v51  ;;  %4285 = vmatprep.mubr.f32.mxu1 %v7559_v63  ;;  %v4140_v41 = vadd.f32 %v7559_v63, %v7557_v33 }
 0xb39   : > { %7570 = vpow2.f32 %v4090_v3  ;;  %4286 = vmatmul.mubr.f32.vlgmr.msra.gmra.mrb[96].mxu1 %v7557_v33 }
 0xb3a   : > { %v7561_v15 = vpop.eup %7560  ;;  %v4092_v34 = vmul.f32 1.442695, %v4052_v0  ;;  %v4094_v18 = vmul.f32 1.442695, %v4053_v14  ;;  %4141 = vadd.xlane.f32.xlu0 %v4140_v41 }
 0xb3b   : > { %v7563_v48 = vpop.eup %7562  ;;  %v4013_v43 = vpop.xlane.xlu1 %4012 }
 0xb3c   : > { %7572 = vpow2.f32 %v4092_v34  ;;  %4290 = vmatprep.mubr.f32.mxu1 %v7563_v48  ;;  %v4054_v5 = vsub.f32 %v9917_v7, %v4013_v43  ;;  %v4055_v46 = vsub.f32 %v9919_v49, %v4013_v43  ;;  %v4143_v36 = vadd.f32 %v7563_v48, %v7561_v15 }
 0xb3d   : > { %7574 = vpow2.f32 %v4094_v18  ;;  %4291 = vmatmul.mubr.f32.gmra.mrb[98].mxu1 %v7561_v15 }
 0xb3e   : > { %v7565_v17 = vpop.eup %7564  ;;  %v4096_v53 = vmul.f32 1.442695, %v4054_v5  ;;  %v4098_v62 = vmul.f32 1.442695, %v4055_v46  ;;  %4144 = vadd.xlane.f32.xlu1 %v4143_v36 }
 0xb3f   : > { %v7567_v4 = vpop.eup %7566  ;;  %v4016_v27 = vpop.xlane.xlu0 %4015 }
 0xb40   : > { %7576 = vpow2.f32 %v4096_v53  ;;  %v4056_v2 = vsub.f32 %v9923_v54, %v4016_v27  ;;  %v4057_v26 = vsub.f32 %v9925_v19, %v4016_v27  ;;  %4295 = vmatprep.mubr.f32.mxu1 %v7567_v4  ;;  %v4146_v28 = vadd.f32 %v7567_v4, %v7565_v17 }
 0xb41   : > { %7578 = vpow2.f32 %v4098_v62  ;;  %4296 = vmatmul.mubr.f32.gmra.mrb[100].mxu1 %v7565_v17 }
 0xb42   : > { %v7569_v7 = vpop.eup %7568  ;;  %v4100_v49 = vmul.f32 1.442695, %v4056_v2  ;;  %v4102_v21 = vmul.f32 1.442695, %v4057_v26  ;;  %4147 = vadd.xlane.f32.xlu0 %v4146_v28 }
 0xb43   : > { %v7571_v40 = vpop.eup %7570  ;;  %v4019_v47 = vpop.xlane.xlu1 %4018 }
 0xb44   : > { %7580 = vpow2.f32 %v4100_v49  ;;  %4300 = vmatprep.mubr.f32.mxu1 %v7571_v40  ;;  %v4058_v31 = vsub.f32 %v9929_v13, %v4019_v47  ;;  %v4059_v61 = vsub.f32 %v9931_v9, %v4019_v47  ;;  %v4149_v16 = vadd.f32 %v7571_v40, %v7569_v7 }
 0xb45   : > { %7582 = vpow2.f32 %v4102_v21  ;;  %4301 = vmatmul.mubr.f32.gmra.mrb[102].mxu1 %v7569_v7 }
 0xb46   : > { %v7573_v54 = vpop.eup %7572  ;;  %v4104_v19 = vmul.f32 1.442695, %v4058_v31  ;;  %v4106_v56 = vmul.f32 1.442695, %v4059_v61  ;;  %4150 = vadd.xlane.f32.xlu1 %v4149_v16 }
 0xb47   : > { %v7575_v32 = vpop.eup %7574  ;;  %v4022_v55 = vpop.xlane.xlu0 %4021 }
 0xb48   : > { %7584 = vpow2.f32 %v4104_v19  ;;  %v4060_v60 = vsub.f32 %v9935_v23, %v4022_v55  ;;  %v4061_v59 = vsub.f32 %v9937_v50, %v4022_v55  ;;  %4305 = vmatprep.mubr.f32.mxu1 %v7575_v32  ;;  %v4152_v22 = vadd.f32 %v7575_v32, %v7573_v54 }
 0xb49   : > { %7586 = vpow2.f32 %v4106_v56  ;;  %4306 = vmatmul.mubr.f32.gmra.mrb[104].mxu1 %v7573_v54 }
 0xb4a   : > { %v7577_v13 = vpop.eup %7576  ;;  %v4108_v9 = vmul.f32 1.442695, %v4060_v60  ;;  %v4110_v58 = vmul.f32 1.442695, %v4061_v59  ;;  %4153 = vadd.xlane.f32.xlu0 %v4152_v22 }
 0xb4b   : > { %v7579_v20 = vpop.eup %7578  ;;  %v4025_v25 = vpop.xlane.xlu1 %4024 }
 0xb4c   : > { %7588 = vpow2.f32 %v4108_v9  ;;  %4310 = vmatprep.mubr.f32.mxu1 %v7579_v20  ;;  %v4062_v29 = vsub.f32 %v9941_v1, %v4025_v25  ;;  %v4063_v35 = vsub.f32 %v9943_v39, %v4025_v25  ;;  %v4155_v30 = vadd.f32 %v7579_v20, %v7577_v13 }
 0xb4d   : > { %7590 = vpow2.f32 %v4110_v58  ;;  %4311 = vmatmul.mubr.f32.gmra.mrb[106].mxu1 %v7577_v13 }
 0xb4e   : > { %v7581_v23 = vpop.eup %7580  ;;  %v4112_v50 = vmul.f32 1.442695, %v4062_v29  ;;  %v4114_v33 = vmul.f32 1.442695, %v4063_v35  ;;  %4156 = vadd.xlane.f32.xlu1 %v4155_v30  ;;  %v5881_v35 = vld [vmem:[%s10376_s3 + $0x40] sm:$0xff]  ;;  %v5882_v30 = vld [vmem:[%s10376_s3 + $0x48] sm:$0xff] }
 0xb4f   : > { %v7583_v44 = vpop.eup %7582  ;;  %v4028_v3 = vpop.xlane.xlu0 %4027 }
 0xb50   : > { %7592 = vpow2.f32 %v4112_v50  ;;  %v4064_v63 = vsub.f32 %v9947_v57, %v4028_v3  ;;  %v4065_v51 = vsub.f32 %v9949_v6, %v4028_v3  ;;  %4315 = vmatprep.mubr.f32.mxu1 %v7583_v44  ;;  %v4158_v0 = vadd.f32 %v7583_v44, %v7581_v23  ;;  %v5883_v50 = vld [vmem:[%s10376_s3 + $0x50] sm:$0xff]  ;;  %v5201_v3 = vld [vmem:[#allocation3 + $0x380] sm:$0xff] }
 0xb51   : > { %7594 = vpow2.f32 %v4114_v33  ;;  %4316 = vmatmul.mubr.f32.gmra.mrb[108].mxu1 %v7581_v23  ;;  %v7105_v23 = vpack.c.bf16 %v5882_v30, %v5881_v35  ;;  %v5884_v33 = vld [vmem:[%s10376_s3 + $0x58] sm:$0xff]  ;;  %v5197_v30 = vld [vmem:[#allocation3 + $0x360] sm:$0xff] }
 0xb52   : > { %v7585_v1 = vpop.eup %7584  ;;  %v4116_v39 = vmul.f32 1.442695, %v4064_v63  ;;  %v4118_v14 = vmul.f32 1.442695, %v4065_v51  ;;  %4159 = vadd.xlane.f32.xlu0 %v4158_v0  ;;  %v7109_v44 = vpack.c.bf16 %v5884_v33, %v5883_v50  ;;  %v5202_v63 = vld [vmem:[#allocation3 + $0x388] sm:$0xff]  ;;  %v5185_v0 = vld [vmem:[#allocation3 + $0x300] sm:$0xff] }
 0xb53   : > { %v7587_v41 = vpop.eup %7586  ;;  %v4031_v15 = vpop.xlane.xlu1 %4030  ;;  %7106 = vmatprep.subr.bf16.mxu1 %v7105_v23  ;;  %v7153_v51 = vpack.c.bf16 %v5202_v63, %v5201_v3  ;;  %v5215_v3 = vld [vmem:[#allocation3 + $0x3f0] sm:$0xff]  ;;  %v5216_v63 = vld [vmem:[#allocation3 + $0x3f8] sm:$0xff] }
 0xb54   : > { %7596 = vpow2.f32 %v4116_v39  ;;  %4320 = vmatprep.mubr.f32.mxu1 %v7587_v41  ;;  %v4066_v34 = vsub.f32 %v9953_v12, %v4031_v15  ;;  %v4067_v18 = vsub.f32 %v9955_v52, %v4031_v15  ;;  %v4161_v48 = vadd.f32 %v7587_v41, %v7585_v1  ;;  %7108 = vmatpush3.bf16.msra.mxu1 %v7105_v23  ;;  %v5203_v15 = vld [vmem:[#allocation3 + $0x390] sm:$0xff]  ;;  %v5198_v23 = vld [vmem:[#allocation3 + $0x368] sm:$0xff] }
 0xb55   : > { %7598 = vpow2.f32 %v4118_v14  ;;  %4321 = vmatmul.mubr.f32.gmra.mrb[110].mxu1 %v7585_v1  ;;  %7110 = vmatprep.subr.bf16.mxu1 %v7109_v44  ;;  %v5186_v1 = vld [vmem:[#allocation3 + $0x308] sm:$0xff]  ;;  %v10135_v33 = vpack.c.bf16 %v5198_v23, %v5197_v30 }
 0xb56   : > { %v7589_v57 = vpop.eup %7588  ;;  %v4120_v6 = vmul.f32 1.442695, %v4066_v34  ;;  %v4122_v43 = vmul.f32 1.442695, %v4067_v18  ;;  %4162 = vadd.xlane.f32.xlu1 %v4161_v48  ;;  %7154 = vmatprep.subr.bf16.mxu0 %v7153_v51  ;;  %v10058_v39 = vpack.c.bf16 %v5186_v1, %v5185_v0  ;;  %v5204_v34 = vld [vmem:[#allocation3 + $0x398] sm:$0xff]  ;;  %v10143_v0 = vpack.c.bf16 %v5216_v63, %v5215_v3  ;;  %v5199_v1 = vld [vmem:[#allocation3 + $0x370] sm:$0xff] }
 0xb57   : > { %v7591_v5 = vpop.eup %7590  ;;  %v4034_v46 = vpop.xlane.xlu0 %4033  ;;  %v10067_v48 = vpack.c.bf16 %v5204_v34, %v5203_v15  ;;  %v5200_v15 = vld [vmem:[#allocation3 + $0x378] sm:$0xff] }
 0xb58   : > { %7600 = vpow2.f32 %v4120_v6  ;;  %v4068_v36 = vsub.f32 %v9959_v37, %v4034_v46  ;;  %v4069_v17 = vsub.f32 %v9961_v10, %v4034_v46  ;;  %4325 = vmatprep.mubr.f32.mxu1 %v7591_v5  ;;  %v4164_v53 = vadd.f32 %v7591_v5, %v7589_v57  ;;  %7112 = vmatpush3.bf16.msra.mxu1 %v7109_v44  ;;  %v5188_v5 = vld [vmem:[#allocation3 + $0x318] sm:$0xff] }
 0xb59   : > { %7602 = vpow2.f32 %v4122_v43  ;;  %4326 = vmatmul.mubr.f32.gmra.mrb[112].mxu1 %v7589_v57  ;;  %7209 = vmatprep.subr.bf16.mxu1 %v7153_v51  ;;  %v5187_v43 = vld [vmem:[#allocation3 + $0x310] sm:$0xff] }
 0xb5a   : > { %v7593_v12 = vpop.eup %7592  ;;  %v4124_v52 = vmul.f32 1.442695, %v4068_v36  ;;  %v4126_v62 = vmul.f32 1.442695, %v4069_v17  ;;  %4165 = vadd.xlane.f32.xlu0 %v4164_v53  ;;  %7156 = vmatpush3.bf16.msra.mxu0 %v10058_v39  ;;  %v10076_v36 = vpack.c.bf16 %v5188_v5, %v5187_v43  ;;  %v5205_v53 = vld [vmem:[#allocation3 + $0x3a0] sm:$0xff] }
 0xb5b   : > { %v7595_v4 = vpop.eup %7594  ;;  %v4037_v27 = vpop.xlane.xlu1 %4036  ;;  %7158 = vmatprep.subr.bf16.mxu0 %v10067_v48 }
 0xb5c   : > { %7604 = vpow2.f32 %v4124_v52  ;;  %4330 = vmatprep.mubr.f32.mxu1 %v7595_v4  ;;  %v4070_v2 = vsub.f32 %v9965_v45, %v4037_v27  ;;  %v4071_v26 = vsub.f32 %v9967_v38, %v4037_v27  ;;  %v4167_v28 = vadd.f32 %v7595_v4, %v7593_v12  ;;  %v5189_v4 = vld [vmem:[#allocation3 + $0x320] sm:$0xff]  ;;  %v5190_v27 = vld [vmem:[#allocation3 + $0x328] sm:$0xff] }
 0xb5d   : > { %7606 = vpow2.f32 %v4126_v62  ;;  %4331 = vmatmul.mubr.f32.gmra.mrb[114].mxu1 %v7593_v12  ;;  %v5206_v12 = vld [vmem:[#allocation3 + $0x3a8] sm:$0xff] }
 0xb5e   : > { %v7597_v37 = vpop.eup %7596  ;;  %v4128_v10 = vmul.f32 1.442695, %v4070_v2  ;;  %v4130_v7 = vmul.f32 1.442695, %v4071_v26  ;;  %4168 = vadd.xlane.f32.xlu1 %v4167_v28  ;;  %7160 = vmatpush3.bf16.msra.mxu0 %v10076_v36  ;;  %v10083_v62 = vpack.c.bf16 %v5206_v12, %v5205_v53  ;;  %v10087_v26 = vpack.c.bf16 %v5190_v27, %v5189_v4 }
 0xb5f   : > { %v7599_v49 = vpop.eup %7598  ;;  %v4040_v21 = vpop.xlane.xlu0 %4039 }
 0xb60   : > { %7608 = vpow2.f32 %v4128_v10  ;;  %v4072_v40 = vsub.f32 %v9971_v11, %v4040_v21  ;;  %v4073_v47 = vsub.f32 %v9973_v8, %v4040_v21  ;;  %4335 = vmatprep.mubr.f32.mxu1 %v7599_v49  ;;  %v4170_v31 = vadd.f32 %v7599_v49, %v7597_v37  ;;  %7162 = vmatprep.subr.bf16.mxu0 %v10083_v62  ;;  %v5208_v10 = vld [vmem:[#allocation3 + $0x3b8] sm:$0xff]  ;;  %v5191_v21 = vld [vmem:[#allocation3 + $0x330] sm:$0xff] }
 0xb61   : > { %7610 = vpow2.f32 %v4130_v7  ;;  %4336 = vmatmul.mubr.f32.gmra.mrb[116].mxu1 %v7597_v37  ;;  %v5207_v37 = vld [vmem:[#allocation3 + $0x3b0] sm:$0xff] }
 0xb62   : > { %v7601_v45 = vpop.eup %7600  ;;  %v4132_v38 = vmul.f32 1.442695, %v4072_v40  ;;  %v4134_v61 = vmul.f32 1.442695, %v4073_v47  ;;  %4171 = vadd.xlane.f32.xlu0 %v4170_v31  ;;  %7164 = vmatpush3.bf16.msra.mxu0 %v10087_v26  ;;  %v10095_v49 = vpack.c.bf16 %v5208_v10, %v5207_v37  ;;  %v5192_v40 = vld [vmem:[#allocation3 + $0x338] sm:$0xff] }
 0xb63   : > { %v7603_v16 = vpop.eup %7602  ;;  %v4043_v54 = vpop.xlane.xlu1 %4042  ;;  %v10099_v31 = vpack.c.bf16 %v5192_v40, %v5191_v21 }
 0xb64   : > { %7612 = vpow2.f32 %v4132_v38  ;;  %4340 = vmatprep.mubr.f32.mxu1 %v7603_v16  ;;  %v4074_v19 = vsub.f32 %v9977_v42, %v4043_v54  ;;  %v4075_v56 = vsub.f32 %v9979_v24, %v4043_v54  ;;  %v4173_v32 = vadd.f32 %v7603_v16, %v7601_v45  ;;  %7166 = vmatprep.subr.bf16.mxu0 %v10095_v49  ;;  %v5209_v38 = vld [vmem:[#allocation3 + $0x3c0] sm:$0xff] }
 0xb65   : > { %7614 = vpow2.f32 %v4134_v61  ;;  %4341 = vmatmul.mubr.f32.gmra.mrb[118].mxu1 %v7601_v45  ;;  %v5210_v61 = vld [vmem:[#allocation3 + $0x3c8] sm:$0xff] }
 0xb66   : > { %v7605_v11 = vpop.eup %7604  ;;  %v4136_v8 = vmul.f32 1.442695, %v4074_v19  ;;  %v4138_v55 = vmul.f32 1.442695, %v4075_v56  ;;  %4174 = vadd.xlane.f32.xlu1 %v4173_v32  ;;  %7168 = vmatpush3.bf16.msra.mxu0 %v10099_v31  ;;  %v10107_v54 = vpack.c.bf16 %v5210_v61, %v5209_v38  ;;  %v5193_v19 = vld [vmem:[#allocation3 + $0x340] sm:$0xff]  ;;  %v5194_v56 = vld [vmem:[#allocation3 + $0x348] sm:$0xff] }
 0xb67   : > { %v7607_v60 = vpop.eup %7606 }
 0xb68   : > { %7616 = vpow2.f32 %v4136_v8  ;;  %4345 = vmatprep.mubr.f32.mxu1 %v7607_v60  ;;  %v4176_v59 = vadd.f32 %v7607_v60, %v7605_v11  ;;  %7170 = vmatprep.subr.bf16.mxu0 %v10107_v54  ;;  %v5212_v60 = vld [vmem:[#allocation3 + $0x3d8] sm:$0xff] }
 0xb69   : > { %7618 = vpow2.f32 %v4138_v55  ;;  %4346 = vmatmul.mubr.f32.gmra.mrb[120].mxu1 %v7605_v11  ;;  %v10111_v11 = vpack.c.bf16 %v5194_v56, %v5193_v19  ;;  %v5211_v55 = vld [vmem:[#allocation3 + $0x3d0] sm:$0xff] }
 0xb6a   : > { %v7609_v22 = vpop.eup %7608  ;;  %4177 = vadd.xlane.f32.xlu0 %v4176_v59 }
 0xb6b   : > { %v7611_v13 = vpop.eup %7610  ;;  %7172 = vmatpush3.bf16.msra.mxu0 %v10111_v11 }
 0xb6c   : > { %4350 = vmatprep.mubr.f32.mxu1 %v7611_v13  ;;  %v4179_v42 = vadd.f32 %v7611_v13, %v7609_v22  ;;  %v5195_v13 = vld [vmem:[#allocation3 + $0x350] sm:$0xff] }
 0xb6d   : > { %4351 = vmatmul.mubr.f32.gmra.mrb[122].mxu1 %v7609_v22  ;;  %v10119_v22 = vpack.c.bf16 %v5212_v60, %v5211_v55 }
 0xb6e   : > { %v7613_v24 = vpop.eup %7612  ;;  %4180 = vadd.xlane.f32.xlu1 %v4179_v42  ;;  %v5196_v42 = vld [vmem:[#allocation3 + $0x358] sm:$0xff] }
 0xb6f   : > { %v7615_v9 = vpop.eup %7614  ;;  %7174 = vmatprep.subr.bf16.mxu0 %v10119_v22 }
 0xb70   : > { %4355 = vmatprep.mubr.f32.mxu1 %v7615_v9  ;;  %v4182_v58 = vadd.f32 %v7615_v9, %v7613_v24  ;;  %v10123_v9 = vpack.c.bf16 %v5196_v42, %v5195_v13 }
 0xb71   : > { %4356 = vmatmul.mubr.f32.gmra.mrb[124].mxu1 %v7613_v24 }
 0xb72   : > { %v7617_v20 = vpop.eup %7616  ;;  %4183 = vadd.xlane.f32.xlu0 %v4182_v58  ;;  %7176 = vmatpush3.bf16.msra.mxu0 %v10123_v9 }
 0xb73   : > { %v7619_v25 = vpop.eup %7618 }
 0xb74   : > { %4360 = vmatprep.mubr.f32.mxu1 %v7619_v25  ;;  %v4185_v29 = vadd.f32 %v7619_v25, %v7617_v20  ;;  %v5214_v25 = vld [vmem:[#allocation3 + $0x3e8] sm:$0xff] }
 0xb75   : > { %4361 = vmatmul.mubr.f32.gmra.mrb[126].mxu1 %v7617_v20  ;;  %v5213_v20 = vld [vmem:[#allocation3 + $0x3e0] sm:$0xff] }
 0xb76   : > { %4186 = vadd.xlane.f32.xlu1 %v4185_v29  ;;  %v10131_v35 = vpack.c.bf16 %v5214_v25, %v5213_v20 }
 0xb78   : > { %7178 = vmatprep.subr.bf16.mxu0 %v10131_v35 }
 0xb79   : > { %7180 = vmatpush3.bf16.msra.mxu0 %v10135_v33 }
 0xb7a   : > { %7182 = vmatprep.subr.bf16.mxu0 %v10143_v0 }
 0xbab   : > { %v10060_v14 = vpop.f32.mrb[144].mxu0 }
 0xbac   : > { %v10063_v41 = vpop.f32.mrb[145].mxu0 }
 0xbad   : > { %v4992_v18 = vmax.f32 %v10060_v14, %v10063_v41 }
 0xbaf   : > { %v10069_v57 = vpop.f32.mrb[146].mxu0  ;;  %4993 = vmax.xlane.f32.xlu1 %v4992_v18  ;;  %v10147_v18 = vpack.c.bf16 %v5200_v15, %v5199_v1 }
 0xbb0   : > { %v10072_v6 = vpop.f32.mrb[147].mxu0 }
 0xbb1   : > { %v4995_v46 = vmax.f32 %v10069_v57, %v10072_v6  ;;  %7184 = vmatpush3.bf16.msra.mxu0 %v10147_v18 }
 0xbb3   : > { %v10078_v17 = vpop.f32.mrb[148].mxu0  ;;  %4996 = vmax.xlane.f32.xlu1 %v4995_v46 }
 0xbb4   : > { %v10081_v52 = vpop.f32.mrb[149].mxu0 }
 0xbb5   : > { %v4998_v2 = vmax.f32 %v10078_v17, %v10081_v52 }
 0xbb7   : > { %v10090_v28 = vpop.f32.mrb[150].mxu0  ;;  %4999 = vmax.xlane.f32.xlu1 %v4998_v2 }
 0xbb8   : > { %v10093_v7 = vpop.f32.mrb[151].mxu0 }
 0xbb9   : > { %v5001_v47 = vmax.f32 %v10090_v28, %v10093_v7 }
 0xbbb   : > { %v10102_v45 = vpop.f32.mrb[152].mxu0  ;;  %5002 = vmax.xlane.f32.xlu1 %v5001_v47 }
 0xbbc   : > { %v10105_v16 = vpop.f32.mrb[153].mxu0 }
 0xbbd   : > { %v5004_v32 = vmax.f32 %v10102_v45, %v10105_v16 }
 0xbbf   : > { %v10114_v8 = vpop.f32.mrb[154].mxu0  ;;  %5005 = vmax.xlane.f32.xlu1 %v5004_v32 }
 0xbc0   : > { %v10117_v59 = vpop.f32.mrb[155].mxu0 }
 0xbc1   : > { %v5007_v24 = vmax.f32 %v10114_v8, %v10117_v59 }
 0xbc3   : > { %5008 = vmax.xlane.f32.xlu0 %v5007_v24  ;;  %v10126_v58 = vpop.f32.mrb[156].mxu0 }
 0xbc4   : > { %v10129_v29 = vpop.f32.mrb[157].mxu0 }
 0xbc5   : > { %v5010_v50 = vmax.f32 %v10126_v58, %v10129_v29 }
 0xbc7   : > { %5011 = vmax.xlane.f32.xlu0 %v5010_v50  ;;  %v10138_v44 = vpop.f32.mrb[158].mxu0  ;;  %v4142_v25 = vpop.xlane.xlu0 %4141 }
 0xbc8   : > { %v10141_v51 = vpop.f32.mrb[159].mxu0  ;;  %7620 = vrcp.f32 %v4142_v25 }
 0xbc9   : > { %v5013_v34 = vmax.f32 %v10138_v44, %v10141_v51 }
 0xbcb   : > { %5014 = vmax.xlane.f32.xlu0 %v5013_v34  ;;  %v10150_v43 = vpop.f32.mrb[160].mxu0  ;;  %v4145_v30 = vpop.xlane.xlu1 %4144 }
 0xbcc   : > { %v10153_v5 = vpop.f32.mrb[161].mxu0  ;;  %7622 = vrcp.f32 %v4145_v30 }
 0xbcd   : > { %v5016_v46 = vmax.f32 %v10150_v43, %v10153_v5 }
 0xbcf   : > { %5017 = vmax.xlane.f32.xlu0 %v5016_v46  ;;  %v10157_v53 = vpop.f32.mrb[162].mxu0  ;;  %v4148_v23 = vpop.xlane.xlu0 %4147 }
 0xbd0   : > { %v10159_v12 = vpop.f32.mrb[163].mxu0  ;;  %7624 = vrcp.f32 %v4148_v23 }
 0xbd1   : > { %v5019_v4 = vmax.f32 %v10157_v53, %v10159_v12 }
 0xbd2   : > { %v7621_v15 = vpop.eup %7620 }
 0xbd3   : > { %5020 = vmax.xlane.f32.xlu0 %v5019_v4  ;;  %v10163_v27 = vpop.f32.mrb[164].mxu0  ;;  %v4151_v63 = vpop.xlane.xlu1 %4150 }
 0xbd4   : > { %v10165_v2 = vpop.f32.mrb[165].mxu0  ;;  %7626 = vrcp.f32 %v4151_v63 }
 0xbd5   : > { %v5022_v37 = vmax.f32 %v10163_v27, %v10165_v2 }
 0xbd7   : > { %5023 = vmax.xlane.f32.xlu0 %v5022_v37  ;;  %v10169_v10 = vpop.f32.mrb[166].mxu0  ;;  %v4154_v37 = vpop.xlane.xlu0 %4153 }
 0xbd8   : > { %v10171_v21 = vpop.f32.mrb[167].mxu0  ;;  %7628 = vrcp.f32 %v4154_v37 }
 0xbd9   : > { %v5025_v40 = vmax.f32 %v10169_v10, %v10171_v21 }
 0xbdb   : > { %v10175_v47 = vpop.f32.mrb[168].mxu0  ;;  %5026 = vmax.xlane.f32.xlu1 %v5025_v40  ;;  %v4157_v25 = vpop.xlane.xlu1 %4156 }
 0xbdc   : > { %v10177_v38 = vpop.f32.mrb[169].mxu0  ;;  %7630 = vrcp.f32 %v4157_v25 }
 0xbdd   : > { %v5028_v61 = vmax.f32 %v10175_v47, %v10177_v38 }
 0xbdf   : > { %5029 = vmax.xlane.f32.xlu0 %v5028_v61  ;;  %v10181_v19 = vpop.f32.mrb[170].mxu0  ;;  %v7623_v61 = vpop.eup %7622 }
 0xbe0   : > { %v10183_v56 = vpop.f32.mrb[171].mxu0  ;;  %v7625_v23 = vpop.eup %7624 }
 0xbe1   : > { %v5031_v32 = vmax.f32 %v10181_v19, %v10183_v56 }
 0xbe3   : > { %v10187_v55 = vpop.f32.mrb[172].mxu0  ;;  %5032 = vmax.xlane.f32.xlu1 %v5031_v32 }
 0xbe4   : > { %v10189_v60 = vpop.f32.mrb[173].mxu0 }
 0xbe5   : > { %v5034_v13 = vmax.f32 %v10187_v55, %v10189_v60 }
 0xbe7   : > { %5035 = vmax.xlane.f32.xlu0 %v5034_v13  ;;  %v10193_v42 = vpop.f32.mrb[174].mxu0 }
 0xbe8   : > { %v10195_v24 = vpop.f32.mrb[175].mxu0 }
 0xbe9   : > { %v5037_v20 = vmax.f32 %v10193_v42, %v10195_v24 }
 0xbeb   : > { %5038 = vmax.xlane.f32.xlu1 %v5037_v20 }
 0xc0c   : > { %v6289_v50 = vpop.f32.mrb[96].mxu1 }
 0xc0d   : > { %v6290_v3 = vpop.f32.mrb[97].mxu1 }
 0xc0e   : > { %v6291_v1 = vadd.f32 %v6290_v3, %v6289_v50 }
 0xc10   : > { %v4382_v34 = vmul.f32 %v7621_v15, %v6291_v1  ;;  %v6292_v46 = vpop.f32.mrb[98].mxu1  ;;  %v4160_v1 = vpop.xlane.xlu0 %4159 }
 0xc11   : > { %v6293_v4 = vpop.f32.mrb[99].mxu1  ;;  %7632 = vrcp.f32 %v4160_v1 }
 0xc12   : > { %v6294_v40 = vadd.f32 %v6293_v4, %v6292_v46  ;;  %6729 = vmatprep.mubr.msk.f32.mxu1 %vm1828_vm1, %v4382_v34  ;;  %v7627_v34 = vpop.eup %7626 }
 0xc14   : > { %v4383_v32 = vmul.f32 %v7623_v61, %v6294_v40  ;;  %v6295_v13 = vpop.f32.mrb[100].mxu1 }
 0xc15   : > { %v6296_v20 = vpop.f32.mrb[101].mxu1 }
 0xc16   : > { %v6297_v30 = vadd.f32 %v6296_v20, %v6295_v13  ;;  %6730 = vmatmul.mubr.msk.f32.vlgmr.msra.gmra.mrb[80].mxu1 %vm1828_vm1, %v4383_v32 }
 0xc17   : > { %7217 = vmatpush3.bf16.msra.mxu1 %v10058_v39  ;;  %v4163_v39 = vpop.xlane.xlu1 %4162 }
 0xc18   : > { %v4384_v50 = vmul.f32 %v7625_v23, %v6297_v30  ;;  %v6298_v3 = vpop.f32.mrb[102].mxu1  ;;  %7210 = vmatprep.subr.bf16.mxu1 %v10067_v48  ;;  %v7629_v48 = vpop.eup %7628  ;;  %7634 = vrcp.f32 %v4163_v39 }
 0xc19   : > { %v6299_v63 = vpop.f32.mrb[103].mxu1 }
 0xc1a   : > { %v6300_v15 = vadd.f32 %v6299_v63, %v6298_v3  ;;  %6732 = vmatprep.mubr.msk.f32.mxu1 %vm1828_vm1, %v4384_v50 }
 0xc1b   : > { %7218 = vmatpush3.bf16.msra.mxu1 %v10076_v36  ;;  %v4166_v36 = vpop.xlane.xlu0 %4165 }
 0xc1c   : > { %v4385_v46 = vmul.f32 %v7627_v34, %v6300_v15  ;;  %v6301_v4 = vpop.f32.mrb[104].mxu1  ;;  %7211 = vmatprep.subr.bf16.mxu1 %v10083_v62  ;;  %v7631_v62 = vpop.eup %7630  ;;  %7636 = vrcp.f32 %v4166_v36 }
 0xc1d   : > { %v6302_v37 = vpop.f32.mrb[105].mxu1 }
 0xc1e   : > { %v6303_v40 = vadd.f32 %v6302_v37, %v6301_v4  ;;  %6733 = vmatmul.mubr.msk.f32.gmra.mrb[82].mxu1 %vm1828_vm1, %v4385_v46 }
 0xc1f   : > { %7219 = vmatpush3.bf16.msra.mxu1 %v10087_v26  ;;  %v4169_v26 = vpop.xlane.xlu1 %4168 }
 0xc20   : > { %v4386_v61 = vmul.f32 %v7629_v48, %v6303_v40  ;;  %v6304_v32 = vpop.f32.mrb[106].mxu1  ;;  %7212 = vmatprep.subr.bf16.mxu1 %v10095_v49  ;;  %v7633_v49 = vpop.eup %7632  ;;  %7638 = vrcp.f32 %v4169_v26 }
 0xc21   : > { %v6305_v13 = vpop.f32.mrb[107].mxu1 }
 0xc22   : > { %v6306_v20 = vadd.f32 %v6305_v13, %v6304_v32  ;;  %6735 = vmatprep.mubr.msk.f32.mxu1 %vm1828_vm1, %v4386_v61 }
 0xc23   : > { %7220 = vmatpush3.bf16.msra.mxu1 %v10099_v31  ;;  %v4172_v31 = vpop.xlane.xlu0 %4171 }
 0xc24   : > { %v4387_v25 = vmul.f32 %v7631_v62, %v6306_v20  ;;  %v6307_v30 = vpop.f32.mrb[108].mxu1  ;;  %7213 = vmatprep.subr.bf16.mxu1 %v10107_v54  ;;  %v7635_v54 = vpop.eup %7634  ;;  %7640 = vrcp.f32 %v4172_v31 }
 0xc25   : > { %v6308_v23 = vpop.f32.mrb[109].mxu1 }
 0xc26   : > { %v6309_v50 = vadd.f32 %v6308_v23, %v6307_v30  ;;  %6736 = vmatmul.mubr.msk.f32.gmra.mrb[84].mxu1 %vm1828_vm1, %v4387_v25 }
 0xc27   : > { %7221 = vmatpush3.bf16.msra.mxu1 %v10111_v11  ;;  %v4175_v11 = vpop.xlane.xlu1 %4174 }
 0xc28   : > { %v4388_v3 = vmul.f32 %v7633_v49, %v6309_v50  ;;  %v6310_v63 = vpop.f32.mrb[110].mxu1  ;;  %7214 = vmatprep.subr.bf16.mxu1 %v10119_v22  ;;  %v7637_v22 = vpop.eup %7636  ;;  %7642 = vrcp.f32 %v4175_v11 }
 0xc29   : > { %v6311_v1 = vpop.f32.mrb[111].mxu1 }
 0xc2a   : > { %v6312_v15 = vadd.f32 %v6311_v1, %v6310_v63  ;;  %6738 = vmatprep.mubr.msk.f32.mxu1 %vm1828_vm1, %v4388_v3 }
 0xc2b   : > { %7222 = vmatpush3.bf16.msra.mxu1 %v10123_v9  ;;  %v4178_v9 = vpop.xlane.xlu0 %4177  ;;  %v4181_v32 = vpop.xlane.xlu1 %4180 }
 0xc2c   : > { %v4389_v34 = vmul.f32 %v7635_v54, %v6312_v15  ;;  %v6313_v46 = vpop.f32.mrb[112].mxu1  ;;  %7215 = vmatprep.subr.bf16.mxu1 %v10131_v35  ;;  %v7639_v35 = vpop.eup %7638  ;;  %7644 = vrcp.f32 %v4178_v9 }
 0xc2d   : > { %v6314_v4 = vpop.f32.mrb[113].mxu1  ;;  %7646 = vrcp.f32 %v4181_v32 }
 0xc2e   : > { %v6315_v37 = vadd.f32 %v6314_v4, %v6313_v46  ;;  %6739 = vmatmul.mubr.msk.f32.gmra.mrb[86].mxu1 %vm1828_vm1, %v4389_v34 }
 0xc2f   : > { %7223 = vmatpush3.bf16.msra.mxu1 %v10135_v33  ;;  %v7641_v33 = vpop.eup %7640  ;;  %v4187_v25 = vpop.xlane.xlu1 %4186 }
 0xc30   : > { %v4390_v39 = vmul.f32 %v7637_v22, %v6315_v37  ;;  %v6316_v40 = vpop.f32.mrb[114].mxu1  ;;  %7216 = vmatprep.subr.bf16.mxu1 %v10143_v0  ;;  %v4184_v26 = vpop.xlane.xlu0 %4183 }
 0xc31   : > { %v6317_v48 = vpop.f32.mrb[115].mxu1  ;;  %7648 = vrcp.f32 %v4184_v26 }
 0xc32   : > { %v6318_v61 = vadd.f32 %v6317_v48, %v6316_v40  ;;  %6741 = vmatprep.mubr.msk.f32.mxu1 %vm1828_vm1, %v4390_v39  ;;  %v7643_v49 = vpop.eup %7642  ;;  %7650 = vrcp.f32 %v4187_v25 }
 0xc33   : > { %7224 = vmatpush3.bf16.msra.mxu1 %v10147_v18 }
 0xc34   : > { %v4391_v13 = vmul.f32 %v7639_v35, %v6318_v61  ;;  %v6319_v36 = vpop.f32.mrb[116].mxu1 }
 0xc35   : > { %v6320_v20 = vpop.f32.mrb[117].mxu1 }
 0xc36   : > { %v6321_v62 = vadd.f32 %v6320_v20, %v6319_v36  ;;  %6742 = vmatmul.mubr.msk.f32.gmra.mrb[88].mxu1 %vm1828_vm1, %v4391_v13  ;;  %v7645_v34 = vpop.eup %7644 }
 0xc38   : > { %v4392_v0 = vmul.f32 %v7641_v33, %v6321_v62  ;;  %v6322_v30 = vpop.f32.mrb[118].mxu1 }
 0xc39   : > { %v6323_v23 = vpop.f32.mrb[119].mxu1 }
 0xc3a   : > { %v6324_v50 = vadd.f32 %v6323_v23, %v6322_v30  ;;  %6744 = vmatprep.mubr.msk.f32.mxu1 %vm1828_vm1, %v4392_v0 }
 0xc3c   : > { %v4393_v18 = vmul.f32 %v7643_v49, %v6324_v50  ;;  %v6325_v3 = vpop.f32.mrb[120].mxu1  ;;  %v4994_v63 = vpop.xlane.xlu1 %4993 }
 0xc3d   : > { %v6326_v1 = vpop.f32.mrb[121].mxu1  ;;  %v5040_v31 = vsub.f32 %v10060_v14, %v4994_v63  ;;  %v5041_v15 = vsub.f32 %v10063_v41, %v4994_v63  ;;  %v7647_v41 = vpop.eup %7646 }
 0xc3e   : > { %v6327_v54 = vadd.f32 %v6326_v1, %v6325_v3  ;;  %6745 = vmatmul.mubr.msk.f32.gmra.mrb[90].mxu1 %vm1828_vm1, %v4393_v18 }
 0xc3f   : > { %v5072_v46 = vmul.f32 1.442695, %v5040_v31  ;;  %v5074_v4 = vmul.f32 1.442695, %v5041_v15 }
 0xc40   : > { %v4394_v11 = vmul.f32 %v7645_v34, %v6327_v54  ;;  %v6328_v37 = vpop.f32.mrb[122].mxu1  ;;  %v4997_v22 = vpop.xlane.xlu1 %4996 }
 0xc41   : > { %7652 = vpow2.f32 %v5072_v46  ;;  %v6329_v39 = vpop.f32.mrb[123].mxu1  ;;  %v5042_v40 = vsub.f32 %v10069_v57, %v4997_v22  ;;  %v5043_v48 = vsub.f32 %v10072_v6, %v4997_v22  ;;  %v7649_v6 = vpop.eup %7648 }
 0xc42   : > { %7654 = vpow2.f32 %v5074_v4  ;;  %v6330_v14 = vadd.f32 %v6329_v39, %v6328_v37  ;;  %6747 = vmatprep.mubr.msk.f32.mxu1 %vm1828_vm1, %v4394_v11  ;;  %v7651_v18 = vpop.eup %7650 }
 0xc43   : > { %v5076_v9 = vmul.f32 1.442695, %v5042_v40  ;;  %v5078_v61 = vmul.f32 1.442695, %v5043_v48 }
 0xc44   : > { %v4395_v35 = vmul.f32 %v7647_v41, %v6330_v14  ;;  %v6331_v32 = vpop.f32.mrb[124].mxu1  ;;  %v5000_v13 = vpop.xlane.xlu1 %4999 }
 0xc45   : > { %7656 = vpow2.f32 %v5076_v9  ;;  %v6332_v36 = vpop.f32.mrb[125].mxu1  ;;  %v5044_v20 = vsub.f32 %v10078_v17, %v5000_v13  ;;  %v5045_v62 = vsub.f32 %v10081_v52, %v5000_v13 }
 0xc46   : > { %7658 = vpow2.f32 %v5078_v61  ;;  %v6333_v57 = vadd.f32 %v6332_v36, %v6331_v32  ;;  %6748 = vmatmul.mubr.msk.f32.gmra.mrb[92].mxu1 %vm1828_vm1, %v4395_v35 }
 0xc47   : > { %v5080_v33 = vmul.f32 1.442695, %v5044_v20  ;;  %v5082_v25 = vmul.f32 1.442695, %v5045_v62 }
 0xc48   : > { %v4396_v0 = vmul.f32 %v7649_v6, %v6333_v57  ;;  %v6334_v30 = vpop.f32.mrb[126].mxu1  ;;  %v5003_v23 = vpop.xlane.xlu1 %5002 }
 0xc49   : > { %7660 = vpow2.f32 %v5080_v33  ;;  %v6335_v26 = vpop.f32.mrb[127].mxu1  ;;  %v5046_v50 = vsub.f32 %v10090_v28, %v5003_v23  ;;  %v5047_v49 = vsub.f32 %v10093_v7, %v5003_v23 }
 0xc4a   : > { %7662 = vpow2.f32 %v5082_v25  ;;  %v6336_v17 = vadd.f32 %v6335_v26, %v6334_v30  ;;  %6750 = vmatprep.mubr.msk.f32.mxu1 %vm1828_vm1, %v4396_v0 }
 0xc4b   : > { %v7653_v52 = vpop.eup %7652  ;;  %v5084_v3 = vmul.f32 1.442695, %v5046_v50  ;;  %v5086_v63 = vmul.f32 1.442695, %v5047_v49 }
 0xc4c   : > { %v7655_v1 = vpop.eup %7654  ;;  %v4397_v31 = vmul.f32 %v7651_v18, %v6336_v17  ;;  %v5006_v15 = vpop.xlane.xlu1 %5005 }
 0xc4d   : > { %7664 = vpow2.f32 %v5084_v3  ;;  %5281 = vmatprep.mubr.f32.mxu0 %v7655_v1  ;;  %v5048_v54 = vsub.f32 %v10102_v45, %v5006_v15  ;;  %v5049_v34 = vsub.f32 %v10105_v16, %v5006_v15  ;;  %v5136_v28 = vadd.f32 %v7655_v1, %v7653_v52 }
 0xc4e   : > { %7666 = vpow2.f32 %v5086_v63  ;;  %6751 = vmatmul.mubr.msk.f32.gmra.mrb[94].mxu1 %vm1828_vm1, %v4397_v31  ;;  %5282 = vmatmul.mubr.f32.vlgmr.msra.gmra.mrb[176].mxu0 %v7653_v52 }
 0xc4f   : > { %v7657_v7 = vpop.eup %7656  ;;  %v5088_v46 = vmul.f32 1.442695, %v5048_v54  ;;  %v5090_v4 = vmul.f32 1.442695, %v5049_v34  ;;  %5137 = vadd.xlane.f32.xlu0 %v5136_v28 }
 0xc50   : > { %v7659_v11 = vpop.eup %7658  ;;  %v5009_v37 = vpop.xlane.xlu0 %5008 }
 0xc51   : > { %7668 = vpow2.f32 %v5088_v46  ;;  %v5050_v22 = vsub.f32 %v10114_v8, %v5009_v37  ;;  %v5051_v39 = vsub.f32 %v10117_v59, %v5009_v37  ;;  %5286 = vmatprep.mubr.f32.mxu0 %v7659_v11  ;;  %v5139_v45 = vadd.f32 %v7659_v11, %v7657_v7 }
 0xc52   : > { %7670 = vpow2.f32 %v5090_v4  ;;  %5287 = vmatmul.mubr.f32.gmra.mrb[178].mxu0 %v7657_v7 }
 0xc53   : > { %v7661_v16 = vpop.eup %7660  ;;  %v5092_v40 = vmul.f32 1.442695, %v5050_v22  ;;  %v5094_v48 = vmul.f32 1.442695, %v5051_v39  ;;  %5140 = vadd.xlane.f32.xlu1 %v5139_v45 }
 0xc54   : > { %v7663_v14 = vpop.eup %7662  ;;  %v5012_v41 = vpop.xlane.xlu0 %5011 }
 0xc55   : > { %7672 = vpow2.f32 %v5092_v40  ;;  %v5052_v9 = vsub.f32 %v10126_v58, %v5012_v41  ;;  %v5053_v61 = vsub.f32 %v10129_v29, %v5012_v41  ;;  %5291 = vmatprep.mubr.f32.mxu0 %v7663_v14  ;;  %v5142_v35 = vadd.f32 %v7663_v14, %v7661_v16 }
 0xc56   : > { %7674 = vpow2.f32 %v5094_v48  ;;  %5292 = vmatmul.mubr.f32.gmra.mrb[180].mxu0 %v7661_v16 }
 0xc57   : > { %v7665_v8 = vpop.eup %7664  ;;  %v5096_v59 = vmul.f32 1.442695, %v5052_v9  ;;  %v5098_v32 = vmul.f32 1.442695, %v5053_v61  ;;  %5143 = vadd.xlane.f32.xlu0 %v5142_v35 }
 0xc58   : > { %v7667_v13 = vpop.eup %7666  ;;  %v5015_v36 = vpop.xlane.xlu0 %5014 }
 0xc59   : > { %7676 = vpow2.f32 %v5096_v59  ;;  %v5054_v20 = vsub.f32 %v10138_v44, %v5015_v36  ;;  %v5055_v62 = vsub.f32 %v10141_v51, %v5015_v36  ;;  %5296 = vmatprep.mubr.f32.mxu0 %v7667_v13  ;;  %v5145_v57 = vadd.f32 %v7667_v13, %v7665_v8 }
 0xc5a   : > { %7678 = vpow2.f32 %v5098_v32  ;;  %5297 = vmatmul.mubr.f32.gmra.mrb[182].mxu0 %v7665_v8 }
 0xc5b   : > { %v7669_v58 = vpop.eup %7668  ;;  %v5100_v29 = vmul.f32 1.442695, %v5054_v20  ;;  %v5102_v6 = vmul.f32 1.442695, %v5055_v62  ;;  %5146 = vadd.xlane.f32.xlu1 %v5145_v57 }
 0xc5c   : > { %v7671_v33 = vpop.eup %7670  ;;  %v5018_v25 = vpop.xlane.xlu0 %5017 }
 0xc5d   : > { %7680 = vpow2.f32 %v5100_v29  ;;  %v5056_v0 = vsub.f32 %v10150_v43, %v5018_v25  ;;  %v5057_v30 = vsub.f32 %v10153_v5, %v5018_v25  ;;  %5301 = vmatprep.mubr.f32.mxu0 %v7671_v33  ;;  %v5148_v23 = vadd.f32 %v7671_v33, %v7669_v58 }
 0xc5e   : > { %7682 = vpow2.f32 %v5102_v6  ;;  %5302 = vmatmul.mubr.f32.gmra.mrb[184].mxu0 %v7669_v58 }
 0xc5f   : > { %v7673_v44 = vpop.eup %7672  ;;  %v5104_v51 = vmul.f32 1.442695, %v5056_v0  ;;  %v5106_v26 = vmul.f32 1.442695, %v5057_v30  ;;  %5149 = vadd.xlane.f32.xlu0 %v5148_v23 }
 0xc60   : > { %v7675_v50 = vpop.eup %7674  ;;  %v5021_v49 = vpop.xlane.xlu0 %5020 }
 0xc61   : > { %7684 = vpow2.f32 %v5104_v51  ;;  %v5058_v18 = vsub.f32 %v10157_v53, %v5021_v49  ;;  %v5059_v17 = vsub.f32 %v10159_v12, %v5021_v49  ;;  %5306 = vmatprep.mubr.f32.mxu1 %v7675_v50  ;;  %v5151_v52 = vadd.f32 %v7675_v50, %v7673_v44 }
 0xc62   : > { %7686 = vpow2.f32 %v5106_v26  ;;  %5307 = vmatmul.mubr.f32.vlgmr.msra.gmra.mrb[128].mxu1 %v7673_v44 }
 0xc63   : > { %v7677_v43 = vpop.eup %7676  ;;  %v5108_v5 = vmul.f32 1.442695, %v5058_v18  ;;  %v5110_v3 = vmul.f32 1.442695, %v5059_v17  ;;  %5152 = vadd.xlane.f32.xlu1 %v5151_v52  ;;  %v5933_v17 = vld [vmem:[%s10376_s3 + $0x60] sm:$0xff]  ;;  %v5934_v52 = vld [vmem:[%s10376_s3 + $0x68] sm:$0xff] }
 0xc64   : > { %v7679_v63 = vpop.eup %7678  ;;  %v5024_v1 = vpop.xlane.xlu0 %5023 }
 0xc65   : > { %7688 = vpow2.f32 %v5108_v5  ;;  %v5060_v31 = vsub.f32 %v10163_v27, %v5024_v1  ;;  %v5061_v15 = vsub.f32 %v10165_v2, %v5024_v1  ;;  %5311 = vmatprep.mubr.f32.mxu1 %v7679_v63  ;;  %v5154_v54 = vadd.f32 %v7679_v63, %v7677_v43  ;;  %v5935_v5 = vld [vmem:[%s10376_s3 + $0x70] sm:$0xff] }
 0xc66   : > { %7690 = vpow2.f32 %v5110_v3  ;;  %5312 = vmatmul.mubr.f32.gmra.mrb[130].mxu1 %v7677_v43  ;;  %v7185_v43 = vpack.c.bf16 %v5934_v52, %v5933_v17  ;;  %v5936_v3 = vld [vmem:[%s10376_s3 + $0x78] sm:$0xff] }
 0xc67   : > { %v7681_v53 = vpop.eup %7680  ;;  %v5112_v12 = vmul.f32 1.442695, %v5060_v31  ;;  %v5114_v34 = vmul.f32 1.442695, %v5061_v15  ;;  %5155 = vadd.xlane.f32.xlu0 %v5154_v54  ;;  %v7189_v63 = vpack.c.bf16 %v5936_v3, %v5935_v5 }
 0xc68   : > { %v7683_v28 = vpop.eup %7682  ;;  %v5027_v7 = vpop.xlane.xlu1 %5026  ;;  %7186 = vmatprep.subr.bf16.mxu1 %v7185_v43 }
 0xc69   : > { %7692 = vpow2.f32 %v5112_v12  ;;  %5316 = vmatprep.mubr.f32.mxu1 %v7683_v28  ;;  %v5062_v46 = vsub.f32 %v10169_v10, %v5027_v7  ;;  %v5063_v4 = vsub.f32 %v10171_v21, %v5027_v7  ;;  %v5157_v11 = vadd.f32 %v7683_v28, %v7681_v53  ;;  %7188 = vmatpush3.bf16.msra.mxu1 %v7185_v43 }
 0xc6a   : > { %7694 = vpow2.f32 %v5114_v34  ;;  %5317 = vmatmul.mubr.f32.gmra.mrb[132].mxu1 %v7681_v53  ;;  %7190 = vmatprep.subr.bf16.mxu1 %v7189_v63 }
 0xc6b   : > { %v7685_v27 = vpop.eup %7684  ;;  %v5116_v2 = vmul.f32 1.442695, %v5062_v46  ;;  %v5118_v37 = vmul.f32 1.442695, %v5063_v4  ;;  %5158 = vadd.xlane.f32.xlu1 %v5157_v11 }
 0xc6c   : > { %v7687_v22 = vpop.eup %7686  ;;  %v5030_v39 = vpop.xlane.xlu0 %5029 }
 0xc6d   : > { %7696 = vpow2.f32 %v5116_v2  ;;  %v5064_v45 = vsub.f32 %v10175_v47, %v5030_v39  ;;  %v5065_v16 = vsub.f32 %v10177_v38, %v5030_v39  ;;  %5321 = vmatprep.mubr.f32.mxu1 %v7687_v22  ;;  %v5160_v40 = vadd.f32 %v7687_v22, %v7685_v27  ;;  %7192 = vmatpush3.bf16.msra.mxu1 %v7189_v63 }
 0xc6e   : > { %7698 = vpow2.f32 %v5118_v37  ;;  %5322 = vmatmul.mubr.f32.gmra.mrb[134].mxu1 %v7685_v27 }
 0xc6f   : > { %v7689_v10 = vpop.eup %7688  ;;  %v5120_v21 = vmul.f32 1.442695, %v5064_v45  ;;  %v5122_v48 = vmul.f32 1.442695, %v5065_v16  ;;  %5161 = vadd.xlane.f32.xlu0 %v5160_v40 }
 0xc70   : > { %v7691_v14 = vpop.eup %7690  ;;  %v5033_v41 = vpop.xlane.xlu1 %5032 }
 0xc71   : > { %7700 = vpow2.f32 %v5120_v21  ;;  %5326 = vmatprep.mubr.f32.mxu1 %v7691_v14  ;;  %v5066_v9 = vsub.f32 %v10181_v19, %v5033_v41  ;;  %v5067_v61 = vsub.f32 %v10183_v56, %v5033_v41  ;;  %v5163_v35 = vadd.f32 %v7691_v14, %v7689_v10 }
 0xc72   : > { %7702 = vpow2.f32 %v5122_v48  ;;  %5327 = vmatmul.mubr.f32.gmra.mrb[136].mxu1 %v7689_v10 }
 0xc73   : > { %v7693_v47 = vpop.eup %7692  ;;  %v5124_v38 = vmul.f32 1.442695, %v5066_v9  ;;  %v5126_v8 = vmul.f32 1.442695, %v5067_v61  ;;  %5164 = vadd.xlane.f32.xlu1 %v5163_v35 }
 0xc74   : > { %v7695_v59 = vpop.eup %7694  ;;  %v5036_v32 = vpop.xlane.xlu0 %5035 }
 0xc75   : > { %7704 = vpow2.f32 %v5124_v38  ;;  %v5068_v13 = vsub.f32 %v10187_v55, %v5036_v32  ;;  %v5069_v36 = vsub.f32 %v10189_v60, %v5036_v32  ;;  %5331 = vmatprep.mubr.f32.mxu1 %v7695_v59  ;;  %v5166_v20 = vadd.f32 %v7695_v59, %v7693_v47 }
 0xc76   : > { %7706 = vpow2.f32 %v5126_v8  ;;  %5332 = vmatmul.mubr.f32.gmra.mrb[138].mxu1 %v7693_v47 }
 0xc77   : > { %v7697_v19 = vpop.eup %7696  ;;  %v5128_v56 = vmul.f32 1.442695, %v5068_v13  ;;  %v5130_v62 = vmul.f32 1.442695, %v5069_v36  ;;  %5167 = vadd.xlane.f32.xlu0 %v5166_v20 }
 0xc78   : > { %v7699_v57 = vpop.eup %7698  ;;  %v5039_v58 = vpop.xlane.xlu1 %5038 }
 0xc79   : > { %7708 = vpow2.f32 %v5128_v56  ;;  %5336 = vmatprep.mubr.f32.mxu1 %v7699_v57  ;;  %v5070_v29 = vsub.f32 %v10193_v42, %v5039_v58  ;;  %v5071_v6 = vsub.f32 %v10195_v24, %v5039_v58  ;;  %v5169_v33 = vadd.f32 %v7699_v57, %v7697_v19 }
 0xc7a   : > { %7710 = vpow2.f32 %v5130_v62  ;;  %5337 = vmatmul.mubr.f32.gmra.mrb[140].mxu1 %v7697_v19 }
 0xc7b   : > { %v7701_v55 = vpop.eup %7700  ;;  %v5132_v60 = vmul.f32 1.442695, %v5070_v29  ;;  %v5134_v25 = vmul.f32 1.442695, %v5071_v6  ;;  %5170 = vadd.xlane.f32.xlu1 %v5169_v33 }
 0xc7c   : > { %v7703_v0 = vpop.eup %7702 }
 0xc7d   : > { %7712 = vpow2.f32 %v5132_v60  ;;  %5341 = vmatprep.mubr.f32.mxu1 %v7703_v0  ;;  %v5172_v30 = vadd.f32 %v7703_v0, %v7701_v55 }
 0xc7e   : > { %7714 = vpow2.f32 %v5134_v25  ;;  %5342 = vmatmul.mubr.f32.gmra.mrb[142].mxu1 %v7701_v55 }
 0xc7f   : > { %v7705_v23 = vpop.eup %7704  ;;  %5173 = vadd.xlane.f32.xlu0 %v5172_v30 }
 0xc80   : > { %v7707_v44 = vpop.eup %7706 }
 0xc81   : > { %5346 = vmatprep.mubr.f32.mxu1 %v7707_v44  ;;  %v5175_v42 = vadd.f32 %v7707_v44, %v7705_v23 }
 0xc82   : > { %5347 = vmatmul.mubr.f32.gmra.mrb[144].mxu1 %v7705_v23 }
 0xc83   : > { %v7709_v24 = vpop.eup %7708  ;;  %5176 = vadd.xlane.f32.xlu1 %v5175_v42 }
 0xc84   : > { %v7711_v51 = vpop.eup %7710 }
 0xc85   : > { %5351 = vmatprep.mubr.f32.mxu1 %v7711_v51  ;;  %v5178_v26 = vadd.f32 %v7711_v51, %v7709_v24 }
 0xc86   : > { %5352 = vmatmul.mubr.f32.gmra.mrb[146].mxu1 %v7709_v24 }
 0xc87   : > { %v7713_v50 = vpop.eup %7712  ;;  %5179 = vadd.xlane.f32.xlu0 %v5178_v26 }
 0xc88   : > { %v7715_v49 = vpop.eup %7714 }
 0xc89   : > { %5356 = vmatprep.mubr.f32.mxu1 %v7715_v49  ;;  %v5181_v18 = vadd.f32 %v7715_v49, %v7713_v50 }
 0xc8a   : > { %5357 = vmatmul.mubr.f32.gmra.mrb[148].mxu1 %v7713_v50 }
 0xc8b   : > { %5182 = vadd.xlane.f32.xlu1 %v5181_v18 }
 0xcdc   : > { %v5138_v1 = vpop.xlane.xlu0 %5137 }
 0xcdd   : > { %7716 = vrcp.f32 %v5138_v1 }
 0xce0   : > { %v5141_v31 = vpop.xlane.xlu1 %5140 }
 0xce1   : > { %7718 = vrcp.f32 %v5141_v31 }
 0xce4   : > { %v5144_v15 = vpop.xlane.xlu0 %5143 }
 0xce5   : > { %7720 = vrcp.f32 %v5144_v15 }
 0xce7   : > { %v7717_v28 = vpop.eup %7716 }
 0xce8   : > { %v5147_v12 = vpop.xlane.xlu1 %5146 }
 0xce9   : > { %7722 = vrcp.f32 %v5147_v12 }
 0xceb   : > { %v7719_v2 = vpop.eup %7718 }
 0xcec   : > { %v5150_v11 = vpop.xlane.xlu0 %5149 }
 0xced   : > { %7724 = vrcp.f32 %v5150_v11 }
 0xcef   : > { %v7721_v40 = vpop.eup %7720 }
 0xcf0   : > { %v5153_v45 = vpop.xlane.xlu1 %5152 }
 0xcf1   : > { %7726 = vrcp.f32 %v5153_v45 }
 0xcf3   : > { %v7723_v9 = vpop.eup %7722 }
 0xcf4   : > { %v5156_v14 = vpop.xlane.xlu0 %5155 }
 0xcf5   : > { %7728 = vrcp.f32 %v5156_v14 }
 0xcf7   : > { %v7725_v59 = vpop.eup %7724 }
 0xcf8   : > { %v5159_v38 = vpop.xlane.xlu1 %5158 }
 0xcf9   : > { %7730 = vrcp.f32 %v5159_v38 }
 0xcfb   : > { %v7727_v56 = vpop.eup %7726 }
 0xcfc   : > { %v5162_v20 = vpop.xlane.xlu0 %5161 }
 0xcfd   : > { %7732 = vrcp.f32 %v5162_v20 }
 0xcff   : > { %v7729_v33 = vpop.eup %7728 }
 0xd00   : > { %v5165_v29 = vpop.xlane.xlu1 %5164 }
 0xd01   : > { %7734 = vrcp.f32 %v5165_v29 }
 0xd03   : > { %v7731_v23 = vpop.eup %7730 }
 0xd04   : > { %v5168_v0 = vpop.xlane.xlu0 %5167 }
 0xd05   : > { %7736 = vrcp.f32 %v5168_v0 }
 0xd07   : > { %v7733_v50 = vpop.eup %7732 }
 0xd08   : > { %v5171_v51 = vpop.xlane.xlu1 %5170 }
 0xd09   : > { %7738 = vrcp.f32 %v5171_v51 }
 0xd0b   : > { %v7735_v5 = vpop.eup %7734 }
 0xd0c   : > { %v5174_v52 = vpop.xlane.xlu0 %5173 }
 0xd0d   : > { %7740 = vrcp.f32 %v5174_v52 }
 0xd10   : > { %v5177_v31 = vpop.xlane.xlu1 %5176 }
 0xd11   : > { %7742 = vrcp.f32 %v5177_v31 }
 0xd21   : > { %v6421_v54 = vpop.f32.mrb[176].mxu0 }
 0xd22   : > { %v6422_v53 = vpop.f32.mrb[177].mxu0 }
 0xd23   : > { %v6423_v34 = vadd.f32 %v6422_v53, %v6421_v54  ;;  %v7737_v54 = vpop.eup %7736 }
 0xd25   : > { %v5378_v7 = vmul.f32 %v7717_v28, %v6423_v34  ;;  %v6424_v46 = vpop.f32.mrb[178].mxu0  ;;  %v5180_v28 = vpop.xlane.xlu0 %5179 }
 0xd26   : > { %v6425_v4 = vpop.f32.mrb[179].mxu0  ;;  %7744 = vrcp.f32 %v5180_v28 }
 0xd27   : > { %v6426_v27 = vadd.f32 %v6425_v4, %v6424_v46  ;;  %6817 = vmatprep.mubr.msk.f32.mxu1 %vm1828_vm1, %v5378_v7  ;;  %v7739_v46 = vpop.eup %7738 }
 0xd29   : > { %v5379_v37 = vmul.f32 %v7719_v2, %v6426_v27  ;;  %v6427_v22 = vpop.f32.mrb[180].mxu0  ;;  %v5183_v2 = vpop.xlane.xlu1 %5182 }
 0xd2a   : > { %v6428_v39 = vpop.f32.mrb[181].mxu0  ;;  %7746 = vrcp.f32 %v5183_v2 }
 0xd2b   : > { %v6429_v16 = vadd.f32 %v6428_v39, %v6427_v22  ;;  %6818 = vmatmul.mubr.msk.f32.vlgmr.msra.gmra.mrb[80].mxu1 %vm1828_vm1, %v5379_v37  ;;  %v7741_v22 = vpop.eup %7740 }
 0xd2d   : > { %v5380_v10 = vmul.f32 %v7721_v40, %v6429_v16  ;;  %v6430_v21 = vpop.f32.mrb[182].mxu0 }
 0xd2e   : > { %v6431_v48 = vpop.f32.mrb[183].mxu0 }
 0xd2f   : > { %v6432_v41 = vadd.f32 %v6431_v48, %v6430_v21  ;;  %6820 = vmatprep.mubr.msk.f32.mxu1 %vm1828_vm1, %v5380_v10  ;;  %v7743_v10 = vpop.eup %7742 }
 0xd31   : > { %v5381_v61 = vmul.f32 %v7723_v9, %v6432_v41  ;;  %v6433_v35 = vpop.f32.mrb[184].mxu0  ;;  %v7745_v9 = vpop.eup %7744 }
 0xd32   : > { %v6434_v47 = vpop.f32.mrb[185].mxu0 }
 0xd33   : > { %v6435_v8 = vadd.f32 %v6434_v47, %v6433_v35  ;;  %6821 = vmatmul.mubr.msk.f32.gmra.mrb[82].mxu1 %vm1828_vm1, %v5381_v61 }
 0xd35   : > { %v5382_v32 = vmul.f32 %v7725_v59, %v6435_v8  ;;  %v6436_v13 = vpop.f32.mrb[128].mxu1  ;;  %v7747_v8 = vpop.eup %7746 }
 0xd36   : > { %v6437_v36 = vpop.f32.mrb[129].mxu1 }
 0xd37   : > { %v6438_v19 = vadd.f32 %v6437_v36, %v6436_v13  ;;  %6823 = vmatprep.mubr.msk.f32.mxu1 %vm1828_vm1, %v5382_v32  ;;  %v5953_v32 = vld [vmem:[%s10377_s4] ss:$0 sm:$0xff] }
 0xd39   : > { %v5383_v62 = vmul.f32 %v7727_v56, %v6438_v19  ;;  %v6439_v57 = vpop.f32.mrb[130].mxu1 }
 0xd3a   : > { %v6440_v58 = vpop.f32.mrb[131].mxu1 }
 0xd3b   : > { %v6441_v6 = vadd.f32 %v6440_v58, %v6439_v57  ;;  %6824 = vmatmul.mubr.msk.f32.gmra.mrb[84].mxu1 %vm1828_vm1, %v5383_v62 }
 0xd3d   : > { %v5384_v55 = vmul.f32 %v7729_v33, %v6441_v6  ;;  %v6442_v60 = vpop.f32.mrb[132].mxu1 }
 0xd3e   : > { %v6443_v25 = vpop.f32.mrb[133].mxu1 }
 0xd3f   : > { %v6444_v30 = vadd.f32 %v6443_v25, %v6442_v60  ;;  %6826 = vmatprep.mubr.msk.f32.mxu1 %vm1828_vm1, %v5384_v55 }
 0xd41   : > { %v5385_v44 = vmul.f32 %v7731_v23, %v6444_v30  ;;  %v6445_v42 = vpop.f32.mrb[134].mxu1 }
 0xd42   : > { %v6446_v24 = vpop.f32.mrb[135].mxu1 }
 0xd43   : > { %v6447_v26 = vadd.f32 %v6446_v24, %v6445_v42  ;;  %6827 = vmatmul.mubr.msk.f32.gmra.mrb[86].mxu1 %vm1828_vm1, %v5385_v44 }
 0xd45   : > { %v5386_v49 = vmul.f32 %v7733_v50, %v6447_v26  ;;  %v6448_v18 = vpop.f32.mrb[136].mxu1 }
 0xd46   : > { %v6449_v17 = vpop.f32.mrb[137].mxu1 }
 0xd47   : > { %v6450_v43 = vadd.f32 %v6449_v17, %v6448_v18  ;;  %6829 = vmatprep.mubr.msk.f32.mxu1 %vm1828_vm1, %v5386_v49 }
 0xd49   : > { %v5387_v3 = vmul.f32 %v7735_v5, %v6450_v43  ;;  %v6451_v63 = vpop.f32.mrb[138].mxu1 }
 0xd4a   : > { %v6452_v1 = vpop.f32.mrb[139].mxu1 }
 0xd4b   : > { %v6453_v15 = vadd.f32 %v6452_v1, %v6451_v63  ;;  %6830 = vmatmul.mubr.msk.f32.gmra.mrb[88].mxu1 %vm1828_vm1, %v5387_v3 }
 0xd4d   : > { %v5388_v53 = vmul.f32 %v7737_v54, %v6453_v15  ;;  %v6454_v12 = vpop.f32.mrb[140].mxu1 }
 0xd4e   : > { %v6455_v34 = vpop.f32.mrb[141].mxu1 }
 0xd4f   : > { %v6456_v7 = vadd.f32 %v6455_v34, %v6454_v12  ;;  %6832 = vmatprep.mubr.msk.f32.mxu1 %vm1828_vm1, %v5388_v53 }
 0xd51   : > { %v5389_v4 = vmul.f32 %v7739_v46, %v6456_v7  ;;  %v6457_v11 = vpop.f32.mrb[142].mxu1 }
 0xd52   : > { %v6458_v27 = vpop.f32.mrb[143].mxu1 }
 0xd53   : > { %v6459_v37 = vadd.f32 %v6458_v27, %v6457_v11  ;;  %6833 = vmatmul.mubr.msk.f32.gmra.mrb[90].mxu1 %vm1828_vm1, %v5389_v4 }
 0xd55   : > { %v5390_v39 = vmul.f32 %v7741_v22, %v6459_v37  ;;  %v6460_v45 = vpop.f32.mrb[144].mxu1 }
 0xd56   : > { %v6461_v16 = vpop.f32.mrb[145].mxu1 }
 0xd57   : > { %v6462_v40 = vadd.f32 %v6461_v16, %v6460_v45  ;;  %6835 = vmatprep.mubr.msk.f32.mxu1 %vm1828_vm1, %v5390_v39 }
 0xd59   : > { %v5391_v21 = vmul.f32 %v7743_v10, %v6462_v40  ;;  %v6463_v48 = vpop.f32.mrb[146].mxu1 }
 0xd5a   : > { %v6464_v14 = vpop.f32.mrb[147].mxu1 }
 0xd5b   : > { %v6465_v41 = vadd.f32 %v6464_v14, %v6463_v48  ;;  %6836 = vmatmul.mubr.msk.f32.gmra.mrb[92].mxu1 %vm1828_vm1, %v5391_v21 }
 0xd5d   : > { %v5392_v61 = vmul.f32 %v7745_v9, %v6465_v41  ;;  %v6466_v35 = vpop.f32.mrb[148].mxu1 }
 0xd5e   : > { %v6467_v47 = vpop.f32.mrb[149].mxu1 }
 0xd5f   : > { %v6468_v38 = vadd.f32 %v6467_v47, %v6466_v35  ;;  %6838 = vmatprep.mubr.msk.f32.mxu1 %vm1828_vm1, %v5392_v61 }
 0xd61   : > { %v5393_v59 = vmul.f32 %v7747_v8, %v6468_v38 }
 0xd63   : > { %6839 = vmatmul.mubr.msk.f32.gmra.mrb[94].mxu1 %vm1828_vm1, %v5393_v59 }
 0xdfe   : > { %v6819_v13 = vpop.f32.mrb[80].mxu1 }
 0xdff   : > { %v5616_v36 = vadd.f32 %v6819_v13, %v5953_v32  ;;  %v5513_v20 = vpop.f32.mrb[81].mxu1 }
 0xe00   : > { %v5615_v19 = vadd.f32 %v5953_v32, %v5513_v20 }
 0xe01   : > { %5632 = vst [vmem:[%s8052_s17 + $0x8] sm:$0xff] %v5616_v36 }
 0xe02   : > { %5631 = vst [vmem:[%s8052_s17] sm:$0xff] %v5615_v19 }
 0xe06   : > { %v6822_v56 = vpop.f32.mrb[82].mxu1 }
 0xe07   : > { %v5618_v62 = vadd.f32 %v6822_v56, %v5953_v32  ;;  %v5523_v57 = vpop.f32.mrb[83].mxu1 }
 0xe08   : > { %v5617_v58 = vadd.f32 %v5953_v32, %v5523_v57 }
 0xe09   : > { %5634 = vst [vmem:[%s8052_s17 + $0x18] sm:$0xff] %v5618_v62 }
 0xe0a   : > { %5633 = vst [vmem:[%s8052_s17 + $0x10] sm:$0xff] %v5617_v58 }
 0xe0e   : > { %v6825_v29 = vpop.f32.mrb[84].mxu1 }
 0xe0f   : > { %v5620_v6 = vadd.f32 %v6825_v29, %v5953_v32  ;;  %v5533_v33 = vpop.f32.mrb[85].mxu1 }
 0xe10   : > { %v5619_v55 = vadd.f32 %v5953_v32, %v5533_v33 }
 0xe11   : > { %5636 = vst [vmem:[%s8052_s17 + $0x28] sm:$0xff] %v5620_v6 }
 0xe12   : > { %5635 = vst [vmem:[%s8052_s17 + $0x20] sm:$0xff] %v5619_v55 }
 0xe16   : > { %v6828_v60 = vpop.f32.mrb[86].mxu1 }
 0xe17   : > { %v5622_v25 = vadd.f32 %v6828_v60, %v5953_v32  ;;  %v5543_v0 = vpop.f32.mrb[87].mxu1 }
 0xe18   : > { %v5621_v30 = vadd.f32 %v5953_v32, %v5543_v0 }
 0xe19   : > { %5638 = vst [vmem:[%s8052_s17 + $0x38] sm:$0xff] %v5622_v25 }
 0xe1a   : > { %5637 = vst [vmem:[%s8052_s17 + $0x30] sm:$0xff] %v5621_v30 }
 0xe1e   : > { %v6831_v23 = vpop.f32.mrb[88].mxu1 }
 0xe1f   : > { %v5624_v44 = vadd.f32 %v6831_v23, %v5953_v32  ;;  %v5553_v42 = vpop.f32.mrb[89].mxu1 }
 0xe20   : > { %v5623_v24 = vadd.f32 %v5953_v32, %v5553_v42 }
 0xe21   : > { %5640 = vst [vmem:[%s8052_s17 + $0x48] sm:$0xff] %v5624_v44 }
 0xe22   : > { %5639 = vst [vmem:[%s8052_s17 + $0x40] sm:$0xff] %v5623_v24 }
 0xe26   : > { %v6834_v51 = vpop.f32.mrb[90].mxu1 }
 0xe27   : > { %v5626_v26 = vadd.f32 %v6834_v51, %v5953_v32  ;;  %v5563_v50 = vpop.f32.mrb[91].mxu1 }
 0xe28   : > { %v5625_v49 = vadd.f32 %v5953_v32, %v5563_v50 }
 0xe29   : > { %5642 = vst [vmem:[%s8052_s17 + $0x58] sm:$0xff] %v5626_v26 }
 0xe2a   : > { %5641 = vst [vmem:[%s8052_s17 + $0x50] sm:$0xff] %v5625_v49 }
 0xe2e   : > { %v6837_v18 = vpop.f32.mrb[92].mxu1 }
 0xe2f   : > { %v5628_v17 = vadd.f32 %v6837_v18, %v5953_v32  ;;  %v5573_v52 = vpop.f32.mrb[93].mxu1 }
 0xe30   : > { %v5627_v43 = vadd.f32 %v5953_v32, %v5573_v52 }
 0xe31   : > { %5644 = vst [vmem:[%s8052_s17 + $0x68] sm:$0xff] %v5628_v17 }
 0xe32   : > { %5643 = vst [vmem:[%s8052_s17 + $0x60] sm:$0xff] %v5627_v43 }
 0xe36   : > { %v6840_v5 = vpop.f32.mrb[94].mxu1 }
 0xe37   : > { %v5630_v3 = vadd.f32 %v6840_v5, %v5953_v32  ;;  %v5583_v63 = vpop.f32.mrb[95].mxu1 }
 0xe38   : > { %v5629_v1 = vadd.f32 %v5953_v32, %v5583_v63 }
 0xe39   : > { %5646 = vst [vmem:[%s8052_s17 + $0x78] sm:$0xff] %v5630_v3 }
 0xe3a   : > { %5645 = vst [vmem:[%s8052_s17 + $0x70] sm:$0xff] %v5629_v1 }
 0xe3b   : > { %7805 = shalt.err (!%p7802_p9)
}
 0xe3c   : > { %s7806_s17 = scalar_lea.hbm %s10313_s21, 2048  ;;  %s7810_s30 = scalar_lea.hbm %s10378_s5, 8192 }
 0xe3d   : > { %p7807_p11 = scmp.ne.s32.totalorder %s10313_s21, %s7806_s17  ;;  %p7811_p4 = scmp.lt.u32.totalorder %s10313_s21, %s10378_s5 }
 0xe3e   : > { %p7812_p3 = scmp.lt.u32.totalorder %s7810_s30, %s7806_s17  ;;  %p7814_p10 = scmp.lt.u32.totalorder %s7806_s17, %s10313_s21 }
 0xe3f   : > { %p7808_p13 = pnand %p7807_p11, %p10601_p12 }
 0xe40   : > { %p7813_p8 = por %p7812_p3, %p7811_p4 }
 0xe41   : > { %p7809_p1 = pneg %p7808_p13 }
 0xe42   : > { %p7815_p0 = por %p7814_p10, %p7813_p8 }
 0xe44   : > { %p7816_p2 = pnand %p7815_p0, %p7809_p1 }
 0xe46   : > { %7819 = shalt.err (!%p7816_p2)
}
 0xe47   : > { %s7901_s27 = smov 128   ;;  %s7902_s22 = smov 8  }
 0xe48   : > { %7277 = dma.vmem_to_hbm [thread:$0]  (%p10601_p12), %s10315_s11, 2048, %s10313_s21, %s10321_s6, %s7901_s27, %s7901_s27, %s7902_s22  }
 0xe49 PF: > { %p7289_p5 = scmp.ge.s32.totalorder %s7890_s25, 2  ;;  %s5678_s9 = sand.u32 1, %s7862_s18  }
 0xe4a   : > { %p10602_p6 = scmp.ne.s32.totalorder %s10420_s8, 0  ;;  %s5679_s16 = scalar_lea.sflag [#allocation6], %s5678_s9 }
 0xe4c   : > { %p7284_p7 = pnand %p7289_p5, %p10602_p6 }
 0xe4e   : > { %7857 = dma.done.wait (!%p7284_p7), %s5679_s16, 2048  }
 0xe4f   : > { %7859 = vsyncadd (!%p7284_p7), %s5679_s16, 4294965248  ;;  %s19_s25 = sadd.s32 1, %s7890_s25   ;;  %s10603_s18 = smov %s7866_s19 }
 0xe50   : > { %p16_p9 = scmp.ge.s32.totalorder %s19_s25, 6   ;;  %s10604_s19 = smov %s7870_s20 }
 0xe51   : > { %s10605_s20 = smov %s8012_s13  ;;  %s10606_s21 = smov %s7882_s23 }
 0xe52   : > { %s10607_s22 = smov %s7886_s24  ;;  %s10608_s23 = smov %s10611_s28 }
 0xe53   : > { %s10609_s24 = smov %s10615_s29  ;;  %18 = sbr.rel (!%p16_p9) target bundleno = 8 (0x8), region = 103 }
 0xe5a   :  { %5684 = vsyncpa [#allocation5], 1 }
 0xe5b   :  { %5686 = vsyncpa [#allocation5 + $0x1], 1 }
 0xe5c   :  { %5687 = vsyncpa [#allocation6], 1 }
 0xe5d   :  { %5689 = vsyncpa [#allocation6 + $0x1], 1 }

</bundles_post_ra>
